<compile_context>
chip_gen: v7x
topology: tpu7x:2x2x1
jax: 0.10.0
libtpu: 0.0.40
codegen_flags: <defaults>
</compile_context>

<pallas_src>
import numpy as np
import jax
import jax.numpy as jnp
from jax import lax
from jax.experimental import pallas as pl
from jax.experimental.pallas import tpu as pltpu


# ---------------------------------------------------------------------------
# Fused kernel: one grid step = one batch block (gram + linear + bias)
# ---------------------------------------------------------------------------
def _fused_gram_linear_kernel(x_ref, w_ref, b_ref, o_ref, g_ref):
    """x_ref : (BB, T, D)  compute dtype   batch block of x_list[1]
       w_ref : (D, D, L)   compute dtype   plane i == W^T[i*D:(i+1)*D, :];
                                           constant index_map -> VMEM resident
       b_ref : (1, L)      float32         bias row
       o_ref : (BB, L)     float32         output block
       g_ref : (BB, D, D)  compute dtype   VMEM scratch for the batched gram
    """
    BB, T, D = x_ref.shape

    x = x_ref[...]
    # Batched gram: g[b] = x[b]^T @ x[b]  (contract the sequence axis T),
    # computed for the whole batch block in one dot_general, f32 accumulation.
    g_ref[...] = lax.dot_general(
        x, x,
        dimension_numbers=(((1,), (1,)), ((0,), (0,))),
        preferred_element_type=jnp.float32,
    ).astype(g_ref.dtype)

    # flatten(g) @ W^T  ==  sum_i g[:, i, :] @ W3[i]   with M = BB on the MXU.
    acc = jnp.dot(g_ref[:, 0, :], w_ref[0], preferred_element_type=jnp.float32)
    for i in range(1, D):                       # static unroll over 58 planes
        acc = acc + jnp.dot(
            g_ref[:, i, :],                     # (BB, D)
            w_ref[i],                           # (D, L) tile-aligned plane
            preferred_element_type=jnp.float32,
        )
    # Single full-block store (bias broadcast-added once).
    o_ref[...] = (acc + b_ref[...]).astype(o_ref.dtype)


# ---------------------------------------------------------------------------
# One-time parameter re-layout (hoisted out of the forward pass)
# ---------------------------------------------------------------------------
def prepare_params(weight, bias, *, compute_dtype=jnp.bfloat16):
    """weight: (L, D*D) as in nn.Linear(D*D, L); bias: (L,).

    Returns:
      weight3 : (D, D, L) compute_dtype, plane i == W^T[i*D:(i+1)*D, :]
      bias_row: (1, L)    float32
    """
    L, DD = weight.shape
    D = int(round(np.sqrt(DD)))
    assert D * D == DD
    weight3 = (jnp.asarray(weight, jnp.float32).T
               .reshape(D, D, L).astype(compute_dtype))
    bias_row = jnp.asarray(bias, jnp.float32).reshape(1, L)
    return weight3, bias_row


# ---------------------------------------------------------------------------
# Forward pass
# ---------------------------------------------------------------------------
def sup_namedata_rnn_forward(x_list, weight3, bias_row, *, batch_block=128,
                             compute_dtype=jnp.bfloat16):
    """x_list : list of arrays; only x_list[1] of shape (B, T, 58) is used.
       weight3: (58, 58, last_dims)  pre-reshaped Linear weight (prepare_params)
       bias_row: (1, last_dims) float32
       returns: (B, last_dims) float32
    """
    x1 = jnp.asarray(x_list[1])
    B, T, D = x1.shape
    Dw0, Dw1, L = weight3.shape
    assert Dw0 == D and Dw1 == D

    # Batch block: at most `batch_block` (use 256 on v6e/v7x for full MXU rows),
    # at least a multiple of 8 sublanes. Pad B up to a block multiple instead
    # of collapsing to one giant block (bounded VMEM; >=2 grid steps for the
    # two v7x TensorCores once B > batch_block).
    if B >= batch_block:
        bb = batch_block
    else:
        bb = max(8, ((B + 7) // 8) * 8)
    B_pad = ((B + bb - 1) // bb) * bb

    x1c = x1.astype(compute_dtype)
    if B_pad != B:
        x1c = jnp.pad(x1c, ((0, B_pad - B), (0, 0), (0, 0)))

    out = pl.pallas_call(
        _fused_gram_linear_kernel,
        out_shape=jax.ShapeDtypeStruct((B_pad, L), jnp.float32),
        grid=(B_pad // bb,),
        in_specs=[
            pl.BlockSpec((bb, T, D), lambda g: (g, 0, 0)),
            # constant block index -> weight stays resident in VMEM across steps
            pl.BlockSpec((D, D, L), lambda g: (0, 0, 0)),
            pl.BlockSpec((1, L), lambda g: (0, 0)),
        ],
        out_specs=pl.BlockSpec((bb, L), lambda g: (g, 0)),
        scratch_shapes=[pltpu.VMEM((bb, D, D), compute_dtype)],
        compiler_params=pltpu.CompilerParams(
            dimension_semantics=("parallel",),
        ),
    )(x1c, weight3, bias_row)

    return out[:B] if B_pad != B else out


# ---------------------------------------------------------------------------
# Deterministic parameter init (mimics nn.Linear default U(-1/sqrt(in), 1/sqrt(in)))
# ---------------------------------------------------------------------------
def init_params(key, in_features, out_features):
    kw, kb = jax.random.split(key)
    bound = 1.0 / np.sqrt(in_features)
    weight = jax.random.uniform(
        kw, (out_features, in_features), jnp.float32, -bound, bound
    )
    bias = jax.random.uniform(kb, (out_features,), jnp.float32, -bound, bound)
    return weight, bias


if __name__ == "__main__":
    key = jax.random.PRNGKey(0)
    k_x0, k_x1, k_p = jax.random.split(key, 3)

    B, T, D = 2, 8, 58          # D = 58 fixed by the module (Linear(58*58, ...))
    last_dims = 32

    # x_list: only element 1 is consumed by forward; element 0 supplies batch size.
    x0 = jax.random.normal(k_x0, (B, 3, 2), jnp.float32)
    x1 = jax.random.normal(k_x1, (B, T, D), jnp.float32)
    x_list = [x0, x1]

    weight, bias = init_params(k_p, D * D, last_dims)
    # Hoisted out of the forward pass: done once at init, not per call.
    weight3, bias_row = prepare_params(weight, bias)

    fwd = jax.jit(sup_namedata_rnn_forward)
    y = jax.block_until_ready(fwd(x_list, weight3, bias_row))

    # Pure-JAX f32 reference. Kernel uses bf16 MXU operands with f32
    # accumulation, so compare with a loose tolerance.
    gram_ref = jnp.einsum("bti,btj->bij", x1, x1)
    y_ref = gram_ref.reshape(B, -1) @ weight.T + bias
    assert y.shape == (B, last_dims)
    np.testing.assert_allclose(np.asarray(y), np.asarray(y_ref), rtol=3e-2, atol=3e-2)

    print("KERNEL_OK")
</pallas_src>

<mosaic_0001>
module attributes {stable_mosaic.version = 11 : i64} {
  func.func @_fused_gram_linear_kernel(%arg0: i32, %arg1: memref<8x8x58xbf16, #tpu.memory_space<vmem>>, %arg2: memref<58x58x32xbf16, #tpu.memory_space<vmem>>, %arg3: memref<1x32xf32, #tpu.memory_space<vmem>>, %arg4: memref<8x32xf32, #tpu.memory_space<vmem>>, %arg5: memref<8x58x58xbf16, #tpu.memory_space<vmem>>) attributes {dimension_semantics = [#tpu.dimension_semantics<parallel>], iteration_bounds = array<i64: 1>, scalar_prefetch = 0 : i64, scratch_operands = 1 : i64, tpu.core_type = #tpu.core_type<tc>, window_params = [{transform_indices = @transform_0, window_bounds = array<i64: 8, 8, 58>}, {pipeline_mode = #tpu.pipeline_mode<synchronous>, transform_indices = @transform_1, window_bounds = array<i64: 58, 58, 32>}, {pipeline_mode = #tpu.pipeline_mode<synchronous>, transform_indices = @transform_2, window_bounds = array<i64: 1, 32>}, {transform_indices = @transform_3, window_bounds = array<i64: 8, 32>}]} {
    %c0 = arith.constant 0 : index
    %c0_0 = arith.constant 0 : index
    %c0_1 = arith.constant 0 : index
    %0 = vector.load %arg1[%c0, %c0_0, %c0_1] : memref<8x8x58xbf16, #tpu.memory_space<vmem>>, vector<8x8x58xbf16>
    %cst = arith.constant dense<0.000000e+00> : vector<8x58x58xf32>
    %1 = tpu.matmul %0, %0, %cst {dimension_numbers = #tpu.dot_dimension_numbers<[1], [1], [2], [2], [0, 0, 0, 2, 1, 2], [0], [0]>} : vector<8x8x58xbf16>, vector<8x8x58xbf16>, vector<8x58x58xf32> -> vector<8x58x58xf32>
    %2 = arith.truncf %1 : vector<8x58x58xf32> to vector<8x58x58xbf16>
    %c0_2 = arith.constant 0 : index
    %c0_3 = arith.constant 0 : index
    %c0_4 = arith.constant 0 : index
    %3 = vector.load %arg5[%c0_2, %c0_3, %c0_4] : memref<8x58x58xbf16, #tpu.memory_space<vmem>>, vector<8x58x58xbf16>
    tpu.vector_store %arg5[%c0_2, %c0_3, %c0_4], %2 {strides = array<i32>} : memref<8x58x58xbf16, #tpu.memory_space<vmem>>, vector<8x58x58xbf16>,
    %c0_5 = arith.constant 0 : index
    %c0_6 = arith.constant 0 : index
    %c0_7 = arith.constant 0 : index
    %4 = vector.load %arg5[%c0_5, %c0_6, %c0_7] : memref<8x58x58xbf16, #tpu.memory_space<vmem>>, vector<8x1x58xbf16>
    %5 = vector.shape_cast %4 : vector<8x1x58xbf16> to vector<8x58xbf16>
    %c0_8 = arith.constant 0 : index
    %c0_9 = arith.constant 0 : index
    %c0_10 = arith.constant 0 : index
    %6 = vector.load %arg2[%c0_8, %c0_9, %c0_10] : memref<58x58x32xbf16, #tpu.memory_space<vmem>>, vector<1x58x32xbf16>
    %7 = vector.shape_cast %6 : vector<1x58x32xbf16> to vector<58x32xbf16>
    %cst_11 = arith.constant dense<0.000000e+00> : vector<8x32xf32>
    %8 = tpu.matmul %5, %7, %cst_11 {dimension_numbers = #tpu.dot_dimension_numbers<[1], [0], [0], [1], [0, 0, 1, 1], [], []>} : vector<8x58xbf16>, vector<58x32xbf16>, vector<8x32xf32> -> vector<8x32xf32>
    %c0_12 = arith.constant 0 : index
    %c1 = arith.constant 1 : index
    %c0_13 = arith.constant 0 : index
    %9 = vector.load %arg5[%c0_12, %c1, %c0_13] : memref<8x58x58xbf16, #tpu.memory_space<vmem>>, vector<8x1x58xbf16>
    %10 = vector.shape_cast %9 : vector<8x1x58xbf16> to vector<8x58xbf16>
    %c1_14 = arith.constant 1 : index
    %c0_15 = arith.constant 0 : index
    %c0_16 = arith.constant 0 : index
    %11 = vector.load %arg2[%c1_14, %c0_15, %c0_16] : memref<58x58x32xbf16, #tpu.memory_space<vmem>>, vector<1x58x32xbf16>
    %12 = vector.shape_cast %11 : vector<1x58x32xbf16> to vector<58x32xbf16>
    %cst_17 = arith.constant dense<0.000000e+00> : vector<8x32xf32>
    %13 = tpu.matmul %10, %12, %cst_17 {dimension_numbers = #tpu.dot_dimension_numbers<[1], [0], [0], [1], [0, 0, 1, 1], [], []>} : vector<8x58xbf16>, vector<58x32xbf16>, vector<8x32xf32> -> vector<8x32xf32>
    %14 = arith.addf %8, %13 : vector<8x32xf32>
    %c0_18 = arith.constant 0 : index
    %c2 = arith.constant 2 : index
    %c0_19 = arith.constant 0 : index
    %15 = vector.load %arg5[%c0_18, %c2, %c0_19] : memref<8x58x58xbf16, #tpu.memory_space<vmem>>, vector<8x1x58xbf16>
    %16 = vector.shape_cast %15 : vector<8x1x58xbf16> to vector<8x58xbf16>
    %c2_20 = arith.constant 2 : index
    %c0_21 = arith.constant 0 : index
    %c0_22 = arith.constant 0 : index
    %17 = vector.load %arg2[%c2_20, %c0_21, %c0_22] : memref<58x58x32xbf16, #tpu.memory_space<vmem>>, vector<1x58x32xbf16>
    %18 = vector.shape_cast %17 : vector<1x58x32xbf16> to vector<58x32xbf16>
    %cst_23 = arith.constant dense<0.000000e+00> : vector<8x32xf32>
    %19 = tpu.matmul %16, %18, %cst_23 {dimension_numbers = #tpu.dot_dimension_numbers<[1], [0], [0], [1], [0, 0, 1, 1], [], []>} : vector<8x58xbf16>, vector<58x32xbf16>, vector<8x32xf32> -> vector<8x32xf32>
    %20 = arith.addf %14, %19 : vector<8x32xf32>
    %c0_24 = arith.constant 0 : index
    %c3 = arith.constant 3 : index
    %c0_25 = arith.constant 0 : index
    %21 = vector.load %arg5[%c0_24, %c3, %c0_25] : memref<8x58x58xbf16, #tpu.memory_space<vmem>>, vector<8x1x58xbf16>
    %22 = vector.shape_cast %21 : vector<8x1x58xbf16> to vector<8x58xbf16>
    %c3_26 = arith.constant 3 : index
    %c0_27 = arith.constant 0 : index
    %c0_28 = arith.constant 0 : index
    %23 = vector.load %arg2[%c3_26, %c0_27, %c0_28] : memref<58x58x32xbf16, #tpu.memory_space<vmem>>, vector<1x58x32xbf16>
    %24 = vector.shape_cast %23 : vector<1x58x32xbf16> to vector<58x32xbf16>
    %cst_29 = arith.constant dense<0.000000e+00> : vector<8x32xf32>
    %25 = tpu.matmul %22, %24, %cst_29 {dimension_numbers = #tpu.dot_dimension_numbers<[1], [0], [0], [1], [0, 0, 1, 1], [], []>} : vector<8x58xbf16>, vector<58x32xbf16>, vector<8x32xf32> -> vector<8x32xf32>
    %26 = arith.addf %20, %25 : vector<8x32xf32>
    %c0_30 = arith.constant 0 : index
    %c4 = arith.constant 4 : index
    %c0_31 = arith.constant 0 : index
    %27 = vector.load %arg5[%c0_30, %c4, %c0_31] : memref<8x58x58xbf16, #tpu.memory_space<vmem>>, vector<8x1x58xbf16>
    %28 = vector.shape_cast %27 : vector<8x1x58xbf16> to vector<8x58xbf16>
    %c4_32 = arith.constant 4 : index
    %c0_33 = arith.constant 0 : index
    %c0_34 = arith.constant 0 : index
    %29 = vector.load %arg2[%c4_32, %c0_33, %c0_34] : memref<58x58x32xbf16, #tpu.memory_space<vmem>>, vector<1x58x32xbf16>
    %30 = vector.shape_cast %29 : vector<1x58x32xbf16> to vector<58x32xbf16>
    %cst_35 = arith.constant dense<0.000000e+00> : vector<8x32xf32>
    %31 = tpu.matmul %28, %30, %cst_35 {dimension_numbers = #tpu.dot_dimension_numbers<[1], [0], [0], [1], [0, 0, 1, 1], [], []>} : vector<8x58xbf16>, vector<58x32xbf16>, vector<8x32xf32> -> vector<8x32xf32>
    %32 = arith.addf %26, %31 : vector<8x32xf32>
    %c0_36 = arith.constant 0 : index
    %c5 = arith.constant 5 : index
    %c0_37 = arith.constant 0 : index
    %33 = vector.load %arg5[%c0_36, %c5, %c0_37] : memref<8x58x58xbf16, #tpu.memory_space<vmem>>, vector<8x1x58xbf16>
    %34 = vector.shape_cast %33 : vector<8x1x58xbf16> to vector<8x58xbf16>
    %c5_38 = arith.constant 5 : index
    %c0_39 = arith.constant 0 : index
    %c0_40 = arith.constant 0 : index
    %35 = vector.load %arg2[%c5_38, %c0_39, %c0_40] : memref<58x58x32xbf16, #tpu.memory_space<vmem>>, vector<1x58x32xbf16>
    %36 = vector.shape_cast %35 : vector<1x58x32xbf16> to vector<58x32xbf16>
    %cst_41 = arith.constant dense<0.000000e+00> : vector<8x32xf32>
    %37 = tpu.matmul %34, %36, %cst_41 {dimension_numbers = #tpu.dot_dimension_numbers<[1], [0], [0], [1], [0, 0, 1, 1], [], []>} : vector<8x58xbf16>, vector<58x32xbf16>, vector<8x32xf32> -> vector<8x32xf32>
    %38 = arith.addf %32, %37 : vector<8x32xf32>
    %c0_42 = arith.constant 0 : index
    %c6 = arith.constant 6 : index
    %c0_43 = arith.constant 0 : index
    %39 = vector.load %arg5[%c0_42, %c6, %c0_43] : memref<8x58x58xbf16, #tpu.memory_space<vmem>>, vector<8x1x58xbf16>
    %40 = vector.shape_cast %39 : vector<8x1x58xbf16> to vector<8x58xbf16>
    %c6_44 = arith.constant 6 : index
    %c0_45 = arith.constant 0 : index
    %c0_46 = arith.constant 0 : index
    %41 = vector.load %arg2[%c6_44, %c0_45, %c0_46] : memref<58x58x32xbf16, #tpu.memory_space<vmem>>, vector<1x58x32xbf16>
    %42 = vector.shape_cast %41 : vector<1x58x32xbf16> to vector<58x32xbf16>
    %cst_47 = arith.constant dense<0.000000e+00> : vector<8x32xf32>
    %43 = tpu.matmul %40, %42, %cst_47 {dimension_numbers = #tpu.dot_dimension_numbers<[1], [0], [0], [1], [0, 0, 1, 1], [], []>} : vector<8x58xbf16>, vector<58x32xbf16>, vector<8x32xf32> -> vector<8x32xf32>
    %44 = arith.addf %38, %43 : vector<8x32xf32>
    %c0_48 = arith.constant 0 : index
    %c7 = arith.constant 7 : index
    %c0_49 = arith.constant 0 : index
    %45 = vector.load %arg5[%c0_48, %c7, %c0_49] : memref<8x58x58xbf16, #tpu.memory_space<vmem>>, vector<8x1x58xbf16>
    %46 = vector.shape_cast %45 : vector<8x1x58xbf16> to vector<8x58xbf16>
    %c7_50 = arith.constant 7 : index
    %c0_51 = arith.constant 0 : index
    %c0_52 = arith.constant 0 : index
    %47 = vector.load %arg2[%c7_50, %c0_51, %c0_52] : memref<58x58x32xbf16, #tpu.memory_space<vmem>>, vector<1x58x32xbf16>
    %48 = vector.shape_cast %47 : vector<1x58x32xbf16> to vector<58x32xbf16>
    %cst_53 = arith.constant dense<0.000000e+00> : vector<8x32xf32>
    %49 = tpu.matmul %46, %48, %cst_53 {dimension_numbers = #tpu.dot_dimension_numbers<[1], [0], [0], [1], [0, 0, 1, 1], [], []>} : vector<8x58xbf16>, vector<58x32xbf16>, vector<8x32xf32> -> vector<8x32xf32>
    %50 = arith.addf %44, %49 : vector<8x32xf32>
    %c0_54 = arith.constant 0 : index
    %c8 = arith.constant 8 : index
    %c0_55 = arith.constant 0 : index
    %51 = vector.load %arg5[%c0_54, %c8, %c0_55] : memref<8x58x58xbf16, #tpu.memory_space<vmem>>, vector<8x1x58xbf16>
    %52 = vector.shape_cast %51 : vector<8x1x58xbf16> to vector<8x58xbf16>
    %c8_56 = arith.constant 8 : index
    %c0_57 = arith.constant 0 : index
    %c0_58 = arith.constant 0 : index
    %53 = vector.load %arg2[%c8_56, %c0_57, %c0_58] : memref<58x58x32xbf16, #tpu.memory_space<vmem>>, vector<1x58x32xbf16>
    %54 = vector.shape_cast %53 : vector<1x58x32xbf16> to vector<58x32xbf16>
    %cst_59 = arith.constant dense<0.000000e+00> : vector<8x32xf32>
    %55 = tpu.matmul %52, %54, %cst_59 {dimension_numbers = #tpu.dot_dimension_numbers<[1], [0], [0], [1], [0, 0, 1, 1], [], []>} : vector<8x58xbf16>, vector<58x32xbf16>, vector<8x32xf32> -> vector<8x32xf32>
    %56 = arith.addf %50, %55 : vector<8x32xf32>
    %c0_60 = arith.constant 0 : index
    %c9 = arith.constant 9 : index
    %c0_61 = arith.constant 0 : index
    %57 = vector.load %arg5[%c0_60, %c9, %c0_61] : memref<8x58x58xbf16, #tpu.memory_space<vmem>>, vector<8x1x58xbf16>
    %58 = vector.shape_cast %57 : vector<8x1x58xbf16> to vector<8x58xbf16>
    %c9_62 = arith.constant 9 : index
    %c0_63 = arith.constant 0 : index
    %c0_64 = arith.constant 0 : index
    %59 = vector.load %arg2[%c9_62, %c0_63, %c0_64] : memref<58x58x32xbf16, #tpu.memory_space<vmem>>, vector<1x58x32xbf16>
    %60 = vector.shape_cast %59 : vector<1x58x32xbf16> to vector<58x32xbf16>
    %cst_65 = arith.constant dense<0.000000e+00> : vector<8x32xf32>
    %61 = tpu.matmul %58, %60, %cst_65 {dimension_numbers = #tpu.dot_dimension_numbers<[1], [0], [0], [1], [0, 0, 1, 1], [], []>} : vector<8x58xbf16>, vector<58x32xbf16>, vector<8x32xf32> -> vector<8x32xf32>
    %62 = arith.addf %56, %61 : vector<8x32xf32>
    %c0_66 = arith.constant 0 : index
    %c10 = arith.constant 10 : index
    %c0_67 = arith.constant 0 : index
    %63 = vector.load %arg5[%c0_66, %c10, %c0_67] : memref<8x58x58xbf16, #tpu.memory_space<vmem>>, vector<8x1x58xbf16>
    %64 = vector.shape_cast %63 : vector<8x1x58xbf16> to vector<8x58xbf16>
    %c10_68 = arith.constant 10 : index
    %c0_69 = arith.constant 0 : index
    %c0_70 = arith.constant 0 : index
    %65 = vector.load %arg2[%c10_68, %c0_69, %c0_70] : memref<58x58x32xbf16, #tpu.memory_space<vmem>>, vector<1x58x32xbf16>
    %66 = vector.shape_cast %65 : vector<1x58x32xbf16> to vector<58x32xbf16>
    %cst_71 = arith.constant dense<0.000000e+00> : vector<8x32xf32>
    %67 = tpu.matmul %64, %66, %cst_71 {dimension_numbers = #tpu.dot_dimension_numbers<[1], [0], [0], [1], [0, 0, 1, 1], [], []>} : vector<8x58xbf16>, vector<58x32xbf16>, vector<8x32xf32> -> vector<8x32xf32>
    %68 = arith.addf %62, %67 : vector<8x32xf32>
    %c0_72 = arith.constant 0 : index
    %c11 = arith.constant 11 : index
    %c0_73 = arith.constant 0 : index
    %69 = vector.load %arg5[%c0_72, %c11, %c0_73] : memref<8x58x58xbf16, #tpu.memory_space<vmem>>, vector<8x1x58xbf16>
    %70 = vector.shape_cast %69 : vector<8x1x58xbf16> to vector<8x58xbf16>
    %c11_74 = arith.constant 11 : index
    %c0_75 = arith.constant 0 : index
    %c0_76 = arith.constant 0 : index
    %71 = vector.load %arg2[%c11_74, %c0_75, %c0_76] : memref<58x58x32xbf16, #tpu.memory_space<vmem>>, vector<1x58x32xbf16>
    %72 = vector.shape_cast %71 : vector<1x58x32xbf16> to vector<58x32xbf16>
    %cst_77 = arith.constant dense<0.000000e+00> : vector<8x32xf32>
    %73 = tpu.matmul %70, %72, %cst_77 {dimension_numbers = #tpu.dot_dimension_numbers<[1], [0], [0], [1], [0, 0, 1, 1], [], []>} : vector<8x58xbf16>, vector<58x32xbf16>, vector<8x32xf32> -> vector<8x32xf32>
    %74 = arith.addf %68, %73 : vector<8x32xf32>
    %c0_78 = arith.constant 0 : index
    %c12 = arith.constant 12 : index
    %c0_79 = arith.constant 0 : index
    %75 = vector.load %arg5[%c0_78, %c12, %c0_79] : memref<8x58x58xbf16, #tpu.memory_space<vmem>>, vector<8x1x58xbf16>
    %76 = vector.shape_cast %75 : vector<8x1x58xbf16> to vector<8x58xbf16>
    %c12_80 = arith.constant 12 : index
    %c0_81 = arith.constant 0 : index
    %c0_82 = arith.constant 0 : index
    %77 = vector.load %arg2[%c12_80, %c0_81, %c0_82] : memref<58x58x32xbf16, #tpu.memory_space<vmem>>, vector<1x58x32xbf16>
    %78 = vector.shape_cast %77 : vector<1x58x32xbf16> to vector<58x32xbf16>
    %cst_83 = arith.constant dense<0.000000e+00> : vector<8x32xf32>
    %79 = tpu.matmul %76, %78, %cst_83 {dimension_numbers = #tpu.dot_dimension_numbers<[1], [0], [0], [1], [0, 0, 1, 1], [], []>} : vector<8x58xbf16>, vector<58x32xbf16>, vector<8x32xf32> -> vector<8x32xf32>
    %80 = arith.addf %74, %79 : vector<8x32xf32>
    %c0_84 = arith.constant 0 : index
    %c13 = arith.constant 13 : index
    %c0_85 = arith.constant 0 : index
    %81 = vector.load %arg5[%c0_84, %c13, %c0_85] : memref<8x58x58xbf16, #tpu.memory_space<vmem>>, vector<8x1x58xbf16>
    %82 = vector.shape_cast %81 : vector<8x1x58xbf16> to vector<8x58xbf16>
    %c13_86 = arith.constant 13 : index
    %c0_87 = arith.constant 0 : index
    %c0_88 = arith.constant 0 : index
    %83 = vector.load %arg2[%c13_86, %c0_87, %c0_88] : memref<58x58x32xbf16, #tpu.memory_space<vmem>>, vector<1x58x32xbf16>
    %84 = vector.shape_cast %83 : vector<1x58x32xbf16> to vector<58x32xbf16>
    %cst_89 = arith.constant dense<0.000000e+00> : vector<8x32xf32>
    %85 = tpu.matmul %82, %84, %cst_89 {dimension_numbers = #tpu.dot_dimension_numbers<[1], [0], [0], [1], [0, 0, 1, 1], [], []>} : vector<8x58xbf16>, vector<58x32xbf16>, vector<8x32xf32> -> vector<8x32xf32>
    %86 = arith.addf %80, %85 : vector<8x32xf32>
    %c0_90 = arith.constant 0 : index
    %c14 = arith.constant 14 : index
    %c0_91 = arith.constant 0 : index
    %87 = vector.load %arg5[%c0_90, %c14, %c0_91] : memref<8x58x58xbf16, #tpu.memory_space<vmem>>, vector<8x1x58xbf16>
    %88 = vector.shape_cast %87 : vector<8x1x58xbf16> to vector<8x58xbf16>
    %c14_92 = arith.constant 14 : index
    %c0_93 = arith.constant 0 : index
    %c0_94 = arith.constant 0 : index
    %89 = vector.load %arg2[%c14_92, %c0_93, %c0_94] : memref<58x58x32xbf16, #tpu.memory_space<vmem>>, vector<1x58x32xbf16>
    %90 = vector.shape_cast %89 : vector<1x58x32xbf16> to vector<58x32xbf16>
    %cst_95 = arith.constant dense<0.000000e+00> : vector<8x32xf32>
    %91 = tpu.matmul %88, %90, %cst_95 {dimension_numbers = #tpu.dot_dimension_numbers<[1], [0], [0], [1], [0, 0, 1, 1], [], []>} : vector<8x58xbf16>, vector<58x32xbf16>, vector<8x32xf32> -> vector<8x32xf32>
    %92 = arith.addf %86, %91 : vector<8x32xf32>
    %c0_96 = arith.constant 0 : index
    %c15 = arith.constant 15 : index
    %c0_97 = arith.constant 0 : index
    %93 = vector.load %arg5[%c0_96, %c15, %c0_97] : memref<8x58x58xbf16, #tpu.memory_space<vmem>>, vector<8x1x58xbf16>
    %94 = vector.shape_cast %93 : vector<8x1x58xbf16> to vector<8x58xbf16>
    %c15_98 = arith.constant 15 : index
    %c0_99 = arith.constant 0 : index
    %c0_100 = arith.constant 0 : index
    %95 = vector.load %arg2[%c15_98, %c0_99, %c0_100] : memref<58x58x32xbf16, #tpu.memory_space<vmem>>, vector<1x58x32xbf16>
    %96 = vector.shape_cast %95 : vector<1x58x32xbf16> to vector<58x32xbf16>
    %cst_101 = arith.constant dense<0.000000e+00> : vector<8x32xf32>
    %97 = tpu.matmul %94, %96, %cst_101 {dimension_numbers = #tpu.dot_dimension_numbers<[1], [0], [0], [1], [0, 0, 1, 1], [], []>} : vector<8x58xbf16>, vector<58x32xbf16>, vector<8x32xf32> -> vector<8x32xf32>
    %98 = arith.addf %92, %97 : vector<8x32xf32>
    %c0_102 = arith.constant 0 : index
    %c16 = arith.constant 16 : index
    %c0_103 = arith.constant 0 : index
    %99 = vector.load %arg5[%c0_102, %c16, %c0_103] : memref<8x58x58xbf16, #tpu.memory_space<vmem>>, vector<8x1x58xbf16>
    %100 = vector.shape_cast %99 : vector<8x1x58xbf16> to vector<8x58xbf16>
    %c16_104 = arith.constant 16 : index
    %c0_105 = arith.constant 0 : index
    %c0_106 = arith.constant 0 : index
    %101 = vector.load %arg2[%c16_104, %c0_105, %c0_106] : memref<58x58x32xbf16, #tpu.memory_space<vmem>>, vector<1x58x32xbf16>
    %102 = vector.shape_cast %101 : vector<1x58x32xbf16> to vector<58x32xbf16>
    %cst_107 = arith.constant dense<0.000000e+00> : vector<8x32xf32>
    %103 = tpu.matmul %100, %102, %cst_107 {dimension_numbers = #tpu.dot_dimension_numbers<[1], [0], [0], [1], [0, 0, 1, 1], [], []>} : vector<8x58xbf16>, vector<58x32xbf16>, vector<8x32xf32> -> vector<8x32xf32>
    %104 = arith.addf %98, %103 : vector<8x32xf32>
    %c0_108 = arith.constant 0 : index
    %c17 = arith.constant 17 : index
    %c0_109 = arith.constant 0 : index
    %105 = vector.load %arg5[%c0_108, %c17, %c0_109] : memref<8x58x58xbf16, #tpu.memory_space<vmem>>, vector<8x1x58xbf16>
    %106 = vector.shape_cast %105 : vector<8x1x58xbf16> to vector<8x58xbf16>
    %c17_110 = arith.constant 17 : index
    %c0_111 = arith.constant 0 : index
    %c0_112 = arith.constant 0 : index
    %107 = vector.load %arg2[%c17_110, %c0_111, %c0_112] : memref<58x58x32xbf16, #tpu.memory_space<vmem>>, vector<1x58x32xbf16>
    %108 = vector.shape_cast %107 : vector<1x58x32xbf16> to vector<58x32xbf16>
    %cst_113 = arith.constant dense<0.000000e+00> : vector<8x32xf32>
    %109 = tpu.matmul %106, %108, %cst_113 {dimension_numbers = #tpu.dot_dimension_numbers<[1], [0], [0], [1], [0, 0, 1, 1], [], []>} : vector<8x58xbf16>, vector<58x32xbf16>, vector<8x32xf32> -> vector<8x32xf32>
    %110 = arith.addf %104, %109 : vector<8x32xf32>
    %c0_114 = arith.constant 0 : index
    %c18 = arith.constant 18 : index
    %c0_115 = arith.constant 0 : index
    %111 = vector.load %arg5[%c0_114, %c18, %c0_115] : memref<8x58x58xbf16, #tpu.memory_space<vmem>>, vector<8x1x58xbf16>
    %112 = vector.shape_cast %111 : vector<8x1x58xbf16> to vector<8x58xbf16>
    %c18_116 = arith.constant 18 : index
    %c0_117 = arith.constant 0 : index
    %c0_118 = arith.constant 0 : index
    %113 = vector.load %arg2[%c18_116, %c0_117, %c0_118] : memref<58x58x32xbf16, #tpu.memory_space<vmem>>, vector<1x58x32xbf16>
    %114 = vector.shape_cast %113 : vector<1x58x32xbf16> to vector<58x32xbf16>
    %cst_119 = arith.constant dense<0.000000e+00> : vector<8x32xf32>
    %115 = tpu.matmul %112, %114, %cst_119 {dimension_numbers = #tpu.dot_dimension_numbers<[1], [0], [0], [1], [0, 0, 1, 1], [], []>} : vector<8x58xbf16>, vector<58x32xbf16>, vector<8x32xf32> -> vector<8x32xf32>
    %116 = arith.addf %110, %115 : vector<8x32xf32>
    %c0_120 = arith.constant 0 : index
    %c19 = arith.constant 19 : index
    %c0_121 = arith.constant 0 : index
    %117 = vector.load %arg5[%c0_120, %c19, %c0_121] : memref<8x58x58xbf16, #tpu.memory_space<vmem>>, vector<8x1x58xbf16>
    %118 = vector.shape_cast %117 : vector<8x1x58xbf16> to vector<8x58xbf16>
    %c19_122 = arith.constant 19 : index
    %c0_123 = arith.constant 0 : index
    %c0_124 = arith.constant 0 : index
    %119 = vector.load %arg2[%c19_122, %c0_123, %c0_124] : memref<58x58x32xbf16, #tpu.memory_space<vmem>>, vector<1x58x32xbf16>
    %120 = vector.shape_cast %119 : vector<1x58x32xbf16> to vector<58x32xbf16>
    %cst_125 = arith.constant dense<0.000000e+00> : vector<8x32xf32>
    %121 = tpu.matmul %118, %120, %cst_125 {dimension_numbers = #tpu.dot_dimension_numbers<[1], [0], [0], [1], [0, 0, 1, 1], [], []>} : vector<8x58xbf16>, vector<58x32xbf16>, vector<8x32xf32> -> vector<8x32xf32>
    %122 = arith.addf %116, %121 : vector<8x32xf32>
    %c0_126 = arith.constant 0 : index
    %c20 = arith.constant 20 : index
    %c0_127 = arith.constant 0 : index
    %123 = vector.load %arg5[%c0_126, %c20, %c0_127] : memref<8x58x58xbf16, #tpu.memory_space<vmem>>, vector<8x1x58xbf16>
    %124 = vector.shape_cast %123 : vector<8x1x58xbf16> to vector<8x58xbf16>
    %c20_128 = arith.constant 20 : index
    %c0_129 = arith.constant 0 : index
    %c0_130 = arith.constant 0 : index
    %125 = vector.load %arg2[%c20_128, %c0_129, %c0_130] : memref<58x58x32xbf16, #tpu.memory_space<vmem>>, vector<1x58x32xbf16>
    %126 = vector.shape_cast %125 : vector<1x58x32xbf16> to vector<58x32xbf16>
    %cst_131 = arith.constant dense<0.000000e+00> : vector<8x32xf32>
    %127 = tpu.matmul %124, %126, %cst_131 {dimension_numbers = #tpu.dot_dimension_numbers<[1], [0], [0], [1], [0, 0, 1, 1], [], []>} : vector<8x58xbf16>, vector<58x32xbf16>, vector<8x32xf32> -> vector<8x32xf32>
    %128 = arith.addf %122, %127 : vector<8x32xf32>
    %c0_132 = arith.constant 0 : index
    %c21 = arith.constant 21 : index
    %c0_133 = arith.constant 0 : index
    %129 = vector.load %arg5[%c0_132, %c21, %c0_133] : memref<8x58x58xbf16, #tpu.memory_space<vmem>>, vector<8x1x58xbf16>
    %130 = vector.shape_cast %129 : vector<8x1x58xbf16> to vector<8x58xbf16>
    %c21_134 = arith.constant 21 : index
    %c0_135 = arith.constant 0 : index
    %c0_136 = arith.constant 0 : index
    %131 = vector.load %arg2[%c21_134, %c0_135, %c0_136] : memref<58x58x32xbf16, #tpu.memory_space<vmem>>, vector<1x58x32xbf16>
    %132 = vector.shape_cast %131 : vector<1x58x32xbf16> to vector<58x32xbf16>
    %cst_137 = arith.constant dense<0.000000e+00> : vector<8x32xf32>
    %133 = tpu.matmul %130, %132, %cst_137 {dimension_numbers = #tpu.dot_dimension_numbers<[1], [0], [0], [1], [0, 0, 1, 1], [], []>} : vector<8x58xbf16>, vector<58x32xbf16>, vector<8x32xf32> -> vector<8x32xf32>
    %134 = arith.addf %128, %133 : vector<8x32xf32>
    %c0_138 = arith.constant 0 : index
    %c22 = arith.constant 22 : index
    %c0_139 = arith.constant 0 : index
    %135 = vector.load %arg5[%c0_138, %c22, %c0_139] : memref<8x58x58xbf16, #tpu.memory_space<vmem>>, vector<8x1x58xbf16>
    %136 = vector.shape_cast %135 : vector<8x1x58xbf16> to vector<8x58xbf16>
    %c22_140 = arith.constant 22 : index
    %c0_141 = arith.constant 0 : index
    %c0_142 = arith.constant 0 : index
    %137 = vector.load %arg2[%c22_140, %c0_141, %c0_142] : memref<58x58x32xbf16, #tpu.memory_space<vmem>>, vector<1x58x32xbf16>
    %138 = vector.shape_cast %137 : vector<1x58x32xbf16> to vector<58x32xbf16>
    %cst_143 = arith.constant dense<0.000000e+00> : vector<8x32xf32>
    %139 = tpu.matmul %136, %138, %cst_143 {dimension_numbers = #tpu.dot_dimension_numbers<[1], [0], [0], [1], [0, 0, 1, 1], [], []>} : vector<8x58xbf16>, vector<58x32xbf16>, vector<8x32xf32> -> vector<8x32xf32>
    %140 = arith.addf %134, %139 : vector<8x32xf32>
    %c0_144 = arith.constant 0 : index
    %c23 = arith.constant 23 : index
    %c0_145 = arith.constant 0 : index
    %141 = vector.load %arg5[%c0_144, %c23, %c0_145] : memref<8x58x58xbf16, #tpu.memory_space<vmem>>, vector<8x1x58xbf16>
    %142 = vector.shape_cast %141 : vector<8x1x58xbf16> to vector<8x58xbf16>
    %c23_146 = arith.constant 23 : index
    %c0_147 = arith.constant 0 : index
    %c0_148 = arith.constant 0 : index
    %143 = vector.load %arg2[%c23_146, %c0_147, %c0_148] : memref<58x58x32xbf16, #tpu.memory_space<vmem>>, vector<1x58x32xbf16>
    %144 = vector.shape_cast %143 : vector<1x58x32xbf16> to vector<58x32xbf16>
    %cst_149 = arith.constant dense<0.000000e+00> : vector<8x32xf32>
    %145 = tpu.matmul %142, %144, %cst_149 {dimension_numbers = #tpu.dot_dimension_numbers<[1], [0], [0], [1], [0, 0, 1, 1], [], []>} : vector<8x58xbf16>, vector<58x32xbf16>, vector<8x32xf32> -> vector<8x32xf32>
    %146 = arith.addf %140, %145 : vector<8x32xf32>
    %c0_150 = arith.constant 0 : index
    %c24 = arith.constant 24 : index
    %c0_151 = arith.constant 0 : index
    %147 = vector.load %arg5[%c0_150, %c24, %c0_151] : memref<8x58x58xbf16, #tpu.memory_space<vmem>>, vector<8x1x58xbf16>
    %148 = vector.shape_cast %147 : vector<8x1x58xbf16> to vector<8x58xbf16>
    %c24_152 = arith.constant 24 : index
    %c0_153 = arith.constant 0 : index
    %c0_154 = arith.constant 0 : index
    %149 = vector.load %arg2[%c24_152, %c0_153, %c0_154] : memref<58x58x32xbf16, #tpu.memory_space<vmem>>, vector<1x58x32xbf16>
    %150 = vector.shape_cast %149 : vector<1x58x32xbf16> to vector<58x32xbf16>
    %cst_155 = arith.constant dense<0.000000e+00> : vector<8x32xf32>
    %151 = tpu.matmul %148, %150, %cst_155 {dimension_numbers = #tpu.dot_dimension_numbers<[1], [0], [0], [1], [0, 0, 1, 1], [], []>} : vector<8x58xbf16>, vector<58x32xbf16>, vector<8x32xf32> -> vector<8x32xf32>
    %152 = arith.addf %146, %151 : vector<8x32xf32>
    %c0_156 = arith.constant 0 : index
    %c25 = arith.constant 25 : index
    %c0_157 = arith.constant 0 : index
    %153 = vector.load %arg5[%c0_156, %c25, %c0_157] : memref<8x58x58xbf16, #tpu.memory_space<vmem>>, vector<8x1x58xbf16>
    %154 = vector.shape_cast %153 : vector<8x1x58xbf16> to vector<8x58xbf16>
    %c25_158 = arith.constant 25 : index
    %c0_159 = arith.constant 0 : index
    %c0_160 = arith.constant 0 : index
    %155 = vector.load %arg2[%c25_158, %c0_159, %c0_160] : memref<58x58x32xbf16, #tpu.memory_space<vmem>>, vector<1x58x32xbf16>
    %156 = vector.shape_cast %155 : vector<1x58x32xbf16> to vector<58x32xbf16>
    %cst_161 = arith.constant dense<0.000000e+00> : vector<8x32xf32>
    %157 = tpu.matmul %154, %156, %cst_161 {dimension_numbers = #tpu.dot_dimension_numbers<[1], [0], [0], [1], [0, 0, 1, 1], [], []>} : vector<8x58xbf16>, vector<58x32xbf16>, vector<8x32xf32> -> vector<8x32xf32>
    %158 = arith.addf %152, %157 : vector<8x32xf32>
    %c0_162 = arith.constant 0 : index
    %c26 = arith.constant 26 : index
    %c0_163 = arith.constant 0 : index
    %159 = vector.load %arg5[%c0_162, %c26, %c0_163] : memref<8x58x58xbf16, #tpu.memory_space<vmem>>, vector<8x1x58xbf16>
    %160 = vector.shape_cast %159 : vector<8x1x58xbf16> to vector<8x58xbf16>
    %c26_164 = arith.constant 26 : index
    %c0_165 = arith.constant 0 : index
    %c0_166 = arith.constant 0 : index
    %161 = vector.load %arg2[%c26_164, %c0_165, %c0_166] : memref<58x58x32xbf16, #tpu.memory_space<vmem>>, vector<1x58x32xbf16>
    %162 = vector.shape_cast %161 : vector<1x58x32xbf16> to vector<58x32xbf16>
    %cst_167 = arith.constant dense<0.000000e+00> : vector<8x32xf32>
    %163 = tpu.matmul %160, %162, %cst_167 {dimension_numbers = #tpu.dot_dimension_numbers<[1], [0], [0], [1], [0, 0, 1, 1], [], []>} : vector<8x58xbf16>, vector<58x32xbf16>, vector<8x32xf32> -> vector<8x32xf32>
    %164 = arith.addf %158, %163 : vector<8x32xf32>
    %c0_168 = arith.constant 0 : index
    %c27 = arith.constant 27 : index
    %c0_169 = arith.constant 0 : index
    %165 = vector.load %arg5[%c0_168, %c27, %c0_169] : memref<8x58x58xbf16, #tpu.memory_space<vmem>>, vector<8x1x58xbf16>
    %166 = vector.shape_cast %165 : vector<8x1x58xbf16> to vector<8x58xbf16>
    %c27_170 = arith.constant 27 : index
    %c0_171 = arith.constant 0 : index
    %c0_172 = arith.constant 0 : index
    %167 = vector.load %arg2[%c27_170, %c0_171, %c0_172] : memref<58x58x32xbf16, #tpu.memory_space<vmem>>, vector<1x58x32xbf16>
    %168 = vector.shape_cast %167 : vector<1x58x32xbf16> to vector<58x32xbf16>
    %cst_173 = arith.constant dense<0.000000e+00> : vector<8x32xf32>
    %169 = tpu.matmul %166, %168, %cst_173 {dimension_numbers = #tpu.dot_dimension_numbers<[1], [0], [0], [1], [0, 0, 1, 1], [], []>} : vector<8x58xbf16>, vector<58x32xbf16>, vector<8x32xf32> -> vector<8x32xf32>
    %170 = arith.addf %164, %169 : vector<8x32xf32>
    %c0_174 = arith.constant 0 : index
    %c28 = arith.constant 28 : index
    %c0_175 = arith.constant 0 : index
    %171 = vector.load %arg5[%c0_174, %c28, %c0_175] : memref<8x58x58xbf16, #tpu.memory_space<vmem>>, vector<8x1x58xbf16>
    %172 = vector.shape_cast %171 : vector<8x1x58xbf16> to vector<8x58xbf16>
    %c28_176 = arith.constant 28 : index
    %c0_177 = arith.constant 0 : index
    %c0_178 = arith.constant 0 : index
    %173 = vector.load %arg2[%c28_176, %c0_177, %c0_178] : memref<58x58x32xbf16, #tpu.memory_space<vmem>>, vector<1x58x32xbf16>
    %174 = vector.shape_cast %173 : vector<1x58x32xbf16> to vector<58x32xbf16>
    %cst_179 = arith.constant dense<0.000000e+00> : vector<8x32xf32>
    %175 = tpu.matmul %172, %174, %cst_179 {dimension_numbers = #tpu.dot_dimension_numbers<[1], [0], [0], [1], [0, 0, 1, 1], [], []>} : vector<8x58xbf16>, vector<58x32xbf16>, vector<8x32xf32> -> vector<8x32xf32>
    %176 = arith.addf %170, %175 : vector<8x32xf32>
    %c0_180 = arith.constant 0 : index
    %c29 = arith.constant 29 : index
    %c0_181 = arith.constant 0 : index
    %177 = vector.load %arg5[%c0_180, %c29, %c0_181] : memref<8x58x58xbf16, #tpu.memory_space<vmem>>, vector<8x1x58xbf16>
    %178 = vector.shape_cast %177 : vector<8x1x58xbf16> to vector<8x58xbf16>
    %c29_182 = arith.constant 29 : index
    %c0_183 = arith.constant 0 : index
    %c0_184 = arith.constant 0 : index
    %179 = vector.load %arg2[%c29_182, %c0_183, %c0_184] : memref<58x58x32xbf16, #tpu.memory_space<vmem>>, vector<1x58x32xbf16>
    %180 = vector.shape_cast %179 : vector<1x58x32xbf16> to vector<58x32xbf16>
    %cst_185 = arith.constant dense<0.000000e+00> : vector<8x32xf32>
    %181 = tpu.matmul %178, %180, %cst_185 {dimension_numbers = #tpu.dot_dimension_numbers<[1], [0], [0], [1], [0, 0, 1, 1], [], []>} : vector<8x58xbf16>, vector<58x32xbf16>, vector<8x32xf32> -> vector<8x32xf32>
    %182 = arith.addf %176, %181 : vector<8x32xf32>
    %c0_186 = arith.constant 0 : index
    %c30 = arith.constant 30 : index
    %c0_187 = arith.constant 0 : index
    %183 = vector.load %arg5[%c0_186, %c30, %c0_187] : memref<8x58x58xbf16, #tpu.memory_space<vmem>>, vector<8x1x58xbf16>
    %184 = vector.shape_cast %183 : vector<8x1x58xbf16> to vector<8x58xbf16>
    %c30_188 = arith.constant 30 : index
    %c0_189 = arith.constant 0 : index
    %c0_190 = arith.constant 0 : index
    %185 = vector.load %arg2[%c30_188, %c0_189, %c0_190] : memref<58x58x32xbf16, #tpu.memory_space<vmem>>, vector<1x58x32xbf16>
    %186 = vector.shape_cast %185 : vector<1x58x32xbf16> to vector<58x32xbf16>
    %cst_191 = arith.constant dense<0.000000e+00> : vector<8x32xf32>
    %187 = tpu.matmul %184, %186, %cst_191 {dimension_numbers = #tpu.dot_dimension_numbers<[1], [0], [0], [1], [0, 0, 1, 1], [], []>} : vector<8x58xbf16>, vector<58x32xbf16>, vector<8x32xf32> -> vector<8x32xf32>
    %188 = arith.addf %182, %187 : vector<8x32xf32>
    %c0_192 = arith.constant 0 : index
    %c31 = arith.constant 31 : index
    %c0_193 = arith.constant 0 : index
    %189 = vector.load %arg5[%c0_192, %c31, %c0_193] : memref<8x58x58xbf16, #tpu.memory_space<vmem>>, vector<8x1x58xbf16>
    %190 = vector.shape_cast %189 : vector<8x1x58xbf16> to vector<8x58xbf16>
    %c31_194 = arith.constant 31 : index
    %c0_195 = arith.constant 0 : index
    %c0_196 = arith.constant 0 : index
    %191 = vector.load %arg2[%c31_194, %c0_195, %c0_196] : memref<58x58x32xbf16, #tpu.memory_space<vmem>>, vector<1x58x32xbf16>
    %192 = vector.shape_cast %191 : vector<1x58x32xbf16> to vector<58x32xbf16>
    %cst_197 = arith.constant dense<0.000000e+00> : vector<8x32xf32>
    %193 = tpu.matmul %190, %192, %cst_197 {dimension_numbers = #tpu.dot_dimension_numbers<[1], [0], [0], [1], [0, 0, 1, 1], [], []>} : vector<8x58xbf16>, vector<58x32xbf16>, vector<8x32xf32> -> vector<8x32xf32>
    %194 = arith.addf %188, %193 : vector<8x32xf32>
    %c0_198 = arith.constant 0 : index
    %c32 = arith.constant 32 : index
    %c0_199 = arith.constant 0 : index
    %195 = vector.load %arg5[%c0_198, %c32, %c0_199] : memref<8x58x58xbf16, #tpu.memory_space<vmem>>, vector<8x1x58xbf16>
    %196 = vector.shape_cast %195 : vector<8x1x58xbf16> to vector<8x58xbf16>
    %c32_200 = arith.constant 32 : index
    %c0_201 = arith.constant 0 : index
    %c0_202 = arith.constant 0 : index
    %197 = vector.load %arg2[%c32_200, %c0_201, %c0_202] : memref<58x58x32xbf16, #tpu.memory_space<vmem>>, vector<1x58x32xbf16>
    %198 = vector.shape_cast %197 : vector<1x58x32xbf16> to vector<58x32xbf16>
    %cst_203 = arith.constant dense<0.000000e+00> : vector<8x32xf32>
    %199 = tpu.matmul %196, %198, %cst_203 {dimension_numbers = #tpu.dot_dimension_numbers<[1], [0], [0], [1], [0, 0, 1, 1], [], []>} : vector<8x58xbf16>, vector<58x32xbf16>, vector<8x32xf32> -> vector<8x32xf32>
    %200 = arith.addf %194, %199 : vector<8x32xf32>
    %c0_204 = arith.constant 0 : index
    %c33 = arith.constant 33 : index
    %c0_205 = arith.constant 0 : index
    %201 = vector.load %arg5[%c0_204, %c33, %c0_205] : memref<8x58x58xbf16, #tpu.memory_space<vmem>>, vector<8x1x58xbf16>
    %202 = vector.shape_cast %201 : vector<8x1x58xbf16> to vector<8x58xbf16>
    %c33_206 = arith.constant 33 : index
    %c0_207 = arith.constant 0 : index
    %c0_208 = arith.constant 0 : index
    %203 = vector.load %arg2[%c33_206, %c0_207, %c0_208] : memref<58x58x32xbf16, #tpu.memory_space<vmem>>, vector<1x58x32xbf16>
    %204 = vector.shape_cast %203 : vector<1x58x32xbf16> to vector<58x32xbf16>
    %cst_209 = arith.constant dense<0.000000e+00> : vector<8x32xf32>
    %205 = tpu.matmul %202, %204, %cst_209 {dimension_numbers = #tpu.dot_dimension_numbers<[1], [0], [0], [1], [0, 0, 1, 1], [], []>} : vector<8x58xbf16>, vector<58x32xbf16>, vector<8x32xf32> -> vector<8x32xf32>
    %206 = arith.addf %200, %205 : vector<8x32xf32>
    %c0_210 = arith.constant 0 : index
    %c34 = arith.constant 34 : index
    %c0_211 = arith.constant 0 : index
    %207 = vector.load %arg5[%c0_210, %c34, %c0_211] : memref<8x58x58xbf16, #tpu.memory_space<vmem>>, vector<8x1x58xbf16>
    %208 = vector.shape_cast %207 : vector<8x1x58xbf16> to vector<8x58xbf16>
    %c34_212 = arith.constant 34 : index
    %c0_213 = arith.constant 0 : index
    %c0_214 = arith.constant 0 : index
    %209 = vector.load %arg2[%c34_212, %c0_213, %c0_214] : memref<58x58x32xbf16, #tpu.memory_space<vmem>>, vector<1x58x32xbf16>
    %210 = vector.shape_cast %209 : vector<1x58x32xbf16> to vector<58x32xbf16>
    %cst_215 = arith.constant dense<0.000000e+00> : vector<8x32xf32>
    %211 = tpu.matmul %208, %210, %cst_215 {dimension_numbers = #tpu.dot_dimension_numbers<[1], [0], [0], [1], [0, 0, 1, 1], [], []>} : vector<8x58xbf16>, vector<58x32xbf16>, vector<8x32xf32> -> vector<8x32xf32>
    %212 = arith.addf %206, %211 : vector<8x32xf32>
    %c0_216 = arith.constant 0 : index
    %c35 = arith.constant 35 : index
    %c0_217 = arith.constant 0 : index
    %213 = vector.load %arg5[%c0_216, %c35, %c0_217] : memref<8x58x58xbf16, #tpu.memory_space<vmem>>, vector<8x1x58xbf16>
    %214 = vector.shape_cast %213 : vector<8x1x58xbf16> to vector<8x58xbf16>
    %c35_218 = arith.constant 35 : index
    %c0_219 = arith.constant 0 : index
    %c0_220 = arith.constant 0 : index
    %215 = vector.load %arg2[%c35_218, %c0_219, %c0_220] : memref<58x58x32xbf16, #tpu.memory_space<vmem>>, vector<1x58x32xbf16>
    %216 = vector.shape_cast %215 : vector<1x58x32xbf16> to vector<58x32xbf16>
    %cst_221 = arith.constant dense<0.000000e+00> : vector<8x32xf32>
    %217 = tpu.matmul %214, %216, %cst_221 {dimension_numbers = #tpu.dot_dimension_numbers<[1], [0], [0], [1], [0, 0, 1, 1], [], []>} : vector<8x58xbf16>, vector<58x32xbf16>, vector<8x32xf32> -> vector<8x32xf32>
    %218 = arith.addf %212, %217 : vector<8x32xf32>
    %c0_222 = arith.constant 0 : index
    %c36 = arith.constant 36 : index
    %c0_223 = arith.constant 0 : index
    %219 = vector.load %arg5[%c0_222, %c36, %c0_223] : memref<8x58x58xbf16, #tpu.memory_space<vmem>>, vector<8x1x58xbf16>
    %220 = vector.shape_cast %219 : vector<8x1x58xbf16> to vector<8x58xbf16>
    %c36_224 = arith.constant 36 : index
    %c0_225 = arith.constant 0 : index
    %c0_226 = arith.constant 0 : index
    %221 = vector.load %arg2[%c36_224, %c0_225, %c0_226] : memref<58x58x32xbf16, #tpu.memory_space<vmem>>, vector<1x58x32xbf16>
    %222 = vector.shape_cast %221 : vector<1x58x32xbf16> to vector<58x32xbf16>
    %cst_227 = arith.constant dense<0.000000e+00> : vector<8x32xf32>
    %223 = tpu.matmul %220, %222, %cst_227 {dimension_numbers = #tpu.dot_dimension_numbers<[1], [0], [0], [1], [0, 0, 1, 1], [], []>} : vector<8x58xbf16>, vector<58x32xbf16>, vector<8x32xf32> -> vector<8x32xf32>
    %224 = arith.addf %218, %223 : vector<8x32xf32>
    %c0_228 = arith.constant 0 : index
    %c37 = arith.constant 37 : index
    %c0_229 = arith.constant 0 : index
    %225 = vector.load %arg5[%c0_228, %c37, %c0_229] : memref<8x58x58xbf16, #tpu.memory_space<vmem>>, vector<8x1x58xbf16>
    %226 = vector.shape_cast %225 : vector<8x1x58xbf16> to vector<8x58xbf16>
    %c37_230 = arith.constant 37 : index
    %c0_231 = arith.constant 0 : index
    %c0_232 = arith.constant 0 : index
    %227 = vector.load %arg2[%c37_230, %c0_231, %c0_232] : memref<58x58x32xbf16, #tpu.memory_space<vmem>>, vector<1x58x32xbf16>
    %228 = vector.shape_cast %227 : vector<1x58x32xbf16> to vector<58x32xbf16>
    %cst_233 = arith.constant dense<0.000000e+00> : vector<8x32xf32>
    %229 = tpu.matmul %226, %228, %cst_233 {dimension_numbers = #tpu.dot_dimension_numbers<[1], [0], [0], [1], [0, 0, 1, 1], [], []>} : vector<8x58xbf16>, vector<58x32xbf16>, vector<8x32xf32> -> vector<8x32xf32>
    %230 = arith.addf %224, %229 : vector<8x32xf32>
    %c0_234 = arith.constant 0 : index
    %c38 = arith.constant 38 : index
    %c0_235 = arith.constant 0 : index
    %231 = vector.load %arg5[%c0_234, %c38, %c0_235] : memref<8x58x58xbf16, #tpu.memory_space<vmem>>, vector<8x1x58xbf16>
    %232 = vector.shape_cast %231 : vector<8x1x58xbf16> to vector<8x58xbf16>
    %c38_236 = arith.constant 38 : index
    %c0_237 = arith.constant 0 : index
    %c0_238 = arith.constant 0 : index
    %233 = vector.load %arg2[%c38_236, %c0_237, %c0_238] : memref<58x58x32xbf16, #tpu.memory_space<vmem>>, vector<1x58x32xbf16>
    %234 = vector.shape_cast %233 : vector<1x58x32xbf16> to vector<58x32xbf16>
    %cst_239 = arith.constant dense<0.000000e+00> : vector<8x32xf32>
    %235 = tpu.matmul %232, %234, %cst_239 {dimension_numbers = #tpu.dot_dimension_numbers<[1], [0], [0], [1], [0, 0, 1, 1], [], []>} : vector<8x58xbf16>, vector<58x32xbf16>, vector<8x32xf32> -> vector<8x32xf32>
    %236 = arith.addf %230, %235 : vector<8x32xf32>
    %c0_240 = arith.constant 0 : index
    %c39 = arith.constant 39 : index
    %c0_241 = arith.constant 0 : index
    %237 = vector.load %arg5[%c0_240, %c39, %c0_241] : memref<8x58x58xbf16, #tpu.memory_space<vmem>>, vector<8x1x58xbf16>
    %238 = vector.shape_cast %237 : vector<8x1x58xbf16> to vector<8x58xbf16>
    %c39_242 = arith.constant 39 : index
    %c0_243 = arith.constant 0 : index
    %c0_244 = arith.constant 0 : index
    %239 = vector.load %arg2[%c39_242, %c0_243, %c0_244] : memref<58x58x32xbf16, #tpu.memory_space<vmem>>, vector<1x58x32xbf16>
    %240 = vector.shape_cast %239 : vector<1x58x32xbf16> to vector<58x32xbf16>
    %cst_245 = arith.constant dense<0.000000e+00> : vector<8x32xf32>
    %241 = tpu.matmul %238, %240, %cst_245 {dimension_numbers = #tpu.dot_dimension_numbers<[1], [0], [0], [1], [0, 0, 1, 1], [], []>} : vector<8x58xbf16>, vector<58x32xbf16>, vector<8x32xf32> -> vector<8x32xf32>
    %242 = arith.addf %236, %241 : vector<8x32xf32>
    %c0_246 = arith.constant 0 : index
    %c40 = arith.constant 40 : index
    %c0_247 = arith.constant 0 : index
    %243 = vector.load %arg5[%c0_246, %c40, %c0_247] : memref<8x58x58xbf16, #tpu.memory_space<vmem>>, vector<8x1x58xbf16>
    %244 = vector.shape_cast %243 : vector<8x1x58xbf16> to vector<8x58xbf16>
    %c40_248 = arith.constant 40 : index
    %c0_249 = arith.constant 0 : index
    %c0_250 = arith.constant 0 : index
    %245 = vector.load %arg2[%c40_248, %c0_249, %c0_250] : memref<58x58x32xbf16, #tpu.memory_space<vmem>>, vector<1x58x32xbf16>
    %246 = vector.shape_cast %245 : vector<1x58x32xbf16> to vector<58x32xbf16>
    %cst_251 = arith.constant dense<0.000000e+00> : vector<8x32xf32>
    %247 = tpu.matmul %244, %246, %cst_251 {dimension_numbers = #tpu.dot_dimension_numbers<[1], [0], [0], [1], [0, 0, 1, 1], [], []>} : vector<8x58xbf16>, vector<58x32xbf16>, vector<8x32xf32> -> vector<8x32xf32>
    %248 = arith.addf %242, %247 : vector<8x32xf32>
    %c0_252 = arith.constant 0 : index
    %c41 = arith.constant 41 : index
    %c0_253 = arith.constant 0 : index
    %249 = vector.load %arg5[%c0_252, %c41, %c0_253] : memref<8x58x58xbf16, #tpu.memory_space<vmem>>, vector<8x1x58xbf16>
    %250 = vector.shape_cast %249 : vector<8x1x58xbf16> to vector<8x58xbf16>
    %c41_254 = arith.constant 41 : index
    %c0_255 = arith.constant 0 : index
    %c0_256 = arith.constant 0 : index
    %251 = vector.load %arg2[%c41_254, %c0_255, %c0_256] : memref<58x58x32xbf16, #tpu.memory_space<vmem>>, vector<1x58x32xbf16>
    %252 = vector.shape_cast %251 : vector<1x58x32xbf16> to vector<58x32xbf16>
    %cst_257 = arith.constant dense<0.000000e+00> : vector<8x32xf32>
    %253 = tpu.matmul %250, %252, %cst_257 {dimension_numbers = #tpu.dot_dimension_numbers<[1], [0], [0], [1], [0, 0, 1, 1], [], []>} : vector<8x58xbf16>, vector<58x32xbf16>, vector<8x32xf32> -> vector<8x32xf32>
    %254 = arith.addf %248, %253 : vector<8x32xf32>
    %c0_258 = arith.constant 0 : index
    %c42 = arith.constant 42 : index
    %c0_259 = arith.constant 0 : index
    %255 = vector.load %arg5[%c0_258, %c42, %c0_259] : memref<8x58x58xbf16, #tpu.memory_space<vmem>>, vector<8x1x58xbf16>
    %256 = vector.shape_cast %255 : vector<8x1x58xbf16> to vector<8x58xbf16>
    %c42_260 = arith.constant 42 : index
    %c0_261 = arith.constant 0 : index
    %c0_262 = arith.constant 0 : index
    %257 = vector.load %arg2[%c42_260, %c0_261, %c0_262] : memref<58x58x32xbf16, #tpu.memory_space<vmem>>, vector<1x58x32xbf16>
    %258 = vector.shape_cast %257 : vector<1x58x32xbf16> to vector<58x32xbf16>
    %cst_263 = arith.constant dense<0.000000e+00> : vector<8x32xf32>
    %259 = tpu.matmul %256, %258, %cst_263 {dimension_numbers = #tpu.dot_dimension_numbers<[1], [0], [0], [1], [0, 0, 1, 1], [], []>} : vector<8x58xbf16>, vector<58x32xbf16>, vector<8x32xf32> -> vector<8x32xf32>
    %260 = arith.addf %254, %259 : vector<8x32xf32>
    %c0_264 = arith.constant 0 : index
    %c43 = arith.constant 43 : index
    %c0_265 = arith.constant 0 : index
    %261 = vector.load %arg5[%c0_264, %c43, %c0_265] : memref<8x58x58xbf16, #tpu.memory_space<vmem>>, vector<8x1x58xbf16>
    %262 = vector.shape_cast %261 : vector<8x1x58xbf16> to vector<8x58xbf16>
    %c43_266 = arith.constant 43 : index
    %c0_267 = arith.constant 0 : index
    %c0_268 = arith.constant 0 : index
    %263 = vector.load %arg2[%c43_266, %c0_267, %c0_268] : memref<58x58x32xbf16, #tpu.memory_space<vmem>>, vector<1x58x32xbf16>
    %264 = vector.shape_cast %263 : vector<1x58x32xbf16> to vector<58x32xbf16>
    %cst_269 = arith.constant dense<0.000000e+00> : vector<8x32xf32>
    %265 = tpu.matmul %262, %264, %cst_269 {dimension_numbers = #tpu.dot_dimension_numbers<[1], [0], [0], [1], [0, 0, 1, 1], [], []>} : vector<8x58xbf16>, vector<58x32xbf16>, vector<8x32xf32> -> vector<8x32xf32>
    %266 = arith.addf %260, %265 : vector<8x32xf32>
    %c0_270 = arith.constant 0 : index
    %c44 = arith.constant 44 : index
    %c0_271 = arith.constant 0 : index
    %267 = vector.load %arg5[%c0_270, %c44, %c0_271] : memref<8x58x58xbf16, #tpu.memory_space<vmem>>, vector<8x1x58xbf16>
    %268 = vector.shape_cast %267 : vector<8x1x58xbf16> to vector<8x58xbf16>
    %c44_272 = arith.constant 44 : index
    %c0_273 = arith.constant 0 : index
    %c0_274 = arith.constant 0 : index
    %269 = vector.load %arg2[%c44_272, %c0_273, %c0_274] : memref<58x58x32xbf16, #tpu.memory_space<vmem>>, vector<1x58x32xbf16>
    %270 = vector.shape_cast %269 : vector<1x58x32xbf16> to vector<58x32xbf16>
    %cst_275 = arith.constant dense<0.000000e+00> : vector<8x32xf32>
    %271 = tpu.matmul %268, %270, %cst_275 {dimension_numbers = #tpu.dot_dimension_numbers<[1], [0], [0], [1], [0, 0, 1, 1], [], []>} : vector<8x58xbf16>, vector<58x32xbf16>, vector<8x32xf32> -> vector<8x32xf32>
    %272 = arith.addf %266, %271 : vector<8x32xf32>
    %c0_276 = arith.constant 0 : index
    %c45 = arith.constant 45 : index
    %c0_277 = arith.constant 0 : index
    %273 = vector.load %arg5[%c0_276, %c45, %c0_277] : memref<8x58x58xbf16, #tpu.memory_space<vmem>>, vector<8x1x58xbf16>
    %274 = vector.shape_cast %273 : vector<8x1x58xbf16> to vector<8x58xbf16>
    %c45_278 = arith.constant 45 : index
    %c0_279 = arith.constant 0 : index
    %c0_280 = arith.constant 0 : index
    %275 = vector.load %arg2[%c45_278, %c0_279, %c0_280] : memref<58x58x32xbf16, #tpu.memory_space<vmem>>, vector<1x58x32xbf16>
    %276 = vector.shape_cast %275 : vector<1x58x32xbf16> to vector<58x32xbf16>
    %cst_281 = arith.constant dense<0.000000e+00> : vector<8x32xf32>
    %277 = tpu.matmul %274, %276, %cst_281 {dimension_numbers = #tpu.dot_dimension_numbers<[1], [0], [0], [1], [0, 0, 1, 1], [], []>} : vector<8x58xbf16>, vector<58x32xbf16>, vector<8x32xf32> -> vector<8x32xf32>
    %278 = arith.addf %272, %277 : vector<8x32xf32>
    %c0_282 = arith.constant 0 : index
    %c46 = arith.constant 46 : index
    %c0_283 = arith.constant 0 : index
    %279 = vector.load %arg5[%c0_282, %c46, %c0_283] : memref<8x58x58xbf16, #tpu.memory_space<vmem>>, vector<8x1x58xbf16>
    %280 = vector.shape_cast %279 : vector<8x1x58xbf16> to vector<8x58xbf16>
    %c46_284 = arith.constant 46 : index
    %c0_285 = arith.constant 0 : index
    %c0_286 = arith.constant 0 : index
    %281 = vector.load %arg2[%c46_284, %c0_285, %c0_286] : memref<58x58x32xbf16, #tpu.memory_space<vmem>>, vector<1x58x32xbf16>
    %282 = vector.shape_cast %281 : vector<1x58x32xbf16> to vector<58x32xbf16>
    %cst_287 = arith.constant dense<0.000000e+00> : vector<8x32xf32>
    %283 = tpu.matmul %280, %282, %cst_287 {dimension_numbers = #tpu.dot_dimension_numbers<[1], [0], [0], [1], [0, 0, 1, 1], [], []>} : vector<8x58xbf16>, vector<58x32xbf16>, vector<8x32xf32> -> vector<8x32xf32>
    %284 = arith.addf %278, %283 : vector<8x32xf32>
    %c0_288 = arith.constant 0 : index
    %c47 = arith.constant 47 : index
    %c0_289 = arith.constant 0 : index
    %285 = vector.load %arg5[%c0_288, %c47, %c0_289] : memref<8x58x58xbf16, #tpu.memory_space<vmem>>, vector<8x1x58xbf16>
    %286 = vector.shape_cast %285 : vector<8x1x58xbf16> to vector<8x58xbf16>
    %c47_290 = arith.constant 47 : index
    %c0_291 = arith.constant 0 : index
    %c0_292 = arith.constant 0 : index
    %287 = vector.load %arg2[%c47_290, %c0_291, %c0_292] : memref<58x58x32xbf16, #tpu.memory_space<vmem>>, vector<1x58x32xbf16>
    %288 = vector.shape_cast %287 : vector<1x58x32xbf16> to vector<58x32xbf16>
    %cst_293 = arith.constant dense<0.000000e+00> : vector<8x32xf32>
    %289 = tpu.matmul %286, %288, %cst_293 {dimension_numbers = #tpu.dot_dimension_numbers<[1], [0], [0], [1], [0, 0, 1, 1], [], []>} : vector<8x58xbf16>, vector<58x32xbf16>, vector<8x32xf32> -> vector<8x32xf32>
    %290 = arith.addf %284, %289 : vector<8x32xf32>
    %c0_294 = arith.constant 0 : index
    %c48 = arith.constant 48 : index
    %c0_295 = arith.constant 0 : index
    %291 = vector.load %arg5[%c0_294, %c48, %c0_295] : memref<8x58x58xbf16, #tpu.memory_space<vmem>>, vector<8x1x58xbf16>
    %292 = vector.shape_cast %291 : vector<8x1x58xbf16> to vector<8x58xbf16>
    %c48_296 = arith.constant 48 : index
    %c0_297 = arith.constant 0 : index
    %c0_298 = arith.constant 0 : index
    %293 = vector.load %arg2[%c48_296, %c0_297, %c0_298] : memref<58x58x32xbf16, #tpu.memory_space<vmem>>, vector<1x58x32xbf16>
    %294 = vector.shape_cast %293 : vector<1x58x32xbf16> to vector<58x32xbf16>
    %cst_299 = arith.constant dense<0.000000e+00> : vector<8x32xf32>
    %295 = tpu.matmul %292, %294, %cst_299 {dimension_numbers = #tpu.dot_dimension_numbers<[1], [0], [0], [1], [0, 0, 1, 1], [], []>} : vector<8x58xbf16>, vector<58x32xbf16>, vector<8x32xf32> -> vector<8x32xf32>
    %296 = arith.addf %290, %295 : vector<8x32xf32>
    %c0_300 = arith.constant 0 : index
    %c49 = arith.constant 49 : index
    %c0_301 = arith.constant 0 : index
    %297 = vector.load %arg5[%c0_300, %c49, %c0_301] : memref<8x58x58xbf16, #tpu.memory_space<vmem>>, vector<8x1x58xbf16>
    %298 = vector.shape_cast %297 : vector<8x1x58xbf16> to vector<8x58xbf16>
    %c49_302 = arith.constant 49 : index
    %c0_303 = arith.constant 0 : index
    %c0_304 = arith.constant 0 : index
    %299 = vector.load %arg2[%c49_302, %c0_303, %c0_304] : memref<58x58x32xbf16, #tpu.memory_space<vmem>>, vector<1x58x32xbf16>
    %300 = vector.shape_cast %299 : vector<1x58x32xbf16> to vector<58x32xbf16>
    %cst_305 = arith.constant dense<0.000000e+00> : vector<8x32xf32>
    %301 = tpu.matmul %298, %300, %cst_305 {dimension_numbers = #tpu.dot_dimension_numbers<[1], [0], [0], [1], [0, 0, 1, 1], [], []>} : vector<8x58xbf16>, vector<58x32xbf16>, vector<8x32xf32> -> vector<8x32xf32>
    %302 = arith.addf %296, %301 : vector<8x32xf32>
    %c0_306 = arith.constant 0 : index
    %c50 = arith.constant 50 : index
    %c0_307 = arith.constant 0 : index
    %303 = vector.load %arg5[%c0_306, %c50, %c0_307] : memref<8x58x58xbf16, #tpu.memory_space<vmem>>, vector<8x1x58xbf16>
    %304 = vector.shape_cast %303 : vector<8x1x58xbf16> to vector<8x58xbf16>
    %c50_308 = arith.constant 50 : index
    %c0_309 = arith.constant 0 : index
    %c0_310 = arith.constant 0 : index
    %305 = vector.load %arg2[%c50_308, %c0_309, %c0_310] : memref<58x58x32xbf16, #tpu.memory_space<vmem>>, vector<1x58x32xbf16>
    %306 = vector.shape_cast %305 : vector<1x58x32xbf16> to vector<58x32xbf16>
    %cst_311 = arith.constant dense<0.000000e+00> : vector<8x32xf32>
    %307 = tpu.matmul %304, %306, %cst_311 {dimension_numbers = #tpu.dot_dimension_numbers<[1], [0], [0], [1], [0, 0, 1, 1], [], []>} : vector<8x58xbf16>, vector<58x32xbf16>, vector<8x32xf32> -> vector<8x32xf32>
    %308 = arith.addf %302, %307 : vector<8x32xf32>
    %c0_312 = arith.constant 0 : index
    %c51 = arith.constant 51 : index
    %c0_313 = arith.constant 0 : index
    %309 = vector.load %arg5[%c0_312, %c51, %c0_313] : memref<8x58x58xbf16, #tpu.memory_space<vmem>>, vector<8x1x58xbf16>
    %310 = vector.shape_cast %309 : vector<8x1x58xbf16> to vector<8x58xbf16>
    %c51_314 = arith.constant 51 : index
    %c0_315 = arith.constant 0 : index
    %c0_316 = arith.constant 0 : index
    %311 = vector.load %arg2[%c51_314, %c0_315, %c0_316] : memref<58x58x32xbf16, #tpu.memory_space<vmem>>, vector<1x58x32xbf16>
    %312 = vector.shape_cast %311 : vector<1x58x32xbf16> to vector<58x32xbf16>
    %cst_317 = arith.constant dense<0.000000e+00> : vector<8x32xf32>
    %313 = tpu.matmul %310, %312, %cst_317 {dimension_numbers = #tpu.dot_dimension_numbers<[1], [0], [0], [1], [0, 0, 1, 1], [], []>} : vector<8x58xbf16>, vector<58x32xbf16>, vector<8x32xf32> -> vector<8x32xf32>
    %314 = arith.addf %308, %313 : vector<8x32xf32>
    %c0_318 = arith.constant 0 : index
    %c52 = arith.constant 52 : index
    %c0_319 = arith.constant 0 : index
    %315 = vector.load %arg5[%c0_318, %c52, %c0_319] : memref<8x58x58xbf16, #tpu.memory_space<vmem>>, vector<8x1x58xbf16>
    %316 = vector.shape_cast %315 : vector<8x1x58xbf16> to vector<8x58xbf16>
    %c52_320 = arith.constant 52 : index
    %c0_321 = arith.constant 0 : index
    %c0_322 = arith.constant 0 : index
    %317 = vector.load %arg2[%c52_320, %c0_321, %c0_322] : memref<58x58x32xbf16, #tpu.memory_space<vmem>>, vector<1x58x32xbf16>
    %318 = vector.shape_cast %317 : vector<1x58x32xbf16> to vector<58x32xbf16>
    %cst_323 = arith.constant dense<0.000000e+00> : vector<8x32xf32>
    %319 = tpu.matmul %316, %318, %cst_323 {dimension_numbers = #tpu.dot_dimension_numbers<[1], [0], [0], [1], [0, 0, 1, 1], [], []>} : vector<8x58xbf16>, vector<58x32xbf16>, vector<8x32xf32> -> vector<8x32xf32>
    %320 = arith.addf %314, %319 : vector<8x32xf32>
    %c0_324 = arith.constant 0 : index
    %c53 = arith.constant 53 : index
    %c0_325 = arith.constant 0 : index
    %321 = vector.load %arg5[%c0_324, %c53, %c0_325] : memref<8x58x58xbf16, #tpu.memory_space<vmem>>, vector<8x1x58xbf16>
    %322 = vector.shape_cast %321 : vector<8x1x58xbf16> to vector<8x58xbf16>
    %c53_326 = arith.constant 53 : index
    %c0_327 = arith.constant 0 : index
    %c0_328 = arith.constant 0 : index
    %323 = vector.load %arg2[%c53_326, %c0_327, %c0_328] : memref<58x58x32xbf16, #tpu.memory_space<vmem>>, vector<1x58x32xbf16>
    %324 = vector.shape_cast %323 : vector<1x58x32xbf16> to vector<58x32xbf16>
    %cst_329 = arith.constant dense<0.000000e+00> : vector<8x32xf32>
    %325 = tpu.matmul %322, %324, %cst_329 {dimension_numbers = #tpu.dot_dimension_numbers<[1], [0], [0], [1], [0, 0, 1, 1], [], []>} : vector<8x58xbf16>, vector<58x32xbf16>, vector<8x32xf32> -> vector<8x32xf32>
    %326 = arith.addf %320, %325 : vector<8x32xf32>
    %c0_330 = arith.constant 0 : index
    %c54 = arith.constant 54 : index
    %c0_331 = arith.constant 0 : index
    %327 = vector.load %arg5[%c0_330, %c54, %c0_331] : memref<8x58x58xbf16, #tpu.memory_space<vmem>>, vector<8x1x58xbf16>
    %328 = vector.shape_cast %327 : vector<8x1x58xbf16> to vector<8x58xbf16>
    %c54_332 = arith.constant 54 : index
    %c0_333 = arith.constant 0 : index
    %c0_334 = arith.constant 0 : index
    %329 = vector.load %arg2[%c54_332, %c0_333, %c0_334] : memref<58x58x32xbf16, #tpu.memory_space<vmem>>, vector<1x58x32xbf16>
    %330 = vector.shape_cast %329 : vector<1x58x32xbf16> to vector<58x32xbf16>
    %cst_335 = arith.constant dense<0.000000e+00> : vector<8x32xf32>
    %331 = tpu.matmul %328, %330, %cst_335 {dimension_numbers = #tpu.dot_dimension_numbers<[1], [0], [0], [1], [0, 0, 1, 1], [], []>} : vector<8x58xbf16>, vector<58x32xbf16>, vector<8x32xf32> -> vector<8x32xf32>
    %332 = arith.addf %326, %331 : vector<8x32xf32>
    %c0_336 = arith.constant 0 : index
    %c55 = arith.constant 55 : index
    %c0_337 = arith.constant 0 : index
    %333 = vector.load %arg5[%c0_336, %c55, %c0_337] : memref<8x58x58xbf16, #tpu.memory_space<vmem>>, vector<8x1x58xbf16>
    %334 = vector.shape_cast %333 : vector<8x1x58xbf16> to vector<8x58xbf16>
    %c55_338 = arith.constant 55 : index
    %c0_339 = arith.constant 0 : index
    %c0_340 = arith.constant 0 : index
    %335 = vector.load %arg2[%c55_338, %c0_339, %c0_340] : memref<58x58x32xbf16, #tpu.memory_space<vmem>>, vector<1x58x32xbf16>
    %336 = vector.shape_cast %335 : vector<1x58x32xbf16> to vector<58x32xbf16>
    %cst_341 = arith.constant dense<0.000000e+00> : vector<8x32xf32>
    %337 = tpu.matmul %334, %336, %cst_341 {dimension_numbers = #tpu.dot_dimension_numbers<[1], [0], [0], [1], [0, 0, 1, 1], [], []>} : vector<8x58xbf16>, vector<58x32xbf16>, vector<8x32xf32> -> vector<8x32xf32>
    %338 = arith.addf %332, %337 : vector<8x32xf32>
    %c0_342 = arith.constant 0 : index
    %c56 = arith.constant 56 : index
    %c0_343 = arith.constant 0 : index
    %339 = vector.load %arg5[%c0_342, %c56, %c0_343] : memref<8x58x58xbf16, #tpu.memory_space<vmem>>, vector<8x1x58xbf16>
    %340 = vector.shape_cast %339 : vector<8x1x58xbf16> to vector<8x58xbf16>
    %c56_344 = arith.constant 56 : index
    %c0_345 = arith.constant 0 : index
    %c0_346 = arith.constant 0 : index
    %341 = vector.load %arg2[%c56_344, %c0_345, %c0_346] : memref<58x58x32xbf16, #tpu.memory_space<vmem>>, vector<1x58x32xbf16>
    %342 = vector.shape_cast %341 : vector<1x58x32xbf16> to vector<58x32xbf16>
    %cst_347 = arith.constant dense<0.000000e+00> : vector<8x32xf32>
    %343 = tpu.matmul %340, %342, %cst_347 {dimension_numbers = #tpu.dot_dimension_numbers<[1], [0], [0], [1], [0, 0, 1, 1], [], []>} : vector<8x58xbf16>, vector<58x32xbf16>, vector<8x32xf32> -> vector<8x32xf32>
    %344 = arith.addf %338, %343 : vector<8x32xf32>
    %c0_348 = arith.constant 0 : index
    %c57 = arith.constant 57 : index
    %c0_349 = arith.constant 0 : index
    %345 = vector.load %arg5[%c0_348, %c57, %c0_349] : memref<8x58x58xbf16, #tpu.memory_space<vmem>>, vector<8x1x58xbf16>
    %346 = vector.shape_cast %345 : vector<8x1x58xbf16> to vector<8x58xbf16>
    %c57_350 = arith.constant 57 : index
    %c0_351 = arith.constant 0 : index
    %c0_352 = arith.constant 0 : index
    %347 = vector.load %arg2[%c57_350, %c0_351, %c0_352] : memref<58x58x32xbf16, #tpu.memory_space<vmem>>, vector<1x58x32xbf16>
    %348 = vector.shape_cast %347 : vector<1x58x32xbf16> to vector<58x32xbf16>
    %cst_353 = arith.constant dense<0.000000e+00> : vector<8x32xf32>
    %349 = tpu.matmul %346, %348, %cst_353 {dimension_numbers = #tpu.dot_dimension_numbers<[1], [0], [0], [1], [0, 0, 1, 1], [], []>} : vector<8x58xbf16>, vector<58x32xbf16>, vector<8x32xf32> -> vector<8x32xf32>
    %350 = arith.addf %344, %349 : vector<8x32xf32>
    %c0_354 = arith.constant 0 : index
    %c0_355 = arith.constant 0 : index
    %351 = vector.load %arg3[%c0_354, %c0_355] : memref<1x32xf32, #tpu.memory_space<vmem>>, vector<1x32xf32>
    %352 = vector.broadcast %351 : vector<1x32xf32> to vector<8x32xf32>
    %353 = arith.addf %350, %352 : vector<8x32xf32>
    %c0_356 = arith.constant 0 : index
    %c0_357 = arith.constant 0 : index
    %354 = vector.load %arg4[%c0_356, %c0_357] : memref<8x32xf32, #tpu.memory_space<vmem>>, vector<8x32xf32>
    tpu.vector_store %arg4[%c0_356, %c0_357], %353 {strides = array<i32>} : memref<8x32xf32, #tpu.memory_space<vmem>>, vector<8x32xf32>,
    return
  }
  func.func @transform_0(%arg0: i32) -> (i32, i32, i32) {
    %c0_i32 = arith.constant 0 : i32
    %c0_i32_0 = arith.constant 0 : i32
    %c0_i32_1 = arith.constant 0 : i32
    return %arg0, %c0_i32, %c0_i32_0 : i32, i32, i32
  }
  func.func @transform_1(%arg0: i32) -> (i32, i32, i32) {
    %c0_i32 = arith.constant 0 : i32
    %c0_i32_0 = arith.constant 0 : i32
    %c0_i32_1 = arith.constant 0 : i32
    %c0_i32_2 = arith.constant 0 : i32
    return %c0_i32, %c0_i32_0, %c0_i32_1 : i32, i32, i32
  }
  func.func @transform_2(%arg0: i32) -> (i32, i32) {
    %c0_i32 = arith.constant 0 : i32
    %c0_i32_0 = arith.constant 0 : i32
    %c0_i32_1 = arith.constant 0 : i32
    return %c0_i32, %c0_i32_0 : i32, i32
  }
  func.func @transform_3(%arg0: i32) -> (i32, i32) {
    %c0_i32 = arith.constant 0 : i32
    %c0_i32_0 = arith.constant 0 : i32
    return %arg0, %c0_i32 : i32, i32
  }
}

</mosaic_0001>

<bundles_post_ra>
// kernel: sup_namedata_rnn_forward.1
= control target key start
LH: loop header
LB: loop body
LE: loop exit
PB: predicated region body
PF: predicated region fallthrough
CT: control target
= control target key end

     0   :  { %vm52_vm0 = vcmask 1043456   ;;  %vm39_vm1 = vcmask 64512   ;;  %v10467_v49 = vmov 0.0   ;;  %vm1221_vm2 = vcmask 1044480   ;;  %s12421_s0 = inlined_call_operand.vmem [shape: bf16[8,8,58], index: 0, kind: input, shape index: {}]   ;;  %s12422_s1 = inlined_call_operand.vmem [shape: bf16[58,58,32], index: 1, kind: input, shape index: {}]   ;;  %s12423_s2 = inlined_call_operand.vmem [shape: f32[1,32], index: 2, kind: input, shape index: {}]   ;;  %s12424_s3 = inlined_call_operand.vmem [shape: f32[8,32], index: 3, kind: output, shape index: {}]  }
   0x1   :  { %v15_v0 = vld [vmem:[%s12421_s0] sm:$0xf]  ;;  %v17_v1 = vld [vmem:[%s12421_s0 + $0x8] sm:$0xf]  ;;  %v16_v2 = vld [vmem:[%s12421_s0 + $0x4] sm:$0xf] }
   0x2   :  { %23 = vxpose.xlu0.c.b16.start.end [1/1] (short) (narrow) %v15_v0, 64  ;;  %217 = vxpose.xlu1.c.b16.start.end [1/1] (short) (narrow) %v17_v1, 64  ;;  %v54_v3 = vsel %vm52_vm0, %v15_v0, 0  ;;  %v150_v4 = vsel %vm52_vm0, %v16_v2, 0  ;;  %v18_v5 = vld [vmem:[%s12421_s0 + $0xc] sm:$0xf] }
   0x3   :  { %9992 = vmatprep.subr.msk.bf16.mxu0 %vm52_vm0, %v15_v0  ;;  %9993 = vmatprep.subr.msk.bf16.mxu1 %vm52_vm0, %v16_v2  ;;  %v19_v6 = vld [vmem:[%s12421_s0 + $0x10] sm:$0xf]  ;;  %v20_v7 = vld [vmem:[%s12421_s0 + $0x14] sm:$0xf]  ;;  %v21_v8 = vld [vmem:[%s12421_s0 + $0x18] sm:$0xf] }
   0x4   :  { %9217 = vmatpush3.bf16.msra.mxu0 %v54_v3  ;;  %9227 = vmatpush3.bf16.msra.mxu1 %v150_v4  ;;  %v10519_v9 = vld [vmem:[%s12421_s0 + $0x1c] sm:$0xf]  ;;  %v246_v12 = vsel %vm52_vm0, %v17_v1, 0  ;;  %v342_v21 = vsel %vm52_vm0, %v18_v5, 0  ;;  %v438_v23 = vsel %vm52_vm0, %v19_v6, 0  ;;  %v534_v31 = vsel %vm52_vm0, %v20_v7, 0 }
   0x5   :  { %9994 = vmatprep.subr.msk.bf16.mxu0 %vm52_vm0, %v17_v1  ;;  %9995 = vmatprep.subr.msk.bf16.mxu1 %vm52_vm0, %v18_v5  ;;  %v630_v33 = vsel %vm52_vm0, %v21_v8, 0  ;;  %v726_v40 = vsel %vm52_vm0, %v10519_v9, 0  ;;  %v10006_v48 = vld [vmem:[%s12422_s1 + $0x20] sm:$0xff]   ;;  %v10008_v51 = vld [vmem:[%s12422_s1 + $0x28] sm:$0xff]   ;;  %v10010_v53 = vld [vmem:[%s12422_s1 + $0x30] sm:$0xff]   ;;  %vm10468_vm3 = vmmov 0  }
   0x6   :  { %v10007_v50 = vld [vmem:[%s12422_s1] sm:$0xff]   ;;  %v10009_v52 = vld [vmem:[%s12422_s1 + $0x8] sm:$0xff]   ;;  %v10011_v54 = vld [vmem:[%s12422_s1 + $0x10] sm:$0xff]   ;;  %vm1049_vm4 = vcmask 470016   ;;  %vm1057_vm5 = vcmask 466944   ;;  %vm1173_vm6 = vcmask 1041409  }
   0x7   :  { %v10012_v55 = vld [vmem:[%s12422_s1 + $0x38] sm:$0x1f]   ;;  %vm1176_vm7 = vcmask 1042434   ;;  %vm1179_vm8 = vcmask 1043459   ;;  %vm1182_vm9 = vcmask 1044484   ;;  %vm1185_vm10 = vcmask 1045509  }
   0x8   :  { %v10013_v56 = vld [vmem:[%s12422_s1 + $0x18] sm:$0x1f]   ;;  %v1223_v57 = vsel %vm1221_vm2, %v10012_v55, 0  ;;  %vm1188_vm11 = vcmask 1046534   ;;  %vm1191_vm12 = vcmask 1047559   ;;  %vm1217_vm13 = vcmask 474112  }
   0x9   :  { %v1307_v58 = vsel %vm1221_vm2, %v10013_v56, 0  ;;  %vm7741_vm14 = vcmask 261120  }
   0xf   :  { %121 = vxpose.xlu0.c.b16.start.end [1/1] (short) (narrow) %v16_v2, 64  ;;  %313 = vxpose.xlu1.c.b16.start.end [1/1] (short) (narrow) %v18_v5, 64 }
  0x1c   :  { %409 = vxpose.xlu0.c.b16.start.end [1/1] (short) (narrow) %v19_v6, 64  ;;  %505 = vxpose.xlu1.c.b16.start.end [1/1] (short) (narrow) %v20_v7, 64 }
  0x29   :  { %601 = vxpose.xlu0.c.b16.start.end [1/1] (short) (narrow) %v21_v8, 64  ;;  %697 = vxpose.xlu1.c.b16.start.end [1/1] (short) (narrow) %v10519_v9, 64 }
  0x68   :  { %v31_v10 = vpop.trf.xlu0  ;;  %v225_v11 = vpop.trf.xlu1 }
  0x69   :  { %9218 = vmatprep.mubr.msk.bf16.mxu0 %vm39_vm1, %v31_v10 }
  0x6c   :  { %v32_v13 = vpop.trf.xlu0  ;;  %v226_v14 = vpop.trf.xlu1 }
  0x6d   :  { %9219 = vmatmul.mubr.msk.bf16.vlgmr.msra.gmra.mrb[0].mxu0 %vm39_vm1, %v32_v13 }
  0x6e   :  { %9237 = vmatpush3.bf16.msra.mxu0 %v246_v12 }
  0x6f   :  { %9996 = vmatprep.subr.msk.bf16.mxu0 %vm52_vm0, %v19_v6 }
  0x70   :  { %v33_v15 = vpop.trf.xlu0  ;;  %v227_v16 = vpop.trf.xlu1 }
  0x71   :  { %9222 = vmatprep.mubr.msk.bf16.mxu0 %vm39_vm1, %v33_v15 }
  0x74   :  { %v34_v17 = vpop.trf.xlu0  ;;  %v228_v18 = vpop.trf.xlu1 }
  0x75   :  { %9223 = vmatmul.mubr.msk.bf16.gmra.mrb[4].mxu0 %vm39_vm1, %v34_v17 }
  0x76   :  { %9238 = vmatprep.mubr.msk.bf16.mxu0 %vm39_vm1, %v225_v11 }
  0x78   :  { %v129_v19 = vpop.trf.xlu0  ;;  %v321_v20 = vpop.trf.xlu1 }
  0x79   :  { %9228 = vmatprep.mubr.msk.bf16.mxu1 %vm39_vm1, %v129_v19 }
  0x7c   :  { %v130_v22 = vpop.trf.xlu0  ;;  %v322_v24 = vpop.trf.xlu1 }
  0x7d   :  { %9229 = vmatmul.mubr.msk.bf16.vlgmr.msra.gmra.mrb[0].mxu1 %vm39_vm1, %v130_v22  ;;  %9239 = vmatmul.mubr.msk.bf16.vlgmr.msra.gmra.mrb[8].mxu0 %vm39_vm1, %v226_v14 }
  0x7e   :  { %9247 = vmatpush3.bf16.msra.mxu1 %v342_v21  ;;  %9242 = vmatprep.mubr.msk.bf16.mxu0 %vm39_vm1, %v227_v16 }
  0x7f   :  { %9257 = vmatpush3.bf16.msra.mxu0 %v438_v23  ;;  %9997 = vmatprep.subr.msk.bf16.mxu1 %vm52_vm0, %v20_v7 }
  0x80   :  { %v131_v25 = vpop.trf.xlu0  ;;  %v323_v26 = vpop.trf.xlu1  ;;  %9998 = vmatprep.subr.msk.bf16.mxu0 %vm52_vm0, %v21_v8 }
  0x81   :  { %9232 = vmatprep.mubr.msk.bf16.mxu1 %vm39_vm1, %v131_v25 }
  0x84   :  { %v132_v27 = vpop.trf.xlu0  ;;  %v324_v28 = vpop.trf.xlu1 }
  0x85   :  { %9233 = vmatmul.mubr.msk.bf16.gmra.mrb[4].mxu1 %vm39_vm1, %v132_v27  ;;  %9243 = vmatmul.mubr.msk.bf16.gmra.mrb[12].mxu0 %vm39_vm1, %v228_v18 }
  0x86   :  { %9248 = vmatprep.mubr.msk.bf16.mxu1 %vm39_vm1, %v321_v20 }
  0x88   :  { %v417_v29 = vpop.trf.xlu0  ;;  %v513_v30 = vpop.trf.xlu1 }
  0x89   :  { %9258 = vmatprep.mubr.msk.bf16.mxu0 %vm39_vm1, %v417_v29 }
  0x8c   :  { %v418_v32 = vpop.trf.xlu0  ;;  %v514_v34 = vpop.trf.xlu1 }
  0x8d   :  { %9249 = vmatmul.mubr.msk.bf16.vlgmr.msra.gmra.mrb[8].mxu1 %vm39_vm1, %v322_v24  ;;  %9259 = vmatmul.mubr.msk.bf16.vlgmr.msra.gmra.mrb[16].mxu0 %vm39_vm1, %v418_v32 }
  0x8e   :  { %9267 = vmatpush3.bf16.msra.mxu1 %v534_v31  ;;  %9252 = vmatprep.mubr.msk.bf16.mxu1 %vm39_vm1, %v323_v26 }
  0x8f   :  { %9277 = vmatpush3.bf16.msra.mxu0 %v630_v33  ;;  %9999 = vmatprep.subr.msk.bf16.mxu1 %vm52_vm0, %v10519_v9 }
  0x90   :  { %v419_v35 = vpop.trf.xlu0  ;;  %v515_v37 = vpop.trf.xlu1  ;;  %9296 = vmatprep.subr.bf16.mxu0 %v10467_v49 }
  0x91   :  { %9262 = vmatprep.mubr.msk.bf16.mxu0 %vm39_vm1, %v419_v35 }
  0x94   :  { %v420_v36 = vpop.trf.xlu0  ;;  %v516_v39 = vpop.trf.xlu1 }
  0x95   :  { %9253 = vmatmul.mubr.msk.bf16.gmra.mrb[12].mxu1 %vm39_vm1, %v324_v28  ;;  %9263 = vmatmul.mubr.msk.bf16.gmra.mrb[20].mxu0 %vm39_vm1, %v420_v36 }
  0x96   :  { %9268 = vmatprep.mubr.msk.bf16.mxu1 %vm39_vm1, %v513_v30 }
  0x98   :  { %v609_v38 = vpop.trf.xlu0  ;;  %v705_v43 = vpop.trf.xlu1 }
  0x99   :  { %9278 = vmatprep.mubr.msk.bf16.mxu0 %vm39_vm1, %v609_v38 }
  0x9c   :  { %v610_v41 = vpop.trf.xlu0  ;;  %v706_v45 = vpop.trf.xlu1 }
  0x9d   :  { %9269 = vmatmul.mubr.msk.bf16.vlgmr.msra.gmra.mrb[16].mxu1 %vm39_vm1, %v514_v34  ;;  %9279 = vmatmul.mubr.msk.bf16.vlgmr.msra.gmra.mrb[24].mxu0 %vm39_vm1, %v610_v41 }
  0x9e   :  { %9287 = vmatpush3.bf16.msra.mxu1 %v726_v40  ;;  %9272 = vmatprep.mubr.msk.bf16.mxu1 %vm39_vm1, %v515_v37 }
  0x9f   :  { %9308 = vmatprep.subr.bf16.mxu1 %v10467_v49  ;;  %9297 = vmatpush3.bf16.msra.mxu0 %v10006_v48 }
  0xa0   :  { %v611_v42 = vpop.trf.xlu0  ;;  %v707_v46 = vpop.trf.xlu1  ;;  %9298 = vmatprep.subr.bf16.mxu0 %v10467_v49 }
  0xa1   :  { %9282 = vmatprep.mubr.msk.bf16.mxu0 %vm39_vm1, %v611_v42 }
  0xa3   :  { %9299 = vmatpush3.bf16.msra.mxu0 %v10008_v51 }
  0xa4   :  { %v612_v44 = vpop.trf.xlu0  ;;  %v708_v47 = vpop.trf.xlu1  ;;  %9300 = vmatprep.subr.bf16.mxu0 %v10467_v49 }
  0xa5   :  { %9273 = vmatmul.mubr.msk.bf16.gmra.mrb[20].mxu1 %vm39_vm1, %v516_v39  ;;  %9283 = vmatmul.mubr.msk.bf16.gmra.mrb[28].mxu0 %vm39_vm1, %v612_v44 }
  0xa6   :  { %9288 = vmatprep.mubr.msk.bf16.mxu1 %vm39_vm1, %v705_v43  ;;  %9304 = vmatprep.mubr.msk.bf16.mxu0 %vm10468_vm3, %v10467_v49 }
  0xa7   :  { %9301 = vmatpush3.bf16.msra.mxu0 %v10010_v53 }
  0xa8   :  { %9302 = vmatprep.subr.bf16.mxu0 %v10467_v49 }
  0xab   :  { %9303 = vmatpush3.bf16.msra.mxu0 %v1223_v57 }
  0xac   :  { %9320 = vmatprep.subr.bf16.mxu0 %v10467_v49 }
  0xad   :  { %9289 = vmatmul.mubr.msk.bf16.vlgmr.msra.gmra.mrb[24].mxu1 %vm39_vm1, %v706_v45 }
  0xae   :  { %9292 = vmatprep.mubr.msk.bf16.mxu1 %vm39_vm1, %v707_v46  ;;  %9309 = vmatpush3.bf16.msra.mxu1 %v10007_v50 }
  0xaf   :  { %9310 = vmatprep.subr.bf16.mxu1 %v10467_v49 }
  0xb2   :  { %9311 = vmatpush3.bf16.msra.mxu1 %v10009_v52 }
  0xb3   :  { %9312 = vmatprep.subr.bf16.mxu1 %v10467_v49 }
  0xb5   :  { %9293 = vmatmul.mubr.msk.bf16.gmra.mrb[28].mxu1 %vm39_vm1, %v708_v47 }
  0xb6   :  { %9313 = vmatpush3.bf16.msra.mxu1 %v10011_v54  ;;  %9316 = vmatprep.mubr.msk.bf16.mxu1 %vm10468_vm3, %v10467_v49 }
  0xb7   :  { %9314 = vmatprep.subr.bf16.mxu1 %v10467_v49 }
  0xba   :  { %9315 = vmatpush3.bf16.msra.mxu1 %v1307_v58 }
  0xbb   :  { %9332 = vmatprep.subr.bf16.mxu1 %v10467_v49 }
 0x140   :  { %v9220_v59 = vpop.f32.mrb[0].mxu0 }
 0x141   :  { %v8824_v60 = vpack.c.bf16 %v9220_v59, %v9220_v59  ;;  %v90_v61 = vpop.f32.mrb[1].mxu0 }
 0x142   :  { %v8822_v62 = vpack.c.bf16 %v90_v61, %v90_v61  ;;  %v9221_v63 = vpop.f32.mrb[2].mxu0 }
 0x143   :  { %1052 = vst.msk [vmem:[#allocation2 + $0x8] sm:$0xf] %vm1049_vm4, %v8824_v60  ;;  %v8825_v0 = vpack.c.bf16 %v9221_v63, %v9221_v63  ;;  %v93_v1 = vpop.f32.mrb[3].mxu0 }
 0x144   :  { %1050 = vst.msk [vmem:[#allocation2] sm:$0xf] %vm1049_vm4, %v8822_v62  ;;  %v8823_v2 = vpack.c.bf16 %v93_v1, %v93_v1 }
 0x145   :  { %1053 = vst.msk [vmem:[#allocation2 + $0xc] sm:$0xf] %vm1049_vm4, %v8825_v0 }
 0x146   :  { %1051 = vst.msk [vmem:[#allocation2 + $0x4] sm:$0xf] %vm1049_vm4, %v8823_v2 }
 0x148   :  { %v9224_v3 = vpop.f32.mrb[4].mxu0 }
 0x149   :  { %v8828_v4 = vpack.c.bf16 %v9224_v3, %v9224_v3  ;;  %v106_v5 = vpop.f32.mrb[5].mxu0 }
 0x14a   :  { %v8826_v6 = vpack.c.bf16 %v106_v5, %v106_v5  ;;  %v9225_v7 = vpop.f32.mrb[6].mxu0 }
 0x14b   :  { %1056 = vst.msk [vmem:[#allocation2 + $0x18] sm:$0xf] %vm1049_vm4, %v8828_v4  ;;  %v8829_v8 = vpack.c.bf16 %v9225_v7, %v9225_v7  ;;  %v109_v9 = vpop.f32.mrb[7].mxu0 }
 0x14c   :  { %1054 = vst.msk [vmem:[#allocation2 + $0x10] sm:$0xf] %vm1049_vm4, %v8826_v6  ;;  %v8827_v10 = vpack.c.bf16 %v109_v9, %v109_v9 }
 0x14d   :  { %1058 = vst.msk [vmem:[#allocation2 + $0x1c] sm:$0x1] %vm1057_vm5, %v8829_v8 }
 0x14e   :  { %1055 = vst.msk [vmem:[#allocation2 + $0x14] sm:$0xf] %vm1049_vm4, %v8827_v10 }
 0x150   :  { %v9230_v11 = vpop.f32.mrb[0].mxu1  ;;  %v9240_v12 = vpop.f32.mrb[8].mxu0 }
 0x151   :  { %v8832_v13 = vpack.c.bf16 %v9230_v11, %v9230_v11  ;;  %v8840_v14 = vpack.c.bf16 %v9240_v12, %v9240_v12  ;;  %v186_v15 = vpop.f32.mrb[1].mxu1  ;;  %v282_v16 = vpop.f32.mrb[9].mxu0 }
 0x152   :  { %v8830_v17 = vpack.c.bf16 %v186_v15, %v186_v15  ;;  %v8838_v18 = vpack.c.bf16 %v282_v16, %v282_v16  ;;  %v9231_v19 = vpop.f32.mrb[2].mxu1  ;;  %v9241_v20 = vpop.f32.mrb[10].mxu0 }
 0x153   :  { %1061 = vst.msk [vmem:[#allocation2 + $0x28] sm:$0xf] %vm1049_vm4, %v8832_v13  ;;  %1069 = vst.msk [vmem:[#allocation2 + $0x48] sm:$0xf] %vm1049_vm4, %v8840_v14  ;;  %v8833_v21 = vpack.c.bf16 %v9231_v19, %v9231_v19  ;;  %v8841_v22 = vpack.c.bf16 %v9241_v20, %v9241_v20  ;;  %v189_v23 = vpop.f32.mrb[3].mxu1  ;;  %v285_v24 = vpop.f32.mrb[11].mxu0 }
 0x154   :  { %1059 = vst.msk [vmem:[#allocation2 + $0x20] sm:$0xf] %vm1049_vm4, %v8830_v17  ;;  %1067 = vst.msk [vmem:[#allocation2 + $0x40] sm:$0xf] %vm1049_vm4, %v8838_v18  ;;  %v8831_v25 = vpack.c.bf16 %v189_v23, %v189_v23  ;;  %v8839_v26 = vpack.c.bf16 %v285_v24, %v285_v24 }
 0x155   :  { %1062 = vst.msk [vmem:[#allocation2 + $0x2c] sm:$0xf] %vm1049_vm4, %v8833_v21  ;;  %1070 = vst.msk [vmem:[#allocation2 + $0x4c] sm:$0xf] %vm1049_vm4, %v8841_v22 }
 0x156   :  { %1060 = vst.msk [vmem:[#allocation2 + $0x24] sm:$0xf] %vm1049_vm4, %v8831_v25  ;;  %1068 = vst.msk [vmem:[#allocation2 + $0x44] sm:$0xf] %vm1049_vm4, %v8839_v26 }
 0x158   :  { %v9234_v27 = vpop.f32.mrb[4].mxu1  ;;  %v9244_v28 = vpop.f32.mrb[12].mxu0 }
 0x159   :  { %v8836_v29 = vpack.c.bf16 %v9234_v27, %v9234_v27  ;;  %v8844_v30 = vpack.c.bf16 %v9244_v28, %v9244_v28  ;;  %v202_v31 = vpop.f32.mrb[5].mxu1  ;;  %v298_v32 = vpop.f32.mrb[13].mxu0  ;;  %v10652_v28 = vld [vmem:[#allocation2] ss:$0 sps:$4 sm:$0x11]  }
 0x15a   :  { %v8834_v33 = vpack.c.bf16 %v202_v31, %v202_v31  ;;  %v8842_v34 = vpack.c.bf16 %v298_v32, %v298_v32  ;;  %v9235_v35 = vpop.f32.mrb[6].mxu1  ;;  %v9245_v36 = vpop.f32.mrb[14].mxu0 }
 0x15b   :  { %1065 = vst.msk [vmem:[#allocation2 + $0x38] sm:$0xf] %vm1049_vm4, %v8836_v29  ;;  %1073 = vst.msk [vmem:[#allocation2 + $0x58] sm:$0xf] %vm1049_vm4, %v8844_v30  ;;  %v8837_v37 = vpack.c.bf16 %v9235_v35, %v9235_v35  ;;  %v8845_v38 = vpack.c.bf16 %v9245_v36, %v9245_v36  ;;  %v205_v39 = vpop.f32.mrb[7].mxu1  ;;  %v301_v41 = vpop.f32.mrb[15].mxu0 }
 0x15c   :  { %1063 = vst.msk [vmem:[#allocation2 + $0x30] sm:$0xf] %vm1049_vm4, %v8834_v33  ;;  %1071 = vst.msk [vmem:[#allocation2 + $0x50] sm:$0xf] %vm1049_vm4, %v8842_v34  ;;  %v8835_v40 = vpack.c.bf16 %v205_v39, %v205_v39  ;;  %v8843_v42 = vpack.c.bf16 %v301_v41, %v301_v41 }
 0x15d   :  { %1066 = vst.msk [vmem:[#allocation2 + $0x3c] sm:$0x1] %vm1057_vm5, %v8837_v37  ;;  %1074 = vst.msk [vmem:[#allocation2 + $0x5c] sm:$0x1] %vm1057_vm5, %v8845_v38 }
 0x15e   :  { %1064 = vst.msk [vmem:[#allocation2 + $0x34] sm:$0xf] %vm1049_vm4, %v8835_v40  ;;  %1072 = vst.msk [vmem:[#allocation2 + $0x54] sm:$0xf] %vm1049_vm4, %v8843_v42 }
 0x15f   :  { %v10004_v29 = vld [vmem:[#allocation2 + $0x20] ss:$0 sps:$4 sm:$0x11]  }
 0x160   :  { %v9250_v43 = vpop.f32.mrb[8].mxu1  ;;  %v9260_v44 = vpop.f32.mrb[16].mxu0  ;;  %v10005_v36 = vld [vmem:[#allocation2 + $0x40] ss:$0 sps:$4 sm:$0x11]  }
 0x161   :  { %v8848_v45 = vpack.c.bf16 %v9250_v43, %v9250_v43  ;;  %v8856_v46 = vpack.c.bf16 %v9260_v44, %v9260_v44  ;;  %v378_v47 = vpop.f32.mrb[9].mxu1  ;;  %v474_v48 = vpop.f32.mrb[17].mxu0 }
 0x162   :  { %v8846_v50 = vpack.c.bf16 %v378_v47, %v378_v47  ;;  %v8854_v51 = vpack.c.bf16 %v474_v48, %v474_v48  ;;  %v9251_v52 = vpop.f32.mrb[10].mxu1  ;;  %v9261_v53 = vpop.f32.mrb[18].mxu0 }
 0x163   :  { %1077 = vst.msk [vmem:[#allocation2 + $0x68] sm:$0xf] %vm1049_vm4, %v8848_v45  ;;  %1085 = vst.msk [vmem:[#allocation2 + $0x88] sm:$0xf] %vm1049_vm4, %v8856_v46  ;;  %v8849_v54 = vpack.c.bf16 %v9251_v52, %v9251_v52  ;;  %v8857_v55 = vpack.c.bf16 %v9261_v53, %v9261_v53  ;;  %v381_v56 = vpop.f32.mrb[11].mxu1  ;;  %v477_v57 = vpop.f32.mrb[19].mxu0  ;;  %v1164_v45 = vunpack.c.l.b16 %v10652_v28  ;;  %v1165_v46 = vunpack.c.l.b16 %v10004_v29 }
 0x164   :  { %1075 = vst.msk [vmem:[#allocation2 + $0x60] sm:$0xf] %vm1049_vm4, %v8846_v50  ;;  %1083 = vst.msk [vmem:[#allocation2 + $0x80] sm:$0xf] %vm1049_vm4, %v8854_v51  ;;  %v8847_v58 = vpack.c.bf16 %v381_v56, %v381_v56  ;;  %v8855_v59 = vpack.c.bf16 %v477_v57, %v477_v57  ;;  %v1166_v51 = vunpack.c.l.b16 %v10005_v36 }
 0x165   :  { %1078 = vst.msk [vmem:[#allocation2 + $0x6c] sm:$0xf] %vm1049_vm4, %v8849_v54  ;;  %1086 = vst.msk [vmem:[#allocation2 + $0x8c] sm:$0xf] %vm1049_vm4, %v8857_v55  ;;  %v1172_v55 = vrot.slane %v1164_v45, 1  ;;  %v1265_v56 = vrot.slane %v1165_v46, 7 }
 0x166   :  { %1076 = vst.msk [vmem:[#allocation2 + $0x64] sm:$0xf] %vm1049_vm4, %v8847_v58  ;;  %1084 = vst.msk [vmem:[#allocation2 + $0x84] sm:$0xf] %vm1049_vm4, %v8855_v59 }
 0x167   :  { %v10665_v57 = vld [vmem:[#allocation2] ss:$0 sps:$4 sm:$0x22]  }
 0x168   :  { %v9254_v60 = vpop.f32.mrb[12].mxu1  ;;  %v9264_v61 = vpop.f32.mrb[20].mxu0 }
 0x169   :  { %v8852_v62 = vpack.c.bf16 %v9254_v60, %v9254_v60  ;;  %v8860_v63 = vpack.c.bf16 %v9264_v61, %v9264_v61  ;;  %v394_v0 = vpop.f32.mrb[13].mxu1  ;;  %v490_v1 = vpop.f32.mrb[21].mxu0 }
 0x16a   :  { %v8850_v2 = vpack.c.bf16 %v394_v0, %v394_v0  ;;  %v8858_v3 = vpack.c.bf16 %v490_v1, %v490_v1  ;;  %v9255_v4 = vpop.f32.mrb[14].mxu1  ;;  %v9265_v5 = vpop.f32.mrb[22].mxu0 }
 0x16b   :  { %1081 = vst.msk [vmem:[#allocation2 + $0x78] sm:$0xf] %vm1049_vm4, %v8852_v62  ;;  %1089 = vst.msk [vmem:[#allocation2 + $0x98] sm:$0xf] %vm1049_vm4, %v8860_v63  ;;  %v8853_v6 = vpack.c.bf16 %v9255_v4, %v9255_v4  ;;  %v8861_v7 = vpack.c.bf16 %v9265_v5, %v9265_v5  ;;  %v397_v8 = vpop.f32.mrb[15].mxu1  ;;  %v493_v9 = vpop.f32.mrb[23].mxu0 }
 0x16c   :  { %1079 = vst.msk [vmem:[#allocation2 + $0x70] sm:$0xf] %vm1049_vm4, %v8850_v2  ;;  %1087 = vst.msk [vmem:[#allocation2 + $0x90] sm:$0xf] %vm1049_vm4, %v8858_v3  ;;  %v8851_v10 = vpack.c.bf16 %v397_v8, %v397_v8  ;;  %v8859_v11 = vpack.c.bf16 %v493_v9, %v493_v9  ;;  %v1175_v3 = vrot.slane %v1166_v51, 7  ;;  %v1267_v4 = vrot.slane %v1166_v51, 6 }
 0x16d   :  { %1082 = vst.msk [vmem:[#allocation2 + $0x7c] sm:$0x1] %vm1057_vm5, %v8853_v6  ;;  %1090 = vst.msk [vmem:[#allocation2 + $0x9c] sm:$0x1] %vm1057_vm5, %v8861_v7  ;;  %v1174_v7 = vsel %vm1173_vm6, %v1165_v46, %v1172_v55 }
 0x16e   :  { %1080 = vst.msk [vmem:[#allocation2 + $0x74] sm:$0xf] %vm1049_vm4, %v8851_v10  ;;  %1088 = vst.msk [vmem:[#allocation2 + $0x94] sm:$0xf] %vm1049_vm4, %v8859_v11  ;;  %v1266_v10 = vsel %vm1173_vm6, %v1265_v56, %v1164_v45 }
 0x16f   :  { %v10014_v50 = vld [vmem:[#allocation2 + $0x60] ss:$0 sps:$4 sm:$0x11]  }
 0x170   :  { %v9270_v12 = vpop.f32.mrb[16].mxu1  ;;  %v9280_v13 = vpop.f32.mrb[24].mxu0  ;;  %v10015_v52 = vld [vmem:[#allocation2 + $0x80] ss:$0 sps:$4 sm:$0x11]   ;;  %v1167_v54 = vunpack.c.l.b16 %v10014_v50 }
 0x171   :  { %v8864_v14 = vpack.c.bf16 %v9270_v12, %v9270_v12  ;;  %v8872_v15 = vpack.c.bf16 %v9280_v13, %v9280_v13  ;;  %v570_v16 = vpop.f32.mrb[17].mxu1  ;;  %v666_v17 = vpop.f32.mrb[25].mxu0  ;;  %v10028_v63 = vld [vmem:[#allocation2 + $0x20] ss:$0 sps:$4 sm:$0x22]   ;;  %v1168_v2 = vunpack.c.l.b16 %v10015_v52  ;;  %v1390_v12 = vunpack.c.l.b16 %v10665_v57 }
 0x172   :  { %v8862_v18 = vpack.c.bf16 %v570_v16, %v570_v16  ;;  %v8870_v19 = vpack.c.bf16 %v666_v17, %v666_v17  ;;  %v9271_v20 = vpop.f32.mrb[18].mxu1  ;;  %v9281_v21 = vpop.f32.mrb[26].mxu0  ;;  %v1178_v8 = vrot.slane %v1167_v54, 6  ;;  %v1269_v11 = vrot.slane %v1167_v54, 5  ;;  %v10019_v57 = vld [vmem:[%s12422_s1 + $0x40] sm:$0xff]  }
 0x173   :  { %1093 = vst.msk [vmem:[#allocation2 + $0xa8] sm:$0xf] %vm1049_vm4, %v8864_v14  ;;  %1101 = vst.msk [vmem:[#allocation2 + $0xc8] sm:$0xf] %vm1049_vm4, %v8872_v15  ;;  %v8865_v22 = vpack.c.bf16 %v9271_v20, %v9271_v20  ;;  %v8873_v23 = vpack.c.bf16 %v9281_v21, %v9281_v21  ;;  %v573_v24 = vpop.f32.mrb[19].mxu1  ;;  %v669_v25 = vpop.f32.mrb[27].mxu0  ;;  %v1391_v13 = vunpack.c.l.b16 %v10028_v63  ;;  %v1177_v14 = vsel %vm1176_vm7, %v1175_v3, %v1174_v7 }
 0x174   :  { %1091 = vst.msk [vmem:[#allocation2 + $0xa0] sm:$0xf] %vm1049_vm4, %v8862_v18  ;;  %1099 = vst.msk [vmem:[#allocation2 + $0xc0] sm:$0xf] %vm1049_vm4, %v8870_v19  ;;  %v8863_v26 = vpack.c.bf16 %v573_v24, %v573_v24  ;;  %v8871_v27 = vpack.c.bf16 %v669_v25, %v669_v25  ;;  %v1181_v15 = vrot.slane %v1168_v2, 5  ;;  %v1180_v19 = vsel %vm1179_vm8, %v1178_v8, %v1177_v14 }
 0x175   :  { %1094 = vst.msk [vmem:[#allocation2 + $0xac] sm:$0xf] %vm1049_vm4, %v8865_v22  ;;  %1102 = vst.msk [vmem:[#allocation2 + $0xcc] sm:$0xf] %vm1049_vm4, %v8873_v23  ;;  %v1268_v20 = vsel %vm1176_vm7, %v1267_v4, %v1266_v10  ;;  %v1271_v21 = vrot.slane %v1168_v2, 4  ;;  %v10021_v4 = vld [vmem:[%s12422_s1 + $0x48] sm:$0xff]  }
 0x176   :  { %1092 = vst.msk [vmem:[#allocation2 + $0xa4] sm:$0xf] %vm1049_vm4, %v8863_v26  ;;  %1100 = vst.msk [vmem:[#allocation2 + $0xc4] sm:$0xf] %vm1049_vm4, %v8871_v27  ;;  %v1270_v26 = vsel %vm1179_vm8, %v1269_v11, %v1268_v20  ;;  %v10024_v20 = vld [vmem:[%s12422_s1 + $0x70] sm:$0xff]  }
 0x177   :  { %v10675_v16 = vld [vmem:[#allocation2 + $0x40] ss:$0 sps:$4 sm:$0x22]  }
 0x178   :  { %v9274_v30 = vpop.f32.mrb[20].mxu1  ;;  %v9284_v31 = vpop.f32.mrb[28].mxu0  ;;  %v10679_v22 = vld [vmem:[#allocation2 + $0x60] ss:$0 sps:$4 sm:$0x22]   ;;  %v1392_v36 = vunpack.c.l.b16 %v10675_v16 }
 0x179   :  { %v8868_v32 = vpack.c.bf16 %v9274_v30, %v9274_v30  ;;  %v8876_v33 = vpack.c.bf16 %v9284_v31, %v9284_v31  ;;  %v586_v34 = vpop.f32.mrb[21].mxu1  ;;  %v682_v35 = vpop.f32.mrb[29].mxu0  ;;  %v1398_v30 = vrot.slane %v1390_v12, 2  ;;  %v1399_v31 = vrot.slane %v1391_v13, 1 }
 0x17a   :  { %v8866_v37 = vpack.c.bf16 %v586_v34, %v586_v34  ;;  %v8874_v38 = vpack.c.bf16 %v682_v35, %v682_v35  ;;  %v9275_v39 = vpop.f32.mrb[22].mxu1  ;;  %v9285_v40 = vpop.f32.mrb[30].mxu0  ;;  %v1183_v35 = vsel %vm1182_vm9, %v1181_v15, %v1180_v19  ;;  %v1393_v45 = vunpack.c.l.b16 %v10679_v22  ;;  %v10044_v8 = vld [vmem:[#allocation2 + $0x20] ss:$0 sps:$4 sm:$0x44]  }
 0x17b   :  { %1097 = vst.msk [vmem:[#allocation2 + $0xb8] sm:$0xf] %vm1049_vm4, %v8868_v32  ;;  %1105 = vst.msk [vmem:[#allocation2 + $0xd8] sm:$0xf] %vm1049_vm4, %v8876_v33  ;;  %v8869_v41 = vpack.c.bf16 %v9275_v39, %v9275_v39  ;;  %v8877_v42 = vpack.c.bf16 %v9285_v40, %v9285_v40  ;;  %v589_v43 = vpop.f32.mrb[23].mxu1  ;;  %v685_v44 = vpop.f32.mrb[31].mxu0  ;;  %v1272_v39 = vsel %vm1182_vm9, %v1271_v21, %v1270_v26 }
 0x17c   :  { %1095 = vst.msk [vmem:[#allocation2 + $0xb0] sm:$0xf] %vm1049_vm4, %v8866_v37  ;;  %1103 = vst.msk [vmem:[#allocation2 + $0xd0] sm:$0xf] %vm1049_vm4, %v8874_v38  ;;  %v8867_v47 = vpack.c.bf16 %v589_v43, %v589_v43  ;;  %v8875_v48 = vpack.c.bf16 %v685_v44, %v685_v44  ;;  %v1495_v54 = vrot.slane %v1392_v36, 1 }
 0x17d   :  { %1098 = vst.msk [vmem:[#allocation2 + $0xbc] sm:$0x1] %vm1057_vm5, %v8869_v41  ;;  %1106 = vst.msk [vmem:[#allocation2 + $0xdc] sm:$0x1] %vm1057_vm5, %v8877_v42  ;;  %v10026_v21 = vld [vmem:[%s12422_s1 + $0x78] sm:$0x1f]  }
 0x17e   :  { %1096 = vst.msk [vmem:[#allocation2 + $0xb4] sm:$0xf] %vm1049_vm4, %v8867_v47  ;;  %1104 = vst.msk [vmem:[#allocation2 + $0xd4] sm:$0xf] %vm1049_vm4, %v8875_v48  ;;  %v1493_v47 = vrot.slane %v1391_v13, 2 }
 0x17f   :  { %v10016_v60 = vld [vmem:[#allocation2 + $0xa0] ss:$0 sps:$4 sm:$0x11]  }
 0x180   :  { %v9290_v53 = vpop.f32.mrb[24].mxu1  ;;  %v10017_v6 = vld [vmem:[#allocation2 + $0xc0] ss:$0 sps:$4 sm:$0x11]   ;;  %v1169_v9 = vunpack.c.l.b16 %v10016_v60  ;;  %v1402_v60 = vrot.slane %v1393_v45, 7 }
 0x181   :  { %v8880_v58 = vpack.c.bf16 %v9290_v53, %v9290_v53  ;;  %v762_v59 = vpop.f32.mrb[25].mxu1  ;;  %v1170_v18 = vunpack.c.l.b16 %v10017_v6  ;;  %v10031_v44 = vld [vmem:[#allocation2 + $0x80] ss:$0 sps:$4 sm:$0x22]   ;;  %v1492_v53 = vrot.slane %v1390_v12, 3 }
 0x182   :  { %v8878_v61 = vpack.c.bf16 %v762_v59, %v762_v59  ;;  %v9291_v62 = vpop.f32.mrb[26].mxu1  ;;  %v1184_v25 = vrot.slane %v1169_v9, 4  ;;  %v1273_v27 = vrot.slane %v1169_v9, 3  ;;  %v10032_v46 = vld [vmem:[#allocation2 + $0xa0] ss:$0 sps:$4 sm:$0x22]   ;;  %v1400_v59 = vsel %vm1173_vm6, %v1399_v31, %v1398_v30 }
 0x183   :  { %1109 = vst.msk [vmem:[#allocation2 + $0xe8] sm:$0xf] %vm1049_vm4, %v8880_v58  ;;  %v8881_v0 = vpack.c.bf16 %v9291_v62, %v9291_v62  ;;  %v765_v1 = vpop.f32.mrb[27].mxu1  ;;  %v1187_v38 = vrot.slane %v1170_v18, 3  ;;  %v1275_v40 = vrot.slane %v1170_v18, 2  ;;  %v10020_v58 = vld [vmem:[%s12422_s1 + $0x60] sm:$0xff]   ;;  %v1494_v2 = vsel %vm1173_vm6, %v1493_v47, %v1492_v53 }
 0x184   :  { %1107 = vst.msk [vmem:[#allocation2 + $0xe0] sm:$0xf] %vm1049_vm4, %v8878_v61  ;;  %v8879_v5 = vpack.c.bf16 %v765_v1, %v765_v1  ;;  %v1186_v42 = vsel %vm1185_vm10, %v1184_v25, %v1183_v35  ;;  %v1274_v43 = vsel %vm1185_vm10, %v1273_v27, %v1272_v39  ;;  %v10033_v63 = vld [vmem:[#allocation2 + $0xc0] ss:$0 sps:$4 sm:$0x22]   ;;  %v1394_v1 = vunpack.c.l.b16 %v10031_v44 }
 0x185   :  { %1110 = vst.msk [vmem:[#allocation2 + $0xec] sm:$0xf] %vm1049_vm4, %v8881_v0  ;;  %v1189_v51 = vsel %vm1188_vm11, %v1187_v38, %v1186_v42  ;;  %v1276_v52 = vsel %vm1188_vm11, %v1275_v40, %v1274_v43  ;;  %v1395_v3 = vunpack.c.l.b16 %v10032_v46  ;;  %v1401_v6 = vsel %vm1176_vm7, %v1392_v36, %v1400_v59  ;;  %v10025_v18 = vld [vmem:[%s12422_s1 + $0x58] sm:$0x1f]   ;;  %v10035_v47 = vld [vmem:[%s12422_s1 + $0x80] sm:$0xff]  }
 0x186   :  { %1108 = vst.msk [vmem:[#allocation2 + $0xe4] sm:$0xf] %vm1049_vm4, %v8879_v5  ;;  %v10022_v5 = vld [vmem:[%s12422_s1 + $0x68] sm:$0xff]   ;;  %v1496_v7 = vsel %vm1176_vm7, %v1495_v54, %v1494_v2  ;;  %v1396_v9 = vunpack.c.l.b16 %v10033_v63  ;;  %v1404_v10 = vrot.slane %v1394_v1, 6  ;;  %v1498_v12 = vrot.slane %v1394_v1, 7 }
 0x187   :  { %v1497_v11 = vsel %vm1179_vm8, %v1393_v45, %v1496_v7  ;;  %v1403_v14 = vsel %vm1179_vm8, %v1402_v60, %v1401_v6  ;;  %v1406_v15 = vrot.slane %v1395_v3, 5  ;;  %v1500_v16 = vrot.slane %v1395_v3, 6  ;;  %v10043_v19 = vld [vmem:[#allocation2] ss:$0 sps:$4 sm:$0x44]   ;;  %v10037_v63 = vld [vmem:[%s12422_s1 + $0x88] sm:$0xff]  }
 0x188   :  { %v9294_v17 = vpop.f32.mrb[28].mxu1  ;;  %v10045_v22 = vld [vmem:[#allocation2 + $0x40] ss:$0 sps:$4 sm:$0x44]   ;;  %v1408_v25 = vrot.slane %v1396_v9, 4  ;;  %v1499_v26 = vsel %vm1182_vm9, %v1498_v12, %v1497_v11  ;;  %v1502_v27 = vrot.slane %v1396_v9, 5 }
 0x189   :  { %v8884_v23 = vpack.c.bf16 %v9294_v17, %v9294_v17  ;;  %v778_v24 = vpop.f32.mrb[29].mxu1  ;;  %v10023_v17 = vld [vmem:[%s12422_s1 + $0x50] sm:$0xff]   ;;  %v1501_v30 = vsel %vm1185_vm10, %v1500_v16, %v1499_v26  ;;  %v1534_v35 = vsel %vm1221_vm2, %v10026_v21, 0  ;;  %v1620_v36 = vunpack.c.l.b16 %v10045_v22  ;;  %v10047_v39 = vld [vmem:[#allocation2 + $0x80] ss:$0 sps:$4 sm:$0x44]  }
 0x18a   :  { %v8882_v28 = vpack.c.bf16 %v778_v24, %v778_v24  ;;  %v9295_v29 = vpop.f32.mrb[30].mxu1  ;;  %v1405_v24 = vsel %vm1182_vm9, %v1404_v10, %v1403_v14  ;;  %v1503_v38 = vsel %vm1188_vm11, %v1502_v27, %v1501_v30  ;;  %v10748_v43 = vld [vmem:[#allocation2 + $0xa0] ss:$0 sps:$4 sm:$0x44]   ;;  %v10038_v1 = vld [vmem:[%s12422_s1 + $0xa8] sm:$0xff]   ;;  %v10039_v12 = vld [vmem:[%s12422_s1 + $0x90] sm:$0xff]  }
 0x18b   :  { %1113 = vst.msk [vmem:[#allocation2 + $0xf8] sm:$0xf] %vm1049_vm4, %v8884_v23  ;;  %v8885_v32 = vpack.c.bf16 %v9295_v29, %v9295_v29  ;;  %v781_v33 = vpop.f32.mrb[31].mxu1  ;;  %v10018_v34 = vld [vmem:[#allocation2 + $0xe0] ss:$0 sps:$4 sm:$0x11]   ;;  %v1619_v23 = vunpack.c.l.b16 %v10044_v8  ;;  %v1623_v59 = vunpack.c.l.b16 %v10748_v43 }
 0x18c   :  { %1111 = vst.msk [vmem:[#allocation2 + $0xf0] sm:$0xf] %vm1049_vm4, %v8882_v28  ;;  %v8883_v37 = vpack.c.bf16 %v781_v33, %v781_v33  ;;  %v1171_v41 = vunpack.c.l.b16 %v10018_v34  ;;  %v10034_v0 = vld [vmem:[#allocation2 + $0xe0] ss:$0 sps:$4 sm:$0x22]   ;;  %v1407_v28 = vsel %vm1185_vm10, %v1406_v15, %v1405_v24  ;;  %v1618_v33 = vunpack.c.l.b16 %v10043_v19 }
 0x18d   :  { %1114 = vst.msk [vmem:[#allocation2 + $0xfc] sm:$0x1] %vm1057_vm5, %v8885_v32  ;;  %v1397_v13 = vunpack.c.l.b16 %v10034_v0  ;;  %v10046_v32 = vld [vmem:[#allocation2 + $0x60] ss:$0 sps:$4 sm:$0x44]   ;;  %v1440_v34 = vsel %vm1221_vm2, %v10025_v18, 0 }
 0x18e   :  { %1112 = vst.msk [vmem:[#allocation2 + $0xf4] sm:$0xf] %vm1049_vm4, %v8883_v37  ;;  %v1190_v48 = vrot.slane %v1171_v41, 2  ;;  %v1277_v50 = vrot.slane %v1171_v41, 1  ;;  %v1409_v37 = vsel %vm1188_vm11, %v1408_v25, %v1407_v28  ;;  %v1627_v40 = vrot.slane %v1619_v23, 3 }
 0x18f   :  { %v1410_v29 = vrot.slane %v1397_v13, 3  ;;  %v1504_v31 = vrot.slane %v1397_v13, 4  ;;  %v1621_v44 = vunpack.c.l.b16 %v10046_v32  ;;  %v1721_v45 = vrot.slane %v1619_v23, 4  ;;  %v10059_v0 = vld [vmem:[#allocation2] ss:$0 sps:$4 sm:$0x88]  }
 0x190   :  { %v1192_v55 = vsel %vm1191_vm12, %v1190_v48, %v1189_v51  ;;  %v1278_v56 = vsel %vm1191_vm12, %v1277_v50, %v1276_v52  ;;  %v1626_v46 = vrot.slane %v1618_v33, 4  ;;  %v10036_v48 = vld [vmem:[%s12422_s1 + $0xa0] sm:$0xff]   ;;  %v1629_v50 = vrot.slane %v1620_v36, 2  ;;  %v10040_v13 = vld [vmem:[%s12422_s1 + $0xb0] sm:$0xff]   ;;  %v10041_v14 = vld [vmem:[%s12422_s1 + $0x98] sm:$0x1f]  }
 0x191   :  { %v1193_v61 = vpack.c.b16 %v1192_v55, %v1192_v55  ;;  %v1279_v62 = vpack.c.b16 %v1278_v56, %v1278_v56  ;;  %v1411_v41 = vsel %vm1191_vm12, %v1410_v29, %v1409_v37  ;;  %v1505_v42 = vsel %vm1191_vm12, %v1504_v31, %v1503_v38  ;;  %v10049_v55 = vld [vmem:[#allocation2 + $0xc0] ss:$0 sps:$4 sm:$0x44]   ;;  %v10042_v15 = vld [vmem:[%s12422_s1 + $0xb8] sm:$0x1f]  }
 0x192   :  { %v1720_v51 = vrot.slane %v1618_v33, 5  ;;  %v1723_v52 = vrot.slane %v1620_v36, 3  ;;  %v1412_v53 = vpack.c.b16 %v1411_v41, %v1411_v41  ;;  %v1506_v54 = vpack.c.b16 %v1505_v42, %v1505_v42  ;;  %v10060_v2 = vld [vmem:[#allocation2 + $0x20] ss:$0 sps:$4 sm:$0x88]  }
 0x193   :  { %9305 = vmatmul.mubr.msk.bf16.vlgmr.msra.gmra.mrb[32].mxu0 %vm1217_vm13, %v1193_v61  ;;  %9317 = vmatmul.mubr.msk.bf16.vlgmr.msra.gmra.mrb[32].mxu1 %vm1217_vm13, %v1279_v62  ;;  %v1622_v56 = vunpack.c.l.b16 %v10047_v39  ;;  %v1631_v60 = vrot.slane %v1621_v44, 1  ;;  %v1725_v62 = vrot.slane %v1621_v44, 2  ;;  %v1624_v3 = vunpack.c.l.b16 %v10049_v55  ;;  %v10061_v11 = vld [vmem:[#allocation2 + $0x40] ss:$0 sps:$4 sm:$0x88]  }
 0x194   :  { %9321 = vmatpush3.bf16.msra.mxu0 %v10019_v57  ;;  %9333 = vmatpush3.bf16.msra.mxu1 %v10020_v58  ;;  %v1628_v57 = vsel %vm1173_vm6, %v1627_v40, %v1626_v46  ;;  %v10050_v58 = vld [vmem:[#allocation2 + $0xe0] ss:$0 sps:$4 sm:$0x44]   ;;  %v1722_v61 = vsel %vm1173_vm6, %v1721_v45, %v1720_v51  ;;  %v1634_v9 = vrot.slane %v1623_v59, 7  ;;  %v1846_v16 = vunpack.c.l.b16 %v10059_v0 }
 0x195   :  { %9322 = vmatprep.subr.bf16.mxu0 %v10467_v49  ;;  %9334 = vmatprep.subr.bf16.mxu1 %v10467_v49  ;;  %v1727_v6 = vrot.slane %v1622_v56, 1  ;;  %v1625_v7 = vunpack.c.l.b16 %v10050_v58  ;;  %v1636_v19 = vrot.slane %v1624_v3, 6  ;;  %v1730_v21 = vrot.slane %v1624_v3, 7  ;;  %v10062_v22 = vld [vmem:[#allocation2 + $0x60] ss:$0 sps:$4 sm:$0x88]  }
 0x196   :  { %9328 = vmatprep.mubr.msk.bf16.mxu0 %vm10468_vm3, %v10467_v49  ;;  %9340 = vmatprep.mubr.msk.bf16.mxu1 %vm10468_vm3, %v10467_v49  ;;  %v1848_v27 = vunpack.c.l.b16 %v10061_v11  ;;  %v1668_v28 = vsel %vm1221_vm2, %v10041_v14, 0  ;;  %v10063_v29 = vld [vmem:[#allocation2 + $0x80] ss:$0 sps:$4 sm:$0x88]   ;;  %v1762_v32 = vsel %vm1221_vm2, %v10042_v15, 0  ;;  %v1849_v36 = vunpack.c.l.b16 %v10062_v22  ;;  %v10056_v11 = vld [vmem:[%s12422_s1 + $0xf0] sm:$0xff]  }
 0x197   :  { %v1638_v24 = vrot.slane %v1625_v7, 5  ;;  %v1732_v26 = vrot.slane %v1625_v7, 6  ;;  %v1854_v39 = vrot.slane %v1846_v16, 6  ;;  %v1948_v40 = vrot.slane %v1846_v16, 7  ;;  %v10051_v41 = vld [vmem:[%s12422_s1 + $0xc0] sm:$0xff]  }
 0x198   :  { %9323 = vmatpush3.bf16.msra.mxu0 %v10021_v4  ;;  %9335 = vmatpush3.bf16.msra.mxu1 %v10022_v5  ;;  %v1630_v4 = vsel %vm1176_vm7, %v1629_v50, %v1628_v57  ;;  %v1724_v5 = vsel %vm1176_vm7, %v1723_v52, %v1722_v61  ;;  %v10052_v42 = vld [vmem:[%s12422_s1 + $0xe0] sm:$0xff]   ;;  %v1857_v43 = vrot.slane %v1848_v27, 4  ;;  %v1850_v51 = vunpack.c.l.b16 %v10063_v29  ;;  %v10054_v57 = vld [vmem:[%s12422_s1 + $0xe8] sm:$0xff]   ;;  %v10057_v61 = vld [vmem:[%s12422_s1 + $0xd8] sm:$0x1f]  }
 0x199   :  { %9324 = vmatprep.subr.bf16.mxu0 %v10467_v49  ;;  %9336 = vmatprep.subr.bf16.mxu1 %v10467_v49  ;;  %v1632_v8 = vsel %vm1179_vm8, %v1631_v60, %v1630_v4  ;;  %v1726_v10 = vsel %vm1179_vm8, %v1725_v62, %v1724_v5  ;;  %v10811_v44 = vld [vmem:[#allocation2 + $0xc0] ss:$0 sps:$4 sm:$0x88]   ;;  %v1859_v52 = vrot.slane %v1849_v36, 3  ;;  %v1953_v55 = vrot.slane %v1849_v36, 4 }
 0x19a   :  { %v1633_v18 = vsel %vm1182_vm9, %v1622_v56, %v1632_v8  ;;  %v10053_v56 = vld [vmem:[%s12422_s1 + $0xc8] sm:$0xff]   ;;  %v10827_v60 = vld [vmem:[#allocation2 + $0x24] ss:$0 sps:$4 sm:$0x11]   ;;  %v1852_v62 = vunpack.c.l.b16 %v10811_v44  ;;  %v1861_v0 = vrot.slane %v1850_v51, 2 }
 0x19b   :  { %v1635_v23 = vsel %vm1185_vm10, %v1634_v9, %v1633_v18  ;;  %v10077_v3 = vld [vmem:[#allocation2 + $0x44] ss:$0 sps:$4 sm:$0x11]   ;;  %v10058_v4 = vld [vmem:[%s12422_s1 + $0xf8] sm:$0x1f]   ;;  %v10055_v9 = vld [vmem:[%s12422_s1 + $0xd0] sm:$0xff]  }
 0x19c   :  { %9325 = vmatpush3.bf16.msra.mxu0 %v10023_v17  ;;  %9337 = vmatpush3.bf16.msra.mxu1 %v10024_v20  ;;  %v1847_v17 = vunpack.c.l.b16 %v10060_v2  ;;  %v1728_v20 = vsel %vm1182_vm9, %v1727_v6, %v1726_v10  ;;  %v1637_v33 = vsel %vm1188_vm11, %v1636_v19, %v1635_v23  ;;  %v10075_v2 = vld [vmem:[#allocation2 + $0x4] ss:$0 sps:$4 sm:$0x11]   ;;  %v1959_v15 = vrot.slane %v1852_v62, 1 }
 0x19d   :  { %9326 = vmatprep.subr.bf16.mxu0 %v10467_v49  ;;  %9338 = vmatprep.subr.bf16.mxu1 %v10467_v49  ;;  %v1729_v25 = vsel %vm1185_vm10, %v1623_v59, %v1728_v20  ;;  %v1639_v37 = vsel %vm1191_vm12, %v1638_v24, %v1637_v33  ;;  %v10078_v10 = vld [vmem:[#allocation2 + $0x64] ss:$0 sps:$4 sm:$0x11]   ;;  %v1990_v22 = vsel %vm1221_vm2, %v10058_v4, 0  ;;  %v2074_v24 = vunpack.c.l.b16 %v10075_v2 }
 0x19e   :  { %v1855_v30 = vrot.slane %v1847_v17, 5  ;;  %v1949_v31 = vrot.slane %v1847_v17, 6  ;;  %v10079_v19 = vld [vmem:[#allocation2 + $0x84] ss:$0 sps:$4 sm:$0x11]  }
 0x19f   :  { %v10080_v20 = vld [vmem:[#allocation2 + $0xa4] ss:$0 sps:$4 sm:$0x11]  }
 0x1a0   :  { %9327 = vmatpush3.bf16.msra.mxu0 %v1440_v34  ;;  %9339 = vmatpush3.bf16.msra.mxu1 %v1534_v35  ;;  %v1731_v34 = vsel %vm1188_vm11, %v1730_v21, %v1729_v25  ;;  %v10064_v35 = vld [vmem:[#allocation2 + $0xa0] ss:$0 sps:$4 sm:$0x88]   ;;  %v1856_v45 = vsel %vm1173_vm6, %v1855_v30, %v1854_v39  ;;  %v1950_v46 = vsel %vm1173_vm6, %v1949_v31, %v1948_v40  ;;  %v1896_v21 = vsel %vm1221_vm2, %v10057_v61, 0  ;;  %v10071_v61 = vld [vmem:[%s12422_s1 + $0x110] sm:$0xff]  }
 0x1a1   :  { %9344 = vmatprep.subr.bf16.mxu0 %v10467_v49  ;;  %9356 = vmatprep.subr.bf16.mxu1 %v10467_v49  ;;  %v1733_v38 = vsel %vm1191_vm12, %v1732_v26, %v1731_v34  ;;  %v1858_v58 = vsel %vm1176_vm7, %v1857_v43, %v1856_v45  ;;  %v10081_v23 = vld [vmem:[#allocation2 + $0xc4] ss:$0 sps:$4 sm:$0x11]   ;;  %v2076_v25 = vunpack.c.l.b16 %v10077_v3  ;;  %v2176_v34 = vrot.slane %v2074_v24, 1 }
 0x1a2   :  { %v1734_v50 = vpack.c.b16 %v1733_v38, %v1733_v38  ;;  %v10859_v26 = vld [vmem:[#allocation2 + $0xe4] ss:$0 sps:$4 sm:$0x11]   ;;  %v2079_v38 = vunpack.c.l.b16 %v10080_v20  ;;  %v2080_v43 = vunpack.c.l.b16 %v10081_v23 }
 0x1a3   :  { %9329 = vmatmul.mubr.msk.bf16.vlgmr.msra.gmra.mrb[36].mxu0 %vm1217_vm13, %v1412_v53  ;;  %9341 = vmatmul.mubr.msk.bf16.vlgmr.msra.gmra.mrb[36].mxu1 %vm1217_vm13, %v1506_v54  ;;  %v10066_v53 = vld [vmem:[#allocation2 + $0xe0] ss:$0 sps:$4 sm:$0x88]   ;;  %v1851_v54 = vunpack.c.l.b16 %v10064_v35  ;;  %v2084_v33 = vrot.slane %v2076_v25, 6  ;;  %v2178_v44 = vrot.slane %v2076_v25, 7  ;;  %v2081_v45 = vunpack.c.l.b16 %v10859_v26 }
 0x1a4   :  { %9345 = vmatpush3.bf16.msra.mxu0 %v10035_v47  ;;  %9357 = vmatpush3.bf16.msra.mxu1 %v10036_v48  ;;  %v1951_v47 = vrot.slane %v1848_v27, 5  ;;  %v1640_v48 = vpack.c.b16 %v1639_v37, %v1639_v37  ;;  %v1853_v5 = vunpack.c.l.b16 %v10066_v53  ;;  %v2077_v27 = vunpack.c.l.b16 %v10078_v10  ;;  %v10067_v35 = vld [vmem:[%s12422_s1 + $0x100] sm:$0xff]  }
 0x1a5   :  { %9346 = vmatprep.subr.bf16.mxu0 %v10467_v49  ;;  %9358 = vmatprep.subr.bf16.mxu1 %v10467_v49  ;;  %v1863_v6 = vrot.slane %v1851_v54, 1  ;;  %v1957_v8 = vrot.slane %v1851_v54, 2  ;;  %v10068_v36 = vld [vmem:[%s12422_s1 + $0x120] sm:$0xff]   ;;  %v2078_v37 = vunpack.c.l.b16 %v10079_v19  ;;  %v10073_v54 = vld [vmem:[%s12422_s1 + $0x118] sm:$0x1f]   ;;  %v2184_v2 = vrot.slane %v2079_v38, 4 }
 0x1a6   :  { %9352 = vmatprep.mubr.msk.bf16.mxu0 %vm10468_vm3, %v10467_v49  ;;  %9364 = vmatprep.mubr.msk.bf16.mxu1 %vm10468_vm3, %v10467_v49  ;;  %v1952_v59 = vsel %vm1176_vm7, %v1951_v47, %v1950_v46  ;;  %v1866_v17 = vrot.slane %v1853_v5, 7  ;;  %v2086_v40 = vrot.slane %v2077_v27, 5  ;;  %v2180_v47 = vrot.slane %v2077_v27, 6  ;;  %v10093_v4 = vld [vmem:[#allocation2 + $0x44] ss:$0 sps:$4 sm:$0x22]  }
 0x1a7   :  { %v1954_v7 = vsel %vm1179_vm8, %v1953_v55, %v1952_v59  ;;  %v2088_v53 = vrot.slane %v2078_v37, 4  ;;  %v2090_v55 = vrot.slane %v2079_v38, 3  ;;  %v10091_v59 = vld [vmem:[#allocation2 + $0x4] ss:$0 sps:$4 sm:$0x22]   ;;  %v2186_v3 = vrot.slane %v2080_v43, 3 }
 0x1a8   :  { %9347 = vmatpush3.bf16.msra.mxu0 %v10037_v63  ;;  %9359 = vmatpush3.bf16.msra.mxu1 %v10038_v1  ;;  %v1860_v63 = vsel %vm1179_vm8, %v1859_v52, %v1858_v58  ;;  %v1955_v1 = vrot.slane %v1850_v51, 3  ;;  %v10070_v51 = vld [vmem:[%s12422_s1 + $0x128] sm:$0xff]   ;;  %v2182_v58 = vrot.slane %v2078_v37, 5  ;;  %v10924_v23 = vld [vmem:[#allocation2 + $0x4] ss:$0 sps:$4 sm:$0x44]  }
 0x1a9   :  { %9348 = vmatprep.subr.bf16.mxu0 %v10467_v49  ;;  %9360 = vmatprep.subr.bf16.mxu1 %v10467_v49  ;;  %v10097_v25 = vld [vmem:[#allocation2 + $0xc4] ss:$0 sps:$4 sm:$0x22]  }
 0x1aa   :  { %v1956_v14 = vsel %vm1182_vm9, %v1955_v1, %v1954_v7  ;;  %v10098_v26 = vld [vmem:[#allocation2 + $0xe4] ss:$0 sps:$4 sm:$0x22]  }
 0x1ab   :  { %v1958_v18 = vsel %vm1185_vm10, %v1957_v8, %v1956_v14  ;;  %v2302_v14 = vunpack.c.l.b16 %v10091_v59  ;;  %v10110_v59 = vld [vmem:[#allocation2 + $0x64] ss:$0 sps:$4 sm:$0x44]  }
 0x1ac   :  { %9349 = vmatpush3.bf16.msra.mxu0 %v10039_v12  ;;  %9361 = vmatpush3.bf16.msra.mxu1 %v10040_v13  ;;  %v2075_v12 = vunpack.c.l.b16 %v10827_v60  ;;  %v1862_v13 = vsel %vm1182_vm9, %v1861_v0, %v1860_v63  ;;  %v1960_v30 = vsel %vm1188_vm11, %v1959_v15, %v1958_v18  ;;  %v10092_v60 = vld [vmem:[#allocation2 + $0x24] ss:$0 sps:$4 sm:$0x22]   ;;  %v10074_v63 = vld [vmem:[%s12422_s1 + $0x138] sm:$0x1f]   ;;  %v2094_v0 = vrot.slane %v2081_v45, 1 }
 0x1ad   :  { %9350 = vmatprep.subr.bf16.mxu0 %v10467_v49  ;;  %9362 = vmatprep.subr.bf16.mxu1 %v10467_v49  ;;  %v1864_v16 = vsel %vm1185_vm10, %v1863_v6, %v1862_v13  ;;  %v10095_v13 = vld [vmem:[#allocation2 + $0x84] ss:$0 sps:$4 sm:$0x22]   ;;  %v2218_v15 = vsel %vm1221_vm2, %v10074_v63, 0  ;;  %v2304_v18 = vunpack.c.l.b16 %v10093_v4 }
 0x1ae   :  { %v1865_v29 = vsel %vm1188_vm11, %v1852_v62, %v1864_v16  ;;  %v2177_v46 = vsel %vm1173_vm6, %v2075_v12, %v2176_v34  ;;  %v10072_v62 = vld [vmem:[%s12422_s1 + $0x130] sm:$0xff]   ;;  %v2404_v34 = vrot.slane %v2302_v14, 3 }
 0x1af   :  { %v1867_v31 = vsel %vm1191_vm12, %v1866_v17, %v1865_v29  ;;  %v10096_v17 = vld [vmem:[#allocation2 + $0xa4] ss:$0 sps:$4 sm:$0x22]   ;;  %v2310_v29 = vrot.slane %v2302_v14, 2  ;;  %v2407_v38 = vrot.slane %v2304_v18, 1 }
 0x1b0   :  { %9351 = vmatpush3.bf16.msra.mxu0 %v1668_v28  ;;  %9363 = vmatpush3.bf16.msra.mxu1 %v1762_v32  ;;  %v2082_v28 = vrot.slane %v2075_v12, 7  ;;  %v1961_v32 = vsel %vm1191_vm12, %v1853_v5, %v1960_v30  ;;  %v10908_v5 = vld [vmem:[#allocation2 + $0x64] ss:$0 sps:$4 sm:$0x22]   ;;  %v2124_v12 = vsel %vm1221_vm2, %v10073_v54, 0  ;;  %v10087_v54 = vld [vmem:[%s12422_s1 + $0x150] sm:$0xff]  }
 0x1b1   :  { %9368 = vmatprep.subr.bf16.mxu0 %v10467_v49  ;;  %9380 = vmatprep.subr.bf16.mxu1 %v10467_v49 }
 0x1b2   :  { %v2083_v39 = vsel %vm1173_vm6, %v2082_v28, %v2074_v24  ;;  %v10083_v28 = vld [vmem:[%s12422_s1 + $0x140] sm:$0xff]  }
 0x1b3   :  { %9353 = vmatmul.mubr.msk.bf16.vlgmr.msra.gmra.mrb[40].mxu0 %vm1217_vm13, %v1640_v48  ;;  %9365 = vmatmul.mubr.msk.bf16.vlgmr.msra.gmra.mrb[40].mxu1 %vm1217_vm13, %v1734_v50  ;;  %v2085_v48 = vsel %vm1176_vm7, %v2084_v33, %v2083_v39  ;;  %v10069_v50 = vld [vmem:[%s12422_s1 + $0x108] sm:$0xff]   ;;  %v2307_v33 = vunpack.c.l.b16 %v10096_v17 }
 0x1b4   :  { %9369 = vmatpush3.bf16.msra.mxu0 %v10051_v41  ;;  %9381 = vmatpush3.bf16.msra.mxu1 %v10052_v42  ;;  %v1868_v41 = vpack.c.b16 %v1867_v31, %v1867_v31  ;;  %v1962_v42 = vpack.c.b16 %v1961_v32, %v1961_v32  ;;  %v2087_v52 = vsel %vm1179_vm8, %v2086_v40, %v2085_v48  ;;  %v10084_v31 = vld [vmem:[%s12422_s1 + $0x160] sm:$0xff]   ;;  %v2306_v32 = vunpack.c.l.b16 %v10095_v13 }
 0x1b5   :  { %9370 = vmatprep.subr.bf16.mxu0 %v10467_v49  ;;  %9382 = vmatprep.subr.bf16.mxu1 %v10467_v49  ;;  %v2089_v6 = vsel %vm1182_vm9, %v2088_v53, %v2087_v52  ;;  %v2530_v40 = vunpack.c.l.b16 %v10924_v23  ;;  %v10108_v48 = vld [vmem:[#allocation2 + $0x24] ss:$0 sps:$4 sm:$0x44]   ;;  %v2533_v13 = vunpack.c.l.b16 %v10110_v59 }
 0x1b6   :  { %9376 = vmatprep.mubr.msk.bf16.mxu0 %vm10468_vm3, %v10467_v49  ;;  %9388 = vmatprep.mubr.msk.bf16.mxu1 %vm10468_vm3, %v10467_v49  ;;  %v2091_v7 = vsel %vm1185_vm10, %v2090_v55, %v2089_v6  ;;  %v2410_v53 = vrot.slane %v2306_v32, 7  ;;  %v10088_v55 = vld [vmem:[%s12422_s1 + $0x170] sm:$0xff]  }
 0x1b8   :  { %9371 = vmatpush3.bf16.msra.mxu0 %v10053_v56  ;;  %9383 = vmatpush3.bf16.msra.mxu1 %v10054_v57  ;;  %v2092_v56 = vrot.slane %v2080_v43, 2  ;;  %v2179_v57 = vsel %vm1176_vm7, %v2178_v44, %v2177_v46  ;;  %v10089_v43 = vld [vmem:[%s12422_s1 + $0x158] sm:$0x1f]   ;;  %v2308_v44 = vunpack.c.l.b16 %v10097_v25 }
 0x1b9   :  { %9372 = vmatprep.subr.bf16.mxu0 %v10467_v49  ;;  %9384 = vmatprep.subr.bf16.mxu1 %v10467_v49  ;;  %v2181_v1 = vsel %vm1179_vm8, %v2180_v47, %v2179_v57  ;;  %v2316_v47 = vrot.slane %v2306_v32, 6  ;;  %v2412_v57 = vrot.slane %v2307_v33, 6  ;;  %v2637_v32 = vrot.slane %v2533_v13, 2 }
 0x1ba   :  { %v2183_v8 = vsel %vm1182_vm9, %v2182_v58, %v2181_v1  ;;  %v2093_v16 = vsel %vm1188_vm11, %v2092_v56, %v2091_v7  ;;  %v10109_v58 = vld [vmem:[#allocation2 + $0x44] ss:$0 sps:$4 sm:$0x44]   ;;  %v2531_v1 = vunpack.c.l.b16 %v10108_v48 }
 0x1bb   :  { %v2185_v10 = vsel %vm1185_vm10, %v2184_v2, %v2183_v8  ;;  %v2095_v19 = vsel %vm1191_vm12, %v2094_v0, %v2093_v16  ;;  %v2320_v0 = vrot.slane %v2308_v44, 4  ;;  %v10975_v8 = vld [vmem:[#allocation2 + $0x84] ss:$0 sps:$4 sm:$0x44]  }
 0x1bc   :  { %9373 = vmatpush3.bf16.msra.mxu0 %v10055_v9  ;;  %9385 = vmatpush3.bf16.msra.mxu1 %v10056_v11  ;;  %v2303_v9 = vunpack.c.l.b16 %v10092_v60  ;;  %v2188_v11 = vrot.slane %v2081_v45, 2  ;;  %v2187_v20 = vsel %vm1188_vm11, %v2186_v3, %v2185_v10  ;;  %v2096_v30 = vpack.c.b16 %v2095_v19, %v2095_v19  ;;  %v10978_v10 = vld [vmem:[#allocation2 + $0xa4] ss:$0 sps:$4 sm:$0x44]  }
 0x1bd   :  { %9374 = vmatprep.subr.bf16.mxu0 %v10467_v49  ;;  %9386 = vmatprep.subr.bf16.mxu1 %v10467_v49  ;;  %v2309_v45 = vunpack.c.l.b16 %v10098_v26  ;;  %v2538_v60 = vrot.slane %v2530_v40, 4  ;;  %v2539_v14 = vrot.slane %v2531_v1, 3  ;;  %v10113_v19 = vld [vmem:[#allocation2 + $0xc4] ss:$0 sps:$4 sm:$0x44]   ;;  %v2534_v23 = vunpack.c.l.b16 %v10975_v8 }
 0x1be   :  { %v2189_v24 = vsel %vm1191_vm12, %v2188_v11, %v2187_v20  ;;  %v2405_v27 = vrot.slane %v2303_v9, 2  ;;  %v10114_v20 = vld [vmem:[#allocation2 + $0xe4] ss:$0 sps:$4 sm:$0x44]   ;;  %v2535_v26 = vunpack.c.l.b16 %v10978_v10 }
 0x1bf   :  { %v2322_v3 = vrot.slane %v2309_v45, 3  ;;  %v2416_v7 = vrot.slane %v2309_v45, 4  ;;  %v10124_v45 = vld [vmem:[#allocation2 + $0x24] ss:$0 sps:$4 sm:$0x88]  }
 0x1c0   :  { %9375 = vmatpush3.bf16.msra.mxu0 %v1896_v21  ;;  %9387 = vmatpush3.bf16.msra.mxu1 %v1990_v22  ;;  %v2305_v21 = vunpack.c.l.b16 %v10908_v5  ;;  %v2311_v22 = vrot.slane %v2303_v9, 1  ;;  %v2406_v39 = vsel %vm1173_vm6, %v2405_v27, %v2404_v34  ;;  %v2414_v5 = vrot.slane %v2308_v44, 5  ;;  %v10101_v34 = vld [vmem:[%s12422_s1 + $0x188] sm:$0xff]   ;;  %v10123_v44 = vld [vmem:[#allocation2 + $0x4] ss:$0 sps:$4 sm:$0x88]  }
 0x1c1   :  { %9392 = vmatprep.subr.bf16.mxu0 %v10467_v49  ;;  %9404 = vmatprep.subr.bf16.mxu1 %v10467_v49  ;;  %v2408_v52 = vsel %vm1176_vm7, %v2407_v38, %v2406_v39  ;;  %v10105_v39 = vld [vmem:[%s12422_s1 + $0x198] sm:$0x1f]   ;;  %v2759_v59 = vunpack.c.l.b16 %v10124_v45  ;;  %v10142_v45 = vld [vmem:[#allocation2 + $0x68] ss:$0 sps:$4 sm:$0x11]  }
 0x1c2   :  { %v2314_v37 = vrot.slane %v2305_v21, 7  ;;  %v2409_v56 = vsel %vm1179_vm8, %v2305_v21, %v2408_v52  ;;  %v2633_v21 = vrot.slane %v2531_v1, 4  ;;  %v10126_v52 = vld [vmem:[#allocation2 + $0x64] ss:$0 sps:$4 sm:$0x88]   ;;  %v2758_v1 = vunpack.c.l.b16 %v10123_v44 }
 0x1c3   :  { %9377 = vmatmul.mubr.msk.bf16.vlgmr.msra.gmra.mrb[44].mxu0 %vm1217_vm13, %v1868_v41  ;;  %9389 = vmatmul.mubr.msk.bf16.vlgmr.msra.gmra.mrb[44].mxu1 %vm1217_vm13, %v1962_v42  ;;  %v10085_v41 = vld [vmem:[%s12422_s1 + $0x148] sm:$0xff]   ;;  %v2411_v4 = vsel %vm1182_vm9, %v2410_v53, %v2409_v56  ;;  %v2767_v8 = vrot.slane %v2759_v59, 5 }
 0x1c4   :  { %9393 = vmatpush3.bf16.msra.mxu0 %v10067_v35  ;;  %9405 = vmatpush3.bf16.msra.mxu1 %v10068_v36  ;;  %v2190_v35 = vpack.c.b16 %v2189_v24, %v2189_v24  ;;  %v2312_v36 = vsel %vm1173_vm6, %v2311_v22, %v2310_v29  ;;  %v10086_v42 = vld [vmem:[%s12422_s1 + $0x168] sm:$0xff]   ;;  %v2413_v6 = vsel %vm1185_vm10, %v2412_v57, %v2411_v4  ;;  %v10100_v22 = vld [vmem:[%s12422_s1 + $0x1a0] sm:$0xff]   ;;  %v2632_v24 = vrot.slane %v2530_v40, 5 }
 0x1c5   :  { %9394 = vmatprep.subr.bf16.mxu0 %v10467_v49  ;;  %9406 = vmatprep.subr.bf16.mxu1 %v10467_v49  ;;  %v2313_v46 = vsel %vm1176_vm7, %v2304_v18, %v2312_v36  ;;  %v2415_v16 = vsel %vm1188_vm11, %v2414_v5, %v2413_v6  ;;  %v10099_v18 = vld [vmem:[%s12422_s1 + $0x180] sm:$0xff]   ;;  %v2536_v36 = vunpack.c.l.b16 %v10113_v19  ;;  %v2761_v5 = vunpack.c.l.b16 %v10126_v52  ;;  %v10141_v44 = vld [vmem:[#allocation2 + $0x48] ss:$0 sps:$4 sm:$0x11]  }
 0x1c6   :  { %9400 = vmatprep.mubr.msk.bf16.mxu0 %vm10468_vm3, %v10467_v49  ;;  %9412 = vmatprep.mubr.msk.bf16.mxu1 %vm10468_vm3, %v10467_v49  ;;  %v2417_v17 = vsel %vm1191_vm12, %v2416_v7, %v2415_v16  ;;  %v2766_v16 = vrot.slane %v2758_v1, 6 }
 0x1c7   :  { %v2418_v29 = vpack.c.b16 %v2417_v17, %v2417_v17 }
 0x1c8   :  { %9395 = vmatpush3.bf16.msra.mxu0 %v10069_v50  ;;  %9407 = vmatpush3.bf16.msra.mxu1 %v10070_v51  ;;  %v2315_v50 = vsel %vm1179_vm8, %v2314_v37, %v2313_v46  ;;  %v2318_v51 = vrot.slane %v2307_v33, 5  ;;  %v2634_v33 = vsel %vm1173_vm6, %v2633_v21, %v2632_v24  ;;  %v2537_v37 = vunpack.c.l.b16 %v10114_v20  ;;  %v10103_v46 = vld [vmem:[%s12422_s1 + $0x190] sm:$0xff]  }
 0x1c9   :  { %9396 = vmatprep.subr.bf16.mxu0 %v10467_v49  ;;  %9408 = vmatprep.subr.bf16.mxu1 %v10467_v49  ;;  %v2317_v63 = vsel %vm1182_vm9, %v2316_v47, %v2315_v50  ;;  %v10106_v47 = vld [vmem:[%s12422_s1 + $0x1b8] sm:$0x1f]   ;;  %v10125_v50 = vld [vmem:[#allocation2 + $0x44] ss:$0 sps:$4 sm:$0x88]   ;;  %v2860_v20 = vrot.slane %v2758_v1, 7 }
 0x1ca   :  { %v2319_v2 = vsel %vm1185_vm10, %v2318_v51, %v2317_v63  ;;  %v10104_v51 = vld [vmem:[%s12422_s1 + $0x1b0] sm:$0xff]   ;;  %v2580_v63 = vsel %vm1221_vm2, %v10105_v39, 0  ;;  %v2760_v4 = vunpack.c.l.b16 %v10125_v50 }
 0x1cb   :  { %v2321_v11 = vsel %vm1188_vm11, %v2320_v0, %v2319_v2  ;;  %v10128_v0 = vld [vmem:[#allocation2 + $0xa4] ss:$0 sps:$4 sm:$0x88]   ;;  %v2674_v2 = vsel %vm1221_vm2, %v10106_v47, 0  ;;  %v10119_v39 = vld [vmem:[%s12422_s1 + $0x1d0] sm:$0xff]  }
 0x1cc   :  { %9397 = vmatpush3.bf16.msra.mxu0 %v10071_v61  ;;  %9409 = vmatpush3.bf16.msra.mxu1 %v10072_v62  ;;  %v10090_v61 = vld [vmem:[%s12422_s1 + $0x178] sm:$0x1f]   ;;  %v2352_v62 = vsel %vm1221_vm2, %v10089_v43, 0  ;;  %v2639_v43 = vrot.slane %v2534_v23, 1  ;;  %v2769_v19 = vrot.slane %v2760_v4, 4  ;;  %v2863_v24 = vrot.slane %v2760_v4, 5 }
 0x1cd   :  { %9398 = vmatprep.subr.bf16.mxu0 %v10467_v49  ;;  %9410 = vmatprep.subr.bf16.mxu1 %v10467_v49  ;;  %v2446_v9 = vsel %vm1221_vm2, %v10090_v61, 0  ;;  %v2644_v61 = vrot.slane %v2537_v37, 6  ;;  %v10145_v4 = vld [vmem:[#allocation2 + $0xc8] ss:$0 sps:$4 sm:$0x11]  }
 0x1d0   :  { %9399 = vmatpush3.bf16.msra.mxu0 %v2124_v12  ;;  %9411 = vmatpush3.bf16.msra.mxu1 %v2218_v15  ;;  %v2532_v12 = vunpack.c.l.b16 %v10109_v58  ;;  %v2323_v15 = vsel %vm1191_vm12, %v2322_v3, %v2321_v11  ;;  %v2642_v58 = vrot.slane %v2536_v36, 7  ;;  %v10115_v11 = vld [vmem:[%s12422_s1 + $0x1c0] sm:$0xff]  }
 0x1d1   :  { %9416 = vmatprep.subr.bf16.mxu0 %v10467_v49  ;;  %9428 = vmatprep.subr.bf16.mxu1 %v10467_v49  ;;  %v2324_v25 = vpack.c.b16 %v2323_v15, %v2323_v15 }
 0x1d2   :  { %v2541_v27 = vrot.slane %v2532_v12, 2 }
 0x1d3   :  { %9401 = vmatmul.mubr.msk.bf16.vlgmr.msra.gmra.mrb[48].mxu0 %vm1217_vm13, %v2096_v30  ;;  %9413 = vmatmul.mubr.msk.bf16.vlgmr.msra.gmra.mrb[48].mxu1 %vm1217_vm13, %v2190_v35  ;;  %v2540_v30 = vsel %vm1173_vm6, %v2539_v14, %v2538_v60  ;;  %v10102_v35 = vld [vmem:[%s12422_s1 + $0x1a8] sm:$0xff]   ;;  %v10116_v14 = vld [vmem:[%s12422_s1 + $0x1e0] sm:$0xff]  }
 0x1d4   :  { %9417 = vmatpush3.bf16.msra.mxu0 %v10083_v28  ;;  %9429 = vmatpush3.bf16.msra.mxu1 %v10084_v31  ;;  %v2543_v28 = vrot.slane %v2533_v13, 1  ;;  %v2635_v31 = vrot.slane %v2532_v12, 3  ;;  %v2542_v38 = vsel %vm1176_vm7, %v2541_v27, %v2540_v30  ;;  %v11045_v12 = vld [vmem:[#allocation2 + $0xc4] ss:$0 sps:$4 sm:$0x88]   ;;  %v10117_v27 = vld [vmem:[%s12422_s1 + $0x1c8] sm:$0xff]  }
 0x1d5   :  { %9418 = vmatprep.subr.bf16.mxu0 %v10467_v49  ;;  %9430 = vmatprep.subr.bf16.mxu1 %v10467_v49  ;;  %v11047_v13 = vld [vmem:[#allocation2 + $0xe4] ss:$0 sps:$4 sm:$0x88]  }
 0x1d6   :  { %9424 = vmatprep.mubr.msk.bf16.mxu0 %vm10468_vm3, %v10467_v49  ;;  %9436 = vmatprep.mubr.msk.bf16.mxu1 %vm10468_vm3, %v10467_v49  ;;  %v2544_v40 = vsel %vm1179_vm8, %v2543_v28, %v2542_v38  ;;  %v10118_v28 = vld [vmem:[%s12422_s1 + $0x1e8] sm:$0xff]   ;;  %v2765_v30 = vunpack.c.l.b16 %v11047_v13 }
 0x1d7   :  { %v2545_v53 = vsel %vm1182_vm9, %v2534_v23, %v2544_v40  ;;  %v2771_v23 = vrot.slane %v2761_v5, 3  ;;  %v10140_v38 = vld [vmem:[#allocation2 + $0x28] ss:$0 sps:$4 sm:$0x11]   ;;  %v10121_v40 = vld [vmem:[%s12422_s1 + $0x1d8] sm:$0x1f]  }
 0x1d8   :  { %9419 = vmatpush3.bf16.msra.mxu0 %v10085_v41  ;;  %9431 = vmatpush3.bf16.msra.mxu1 %v10086_v42  ;;  %v2546_v41 = vrot.slane %v2535_v26, 7  ;;  %v2636_v42 = vsel %vm1176_vm7, %v2635_v31, %v2634_v33 }
 0x1d9   :  { %9420 = vmatprep.subr.bf16.mxu0 %v10467_v49  ;;  %9432 = vmatprep.subr.bf16.mxu1 %v10467_v49  ;;  %v2638_v48 = vsel %vm1179_vm8, %v2637_v32, %v2636_v42 }
 0x1da   :  { %v2547_v56 = vsel %vm1185_vm10, %v2546_v41, %v2545_v53  ;;  %v2640_v57 = vsel %vm1182_vm9, %v2639_v43, %v2638_v48  ;;  %v10122_v41 = vld [vmem:[%s12422_s1 + $0x1f8] sm:$0x1f]   ;;  %v2778_v48 = vrot.slane %v2765_v30, 7  ;;  %v2987_v53 = vunpack.c.l.b16 %v10140_v38 }
 0x1db   :  { %v2641_v60 = vsel %vm1185_vm10, %v2535_v26, %v2640_v57  ;;  %v2865_v26 = vrot.slane %v2761_v5, 4  ;;  %v10146_v5 = vld [vmem:[#allocation2 + $0xe8] ss:$0 sps:$4 sm:$0x11]  }
 0x1dc   :  { %9421 = vmatpush3.bf16.msra.mxu0 %v10087_v54  ;;  %9433 = vmatpush3.bf16.msra.mxu1 %v10088_v55  ;;  %v2548_v54 = vrot.slane %v2536_v36, 6  ;;  %v2550_v55 = vrot.slane %v2537_v37, 5  ;;  %v2643_v7 = vsel %vm1188_vm11, %v2642_v58, %v2641_v60  ;;  %v10139_v37 = vld [vmem:[#allocation2 + $0x8] ss:$0 sps:$4 sm:$0x11]   ;;  %v2808_v58 = vsel %vm1221_vm2, %v10121_v40, 0 }
 0x1dd   :  { %9422 = vmatprep.subr.bf16.mxu0 %v10467_v49  ;;  %9434 = vmatprep.subr.bf16.mxu1 %v10467_v49  ;;  %v2645_v10 = vsel %vm1191_vm12, %v2644_v61, %v2643_v7  ;;  %v2986_v57 = vunpack.c.l.b16 %v10139_v37  ;;  %v2988_v61 = vunpack.c.l.b16 %v10141_v44  ;;  %v2994_v1 = vrot.slane %v2987_v53, 7  ;;  %v11142_v37 = vld [vmem:[#allocation2 + $0x68] ss:$0 sps:$4 sm:$0x22]  }
 0x1de   :  { %v2549_v3 = vsel %vm1188_vm11, %v2548_v54, %v2547_v56  ;;  %v2646_v21 = vpack.c.b16 %v2645_v10, %v2645_v10  ;;  %v10144_v56 = vld [vmem:[#allocation2 + $0xa8] ss:$0 sps:$4 sm:$0x11]  }
 0x1df   :  { %v2551_v6 = vsel %vm1191_vm12, %v2550_v55, %v2549_v3  ;;  %v10143_v55 = vld [vmem:[#allocation2 + $0x88] ss:$0 sps:$4 sm:$0x11]   ;;  %v10131_v3 = vld [vmem:[%s12422_s1 + $0x200] sm:$0xff]   ;;  %v2996_v10 = vrot.slane %v2988_v61, 6  ;;  %v2995_v13 = vsel %vm1173_vm6, %v2994_v1, %v2986_v57 }
 0x1e0   :  { %9423 = vmatpush3.bf16.msra.mxu0 %v2352_v62  ;;  %9435 = vmatpush3.bf16.msra.mxu1 %v2446_v9  ;;  %v10127_v62 = vld [vmem:[#allocation2 + $0x84] ss:$0 sps:$4 sm:$0x88]   ;;  %v2861_v9 = vrot.slane %v2759_v59, 6  ;;  %v2552_v17 = vpack.c.b16 %v2551_v6, %v2551_v6  ;;  %v2902_v59 = vsel %vm1221_vm2, %v10122_v41, 0  ;;  %v2990_v7 = vunpack.c.l.b16 %v10143_v55 }
 0x1e1   :  { %9440 = vmatprep.subr.bf16.mxu0 %v10467_v49  ;;  %9452 = vmatprep.subr.bf16.mxu1 %v10467_v49  ;;  %v2762_v15 = vunpack.c.l.b16 %v10127_v62  ;;  %v10132_v6 = vld [vmem:[%s12422_s1 + $0x220] sm:$0xff]  }
 0x1e3   :  { %9425 = vmatmul.mubr.msk.bf16.vlgmr.msra.gmra.mrb[52].mxu0 %vm1217_vm13, %v2324_v25  ;;  %9437 = vmatmul.mubr.msk.bf16.vlgmr.msra.gmra.mrb[52].mxu1 %vm1217_vm13, %v2418_v29  ;;  %v2862_v25 = vsel %vm1173_vm6, %v2861_v9, %v2860_v20  ;;  %v2764_v29 = vunpack.c.l.b16 %v11045_v12  ;;  %v2773_v32 = vrot.slane %v2762_v15, 2  ;;  %v2867_v36 = vrot.slane %v2762_v15, 3 }
 0x1e4   :  { %9441 = vmatpush3.bf16.msra.mxu0 %v10099_v18  ;;  %9453 = vmatpush3.bf16.msra.mxu1 %v10100_v22  ;;  %v2763_v18 = vunpack.c.l.b16 %v10128_v0  ;;  %v2768_v22 = vsel %vm1173_vm6, %v2767_v8, %v2766_v16  ;;  %v2989_v0 = vunpack.c.l.b16 %v10142_v45  ;;  %v2991_v9 = vunpack.c.l.b16 %v10144_v56 }
 0x1e5   :  { %9442 = vmatprep.subr.bf16.mxu0 %v10467_v49  ;;  %9454 = vmatprep.subr.bf16.mxu1 %v10467_v49  ;;  %v2770_v31 = vsel %vm1176_vm7, %v2769_v19, %v2768_v22  ;;  %v2871_v52 = vrot.slane %v2764_v29, 1  ;;  %v3090_v15 = vrot.slane %v2988_v61, 7  ;;  %v10134_v19 = vld [vmem:[%s12422_s1 + $0x228] sm:$0xff]   ;;  %v2992_v20 = vunpack.c.l.b16 %v10145_v4 }
 0x1e6   :  { %9448 = vmatprep.mubr.msk.bf16.mxu0 %vm10468_vm3, %v10467_v49  ;;  %9460 = vmatprep.mubr.msk.bf16.mxu1 %vm10468_vm3, %v10467_v49  ;;  %v2772_v33 = vsel %vm1179_vm8, %v2771_v23, %v2770_v31  ;;  %v2869_v43 = vrot.slane %v2763_v18, 2  ;;  %v2997_v22 = vsel %vm1176_vm7, %v2996_v10, %v2995_v13  ;;  %v3000_v23 = vrot.slane %v2990_v7, 4  ;;  %v10136_v31 = vld [vmem:[%s12422_s1 + $0x230] sm:$0xff]   ;;  %v10149_v13 = vld [vmem:[%s12422_s1 + $0x248] sm:$0xff]  }
 0x1e7   :  { %v2774_v47 = vsel %vm1182_vm9, %v2773_v32, %v2772_v33  ;;  %v10137_v32 = vld [vmem:[%s12422_s1 + $0x218] sm:$0x1f]   ;;  %v3217_v56 = vunpack.c.l.b16 %v11142_v37 }
 0x1e8   :  { %9443 = vmatpush3.bf16.msra.mxu0 %v10101_v34  ;;  %9455 = vmatpush3.bf16.msra.mxu1 %v10102_v35  ;;  %v2775_v34 = vrot.slane %v2763_v18, 1  ;;  %v2864_v35 = vsel %vm1176_vm7, %v2863_v24, %v2862_v25  ;;  %v10133_v18 = vld [vmem:[%s12422_s1 + $0x208] sm:$0xff]   ;;  %v3002_v25 = vrot.slane %v2991_v9, 3  ;;  %v10138_v33 = vld [vmem:[%s12422_s1 + $0x238] sm:$0x1f]  }
 0x1e9   :  { %9444 = vmatprep.subr.bf16.mxu0 %v10467_v49  ;;  %9456 = vmatprep.subr.bf16.mxu1 %v10467_v49  ;;  %v2866_v42 = vsel %vm1179_vm8, %v2865_v26, %v2864_v35  ;;  %v3096_v35 = vrot.slane %v2991_v9, 4  ;;  %v3226_v9 = vrot.slane %v3217_v56, 7 }
 0x1ea   :  { %v2776_v50 = vsel %vm1185_vm10, %v2775_v34, %v2774_v47  ;;  %v10159_v47 = vld [vmem:[#allocation2 + $0x88] ss:$0 sps:$4 sm:$0x22]  }
 0x1eb   :  { %v2777_v60 = vsel %vm1188_vm11, %v2764_v29, %v2776_v50  ;;  %v10156_v29 = vld [vmem:[#allocation2 + $0x28] ss:$0 sps:$4 sm:$0x22]   ;;  %v3218_v4 = vunpack.c.l.b16 %v10159_v47 }
 0x1ec   :  { %9445 = vmatpush3.bf16.msra.mxu0 %v10103_v46  ;;  %9457 = vmatpush3.bf16.msra.mxu1 %v10104_v51  ;;  %v10120_v46 = vld [vmem:[%s12422_s1 + $0x1f0] sm:$0xff]   ;;  %v2868_v51 = vsel %vm1182_vm9, %v2867_v36, %v2866_v42  ;;  %v2779_v62 = vsel %vm1191_vm12, %v2778_v48, %v2777_v60  ;;  %v10157_v36 = vld [vmem:[#allocation2 + $0x48] ss:$0 sps:$4 sm:$0x22]   ;;  %v3215_v44 = vunpack.c.l.b16 %v10156_v29  ;;  %v3036_v48 = vsel %vm1221_vm2, %v10137_v32, 0 }
 0x1ed   :  { %9446 = vmatprep.subr.bf16.mxu0 %v10467_v49  ;;  %9458 = vmatprep.subr.bf16.mxu1 %v10467_v49  ;;  %v2870_v54 = vsel %vm1185_vm10, %v2869_v43, %v2868_v51  ;;  %v2780_v8 = vpack.c.b16 %v2779_v62, %v2779_v62  ;;  %v3098_v43 = vrot.slane %v2992_v20, 3  ;;  %v10160_v50 = vld [vmem:[#allocation2 + $0xa8] ss:$0 sps:$4 sm:$0x22]   ;;  %v3216_v55 = vunpack.c.l.b16 %v10157_v36 }
 0x1ee   :  { %v3223_v60 = vrot.slane %v3215_v44, 1  ;;  %v3317_v61 = vrot.slane %v3215_v44, 2  ;;  %v10171_v29 = vld [vmem:[#allocation2 + $0x8] ss:$0 sps:$4 sm:$0x44]  }
 0x1ef   :  { %v3442_v44 = vunpack.c.l.b16 %v10171_v29 }
 0x1f0   :  { %9447 = vmatpush3.bf16.msra.mxu0 %v2580_v63  ;;  %9459 = vmatpush3.bf16.msra.mxu1 %v2674_v2  ;;  %v2872_v63 = vsel %vm1188_vm11, %v2871_v52, %v2870_v54  ;;  %v3130_v52 = vsel %vm1221_vm2, %v10138_v33, 0  ;;  %v10161_v54 = vld [vmem:[#allocation2 + $0xc8] ss:$0 sps:$4 sm:$0x22]  }
 0x1f1   :  { %9464 = vmatprep.subr.bf16.mxu0 %v10467_v49  ;;  %9476 = vmatprep.subr.bf16.mxu1 %v10467_v49  ;;  %v2873_v2 = vsel %vm1191_vm12, %v2765_v30, %v2872_v63  ;;  %v10135_v30 = vld [vmem:[%s12422_s1 + $0x210] sm:$0xff]   ;;  %v10147_v63 = vld [vmem:[%s12422_s1 + $0x240] sm:$0xff]  }
 0x1f2   :  { %v2874_v12 = vpack.c.b16 %v2873_v2, %v2873_v2 }
 0x1f3   :  { %9449 = vmatmul.mubr.msk.bf16.vlgmr.msra.gmra.mrb[56].mxu0 %vm1217_vm13, %v2552_v17  ;;  %9461 = vmatmul.mubr.msk.bf16.vlgmr.msra.gmra.mrb[56].mxu1 %vm1217_vm13, %v2646_v21  ;;  %v3092_v17 = vrot.slane %v2989_v0, 6  ;;  %v2993_v21 = vunpack.c.l.b16 %v10146_v5  ;;  %v3219_v5 = vunpack.c.l.b16 %v10160_v50 }
 0x1f4   :  { %9465 = vmatpush3.bf16.msra.mxu0 %v10115_v11  ;;  %9477 = vmatpush3.bf16.msra.mxu1 %v10116_v14  ;;  %v3088_v11 = vrot.slane %v2986_v57, 1  ;;  %v2998_v14 = vrot.slane %v2989_v0, 5 }
 0x1f5   :  { %9466 = vmatprep.subr.bf16.mxu0 %v10467_v49  ;;  %9478 = vmatprep.subr.bf16.mxu1 %v10467_v49  ;;  %v3006_v40 = vrot.slane %v2993_v21, 1 }
 0x1f6   :  { %9472 = vmatprep.mubr.msk.bf16.mxu0 %vm10468_vm3, %v10467_v49  ;;  %9484 = vmatprep.mubr.msk.bf16.mxu1 %vm10468_vm3, %v10467_v49  ;;  %v3089_v16 = vsel %vm1173_vm6, %v2987_v53, %v3088_v11  ;;  %v2999_v24 = vsel %vm1179_vm8, %v2998_v14, %v2997_v22  ;;  %v3220_v11 = vunpack.c.l.b16 %v10161_v54  ;;  %v10150_v14 = vld [vmem:[%s12422_s1 + $0x268] sm:$0xff]   ;;  %v10163_v54 = vld [vmem:[%s12422_s1 + $0x280] sm:$0xff]  }
 0x1f7   :  { %v3091_v26 = vsel %vm1176_vm7, %v3090_v15, %v3089_v16  ;;  %v3001_v38 = vsel %vm1182_vm9, %v3000_v23, %v2999_v24  ;;  %v10153_v15 = vld [vmem:[%s12422_s1 + $0x258] sm:$0x1f]   ;;  %v3324_v23 = vrot.slane %v3219_v5, 6  ;;  %v10172_v24 = vld [vmem:[#allocation2 + $0x28] ss:$0 sps:$4 sm:$0x44]  }
 0x1f8   :  { %9467 = vmatpush3.bf16.msra.mxu0 %v10117_v27  ;;  %9479 = vmatpush3.bf16.msra.mxu1 %v10118_v28  ;;  %v3094_v27 = vrot.slane %v2990_v7, 5  ;;  %v10155_v28 = vld [vmem:[#allocation2 + $0x8] ss:$0 sps:$4 sm:$0x22]   ;;  %v3093_v34 = vsel %vm1179_vm8, %v3092_v17, %v3091_v26  ;;  %v3003_v41 = vsel %vm1185_vm10, %v3002_v25, %v3001_v38  ;;  %v3228_v17 = vrot.slane %v3218_v4, 6  ;;  %v10151_v25 = vld [vmem:[%s12422_s1 + $0x250] sm:$0xff]  }
 0x1f9   :  { %9468 = vmatprep.subr.bf16.mxu0 %v10467_v49  ;;  %9480 = vmatprep.subr.bf16.mxu1 %v10467_v49  ;;  %v3214_v51 = vunpack.c.l.b16 %v10155_v28  ;;  %v10152_v26 = vld [vmem:[%s12422_s1 + $0x270] sm:$0xff]   ;;  %v3232_v28 = vrot.slane %v3220_v11, 4 }
 0x1fa   :  { %v3095_v42 = vsel %vm1182_vm9, %v3094_v27, %v3093_v34  ;;  %v10154_v27 = vld [vmem:[%s12422_s1 + $0x278] sm:$0x1f]  }
 0x1fb   :  { %v3097_v45 = vsel %vm1185_vm10, %v3096_v35, %v3095_v42  ;;  %v3222_v0 = vrot.slane %v3214_v51, 2  ;;  %v3316_v1 = vrot.slane %v3214_v51, 3  ;;  %v3326_v35 = vrot.slane %v3220_v11, 5 }
 0x1fc   :  { %9469 = vmatpush3.bf16.msra.mxu0 %v10119_v39  ;;  %9481 = vmatpush3.bf16.msra.mxu1 %v10120_v46  ;;  %v3004_v39 = vrot.slane %v2992_v20, 2  ;;  %v3100_v46 = vrot.slane %v2993_v21, 2  ;;  %v3230_v21 = vrot.slane %v3219_v5, 5  ;;  %v3358_v42 = vsel %vm1221_vm2, %v10154_v27, 0 }
 0x1fd   :  { %9470 = vmatprep.subr.bf16.mxu0 %v10467_v49  ;;  %9482 = vmatprep.subr.bf16.mxu1 %v10467_v49  ;;  %v3318_v10 = vsel %vm1173_vm6, %v3317_v61, %v3316_v1  ;;  %v3544_v61 = vrot.slane %v3442_v44, 5  ;;  %v10190_v27 = vld [vmem:[#allocation2 + $0x68] ss:$0 sps:$4 sm:$0x88]  }
 0x1fe   :  { %v3005_v53 = vsel %vm1188_vm11, %v3004_v39, %v3003_v41  ;;  %v3443_v39 = vunpack.c.l.b16 %v10172_v24  ;;  %v11206_v41 = vld [vmem:[#allocation2 + $0x88] ss:$0 sps:$4 sm:$0x44]  }
 0x1ff   :  { %v3007_v57 = vsel %vm1191_vm12, %v3006_v40, %v3005_v53  ;;  %v3264_v40 = vsel %vm1221_vm2, %v10153_v15, 0 }
 0x200   :  { %9471 = vmatpush3.bf16.msra.mxu0 %v2808_v58  ;;  %9483 = vmatpush3.bf16.msra.mxu1 %v2902_v59  ;;  %v3099_v58 = vsel %vm1188_vm11, %v3098_v43, %v3097_v45  ;;  %v10162_v59 = vld [vmem:[#allocation2 + $0xe8] ss:$0 sps:$4 sm:$0x22]   ;;  %v3008_v2 = vpack.c.b16 %v3007_v57, %v3007_v57  ;;  %v3545_v53 = vrot.slane %v3443_v39, 4 }
 0x201   :  { %9488 = vmatprep.subr.bf16.mxu0 %v10467_v49  ;;  %9500 = vmatprep.subr.bf16.mxu1 %v10467_v49  ;;  %v3101_v62 = vsel %vm1191_vm12, %v3100_v46, %v3099_v58  ;;  %v11209_v43 = vld [vmem:[#allocation2 + $0xa8] ss:$0 sps:$4 sm:$0x44]   ;;  %v3446_v58 = vunpack.c.l.b16 %v11206_v41 }
 0x202   :  { %v3102_v7 = vpack.c.b16 %v3101_v62, %v3101_v62  ;;  %v10178_v57 = vld [vmem:[#allocation2 + $0xe8] ss:$0 sps:$4 sm:$0x44]  }
 0x203   :  { %9473 = vmatmul.mubr.msk.bf16.vlgmr.msra.gmra.mrb[60].mxu0 %vm1217_vm13, %v2780_v8  ;;  %9485 = vmatmul.mubr.msk.bf16.vlgmr.msra.gmra.mrb[60].mxu1 %vm1217_vm13, %v2874_v12  ;;  %v3224_v8 = vsel %vm1173_vm6, %v3223_v60, %v3222_v0  ;;  %v3221_v12 = vunpack.c.l.b16 %v10162_v59  ;;  %v3447_v59 = vunpack.c.l.b16 %v11209_v43  ;;  %v3450_v60 = vrot.slane %v3442_v44, 4  ;;  %v10179_v43 = vld [vmem:[%s12422_s1 + $0x2c0] sm:$0xff]   ;;  %v11276_v44 = vld [vmem:[#allocation2 + $0xc8] ss:$0 sps:$4 sm:$0x88]  }
 0x204   :  { %9489 = vmatpush3.bf16.msra.mxu0 %v10131_v3  ;;  %9501 = vmatpush3.bf16.msra.mxu1 %v10132_v6  ;;  %v10148_v3 = vld [vmem:[%s12422_s1 + $0x260] sm:$0xff]   ;;  %v3319_v6 = vrot.slane %v3216_v55, 1  ;;  %v3225_v16 = vsel %vm1176_vm7, %v3216_v55, %v3224_v8  ;;  %v3551_v11 = vrot.slane %v3446_v58, 1 }
 0x205   :  { %9490 = vmatprep.subr.bf16.mxu0 %v10467_v49  ;;  %9502 = vmatprep.subr.bf16.mxu1 %v10467_v49  ;;  %v3227_v20 = vsel %vm1179_vm8, %v3226_v9, %v3225_v16  ;;  %v3234_v33 = vrot.slane %v3221_v12, 3  ;;  %v3328_v38 = vrot.slane %v3221_v12, 4  ;;  %v10164_v55 = vld [vmem:[%s12422_s1 + $0x2a0] sm:$0xff]   ;;  %v3449_v12 = vunpack.c.l.b16 %v10178_v57  ;;  %v10167_v16 = vld [vmem:[%s12422_s1 + $0x290] sm:$0xff]  }
 0x206   :  { %9496 = vmatprep.mubr.msk.bf16.mxu0 %vm10468_vm3, %v10467_v49  ;;  %9508 = vmatprep.mubr.msk.bf16.mxu1 %vm10468_vm3, %v10467_v49  ;;  %v3229_v32 = vsel %vm1182_vm9, %v3228_v17, %v3227_v20  ;;  %v10168_v17 = vld [vmem:[%s12422_s1 + $0x2b0] sm:$0xff]   ;;  %v10170_v20 = vld [vmem:[%s12422_s1 + $0x2b8] sm:$0x1f]  }
 0x207   :  { %v3231_v36 = vsel %vm1185_vm10, %v3230_v21, %v3229_v32  ;;  %v10187_v21 = vld [vmem:[#allocation2 + $0x8] ss:$0 sps:$4 sm:$0x88]   ;;  %v3462_v29 = vrot.slane %v3449_v12, 5 }
 0x208   :  { %9491 = vmatpush3.bf16.msra.mxu0 %v10133_v18  ;;  %9503 = vmatpush3.bf16.msra.mxu1 %v10134_v19  ;;  %v3320_v18 = vsel %vm1176_vm7, %v3319_v6, %v3318_v10  ;;  %v3322_v19 = vrot.slane %v3218_v4, 7  ;;  %v3233_v45 = vsel %vm1188_vm11, %v3232_v28, %v3231_v36  ;;  %v3546_v4 = vsel %vm1173_vm6, %v3545_v53, %v3544_v61  ;;  %v10165_v6 = vld [vmem:[%s12422_s1 + $0x288] sm:$0xff]  }
 0x209   :  { %9492 = vmatprep.subr.bf16.mxu0 %v10467_v49  ;;  %9504 = vmatprep.subr.bf16.mxu1 %v10467_v49  ;;  %v3321_v22 = vsel %vm1179_vm8, %v3217_v56, %v3320_v18  ;;  %v3235_v50 = vsel %vm1191_vm12, %v3234_v33, %v3233_v45  ;;  %v10177_v56 = vld [vmem:[#allocation2 + $0xc8] ss:$0 sps:$4 sm:$0x44]   ;;  %v10169_v18 = vld [vmem:[%s12422_s1 + $0x298] sm:$0x1f]  }
 0x20a   :  { %v3323_v34 = vsel %vm1182_vm9, %v3322_v19, %v3321_v22  ;;  %v3236_v62 = vpack.c.b16 %v3235_v50, %v3235_v50  ;;  %v3448_v8 = vunpack.c.l.b16 %v10177_v56  ;;  %v10188_v19 = vld [vmem:[#allocation2 + $0x28] ss:$0 sps:$4 sm:$0x88]   ;;  %v10180_v50 = vld [vmem:[%s12422_s1 + $0x2e0] sm:$0xff]  }
 0x20b   :  { %v3325_v37 = vsel %vm1185_vm10, %v3324_v23, %v3323_v34  ;;  %v10189_v22 = vld [vmem:[#allocation2 + $0x48] ss:$0 sps:$4 sm:$0x88]   ;;  %v3671_v32 = vunpack.c.l.b16 %v10188_v19  ;;  %v3492_v34 = vsel %vm1221_vm2, %v10169_v18, 0 }
 0x20c   :  { %9493 = vmatpush3.bf16.msra.mxu0 %v10135_v30  ;;  %9505 = vmatpush3.bf16.msra.mxu1 %v10136_v31  ;;  %v10173_v30 = vld [vmem:[#allocation2 + $0x48] ss:$0 sps:$4 sm:$0x44]   ;;  %v3327_v46 = vsel %vm1188_vm11, %v3326_v35, %v3325_v37  ;;  %v3460_v24 = vrot.slane %v3448_v8, 6 }
 0x20d   :  { %9494 = vmatprep.subr.bf16.mxu0 %v10467_v49  ;;  %9506 = vmatprep.subr.bf16.mxu1 %v10467_v49  ;;  %v10174_v31 = vld [vmem:[#allocation2 + $0x68] ss:$0 sps:$4 sm:$0x44]   ;;  %v3444_v47 = vunpack.c.l.b16 %v10173_v30  ;;  %v3329_v51 = vsel %vm1191_vm12, %v3328_v38, %v3327_v46  ;;  %v3670_v38 = vunpack.c.l.b16 %v10187_v21  ;;  %v3673_v46 = vunpack.c.l.b16 %v10190_v27  ;;  %v10206_v18 = vld [vmem:[#allocation2 + $0x6c] ss:$0 sps:$4 sm:$0x11]  }
 0x20e   :  { %v10191_v33 = vld [vmem:[#allocation2 + $0x88] ss:$0 sps:$4 sm:$0x88]  }
 0x20f   :  { %v3453_v0 = vrot.slane %v3444_v47, 2  ;;  %v3547_v1 = vrot.slane %v3444_v47, 3  ;;  %v10192_v37 = vld [vmem:[#allocation2 + $0xa8] ss:$0 sps:$4 sm:$0x88]   ;;  %v3679_v47 = vrot.slane %v3671_v32, 5 }
 0x210   :  { %9495 = vmatpush3.bf16.msra.mxu0 %v3036_v48  ;;  %9507 = vmatpush3.bf16.msra.mxu1 %v3130_v52  ;;  %v3445_v48 = vunpack.c.l.b16 %v10174_v31  ;;  %v3451_v52 = vrot.slane %v3443_v39, 3  ;;  %v3556_v31 = vrot.slane %v3449_v12, 6  ;;  %v3586_v39 = vsel %vm1221_vm2, %v10170_v20, 0  ;;  %v11278_v45 = vld [vmem:[#allocation2 + $0xe8] ss:$0 sps:$4 sm:$0x88]  }
 0x211   :  { %9512 = vmatprep.subr.bf16.mxu0 %v10467_v49  ;;  %9524 = vmatprep.subr.bf16.mxu1 %v10467_v49  ;;  %v3548_v10 = vsel %vm1176_vm7, %v3547_v1, %v3546_v4  ;;  %v3678_v53 = vrot.slane %v3670_v38, 6  ;;  %v3675_v56 = vunpack.c.l.b16 %v10192_v37  ;;  %v3683_v61 = vrot.slane %v3673_v46, 3  ;;  %v10182_v1 = vld [vmem:[%s12422_s1 + $0x2e8] sm:$0xff]  }
 0x212   :  { %v3549_v5 = vrot.slane %v3445_v48, 2 }
 0x213   :  { %9497 = vmatmul.mubr.msk.bf16.vlgmr.msra.gmra.mrb[64].mxu0 %vm1217_vm13, %v3008_v2  ;;  %9509 = vmatmul.mubr.msk.bf16.vlgmr.msra.gmra.mrb[64].mxu1 %vm1217_vm13, %v3102_v7  ;;  %v3452_v2 = vsel %vm1173_vm6, %v3451_v52, %v3450_v60  ;;  %v10166_v7 = vld [vmem:[%s12422_s1 + $0x2a8] sm:$0xff]   ;;  %v3680_v60 = vsel %vm1173_vm6, %v3679_v47, %v3678_v53  ;;  %v3781_v12 = vrot.slane %v3675_v56, 2 }
 0x214   :  { %9513 = vmatpush3.bf16.msra.mxu0 %v10147_v63  ;;  %9525 = vmatpush3.bf16.msra.mxu1 %v10148_v3  ;;  %v3330_v63 = vpack.c.b16 %v3329_v51, %v3329_v51  ;;  %v3455_v3 = vrot.slane %v3445_v48, 1  ;;  %v3454_v9 = vsel %vm1176_vm7, %v3453_v0, %v3452_v2  ;;  %v3550_v15 = vsel %vm1179_vm8, %v3549_v5, %v3548_v10  ;;  %v11290_v0 = vld [vmem:[#allocation2 + $0x2c] ss:$0 sps:$4 sm:$0x11]  }
 0x215   :  { %9514 = vmatprep.subr.bf16.mxu0 %v10467_v49  ;;  %9526 = vmatprep.subr.bf16.mxu1 %v10467_v49  ;;  %v3773_v48 = vrot.slane %v3671_v32, 6  ;;  %v3676_v2 = vunpack.c.l.b16 %v11276_v44  ;;  %v3687_v10 = vrot.slane %v3675_v56, 1  ;;  %v3899_v19 = vunpack.c.l.b16 %v11290_v0  ;;  %v10198_v53 = vld [vmem:[%s12422_s1 + $0x328] sm:$0xff]  }
 0x216   :  { %9520 = vmatprep.mubr.msk.bf16.mxu0 %vm10468_vm3, %v10467_v49  ;;  %9532 = vmatprep.mubr.msk.bf16.mxu1 %vm10468_vm3, %v10467_v49  ;;  %v10220_v0 = vld [vmem:[#allocation2 + $0x2c] ss:$0 sps:$4 sm:$0x22]  }
 0x217   :  { %v3906_v32 = vrot.slane %v3899_v19, 7 }
 0x218   :  { %9515 = vmatpush3.bf16.msra.mxu0 %v10149_v13  ;;  %9527 = vmatpush3.bf16.msra.mxu1 %v10150_v14  ;;  %v3456_v13 = vsel %vm1179_vm8, %v3455_v3, %v3454_v9  ;;  %v3458_v14 = vrot.slane %v3447_v59, 7  ;;  %v3677_v3 = vunpack.c.l.b16 %v11278_v45 }
 0x219   :  { %9516 = vmatprep.subr.bf16.mxu0 %v10467_v49  ;;  %9528 = vmatprep.subr.bf16.mxu1 %v10467_v49  ;;  %v3457_v23 = vsel %vm1182_vm9, %v3446_v58, %v3456_v13  ;;  %v10205_v13 = vld [vmem:[#allocation2 + $0x4c] ss:$0 sps:$4 sm:$0x11]  }
 0x21a   :  { %v3459_v28 = vsel %vm1185_vm10, %v3458_v14, %v3457_v23  ;;  %v10184_v14 = vld [vmem:[%s12422_s1 + $0x2f0] sm:$0xff]   ;;  %v10207_v23 = vld [vmem:[#allocation2 + $0x8c] ss:$0 sps:$4 sm:$0x11]   ;;  %v3900_v27 = vunpack.c.l.b16 %v10205_v13 }
 0x21b   :  { %v3461_v35 = vsel %vm1188_vm11, %v3460_v24, %v3459_v28  ;;  %v10208_v28 = vld [vmem:[#allocation2 + $0xac] ss:$0 sps:$4 sm:$0x11]  }
 0x21c   :  { %9517 = vmatpush3.bf16.msra.mxu0 %v10151_v25  ;;  %9529 = vmatpush3.bf16.msra.mxu1 %v10152_v26  ;;  %v3552_v25 = vsel %vm1182_vm9, %v3551_v11, %v3550_v15  ;;  %v3554_v26 = vrot.slane %v3448_v8, 7  ;;  %v10183_v8 = vld [vmem:[%s12422_s1 + $0x2d0] sm:$0xff]   ;;  %v10185_v15 = vld [vmem:[%s12422_s1 + $0x2d8] sm:$0x1f]   ;;  %v3903_v44 = vunpack.c.l.b16 %v10208_v28 }
 0x21d   :  { %9518 = vmatprep.subr.bf16.mxu0 %v10467_v49  ;;  %9530 = vmatprep.subr.bf16.mxu1 %v10467_v49  ;;  %v3553_v30 = vsel %vm1185_vm10, %v3447_v59, %v3552_v25  ;;  %v10181_v59 = vld [vmem:[%s12422_s1 + $0x2c8] sm:$0xff]   ;;  %v3690_v25 = vrot.slane %v3677_v3, 7 }
 0x21e   :  { %v3555_v36 = vsel %vm1188_vm11, %v3554_v26, %v3553_v30  ;;  %v11381_v13 = vld [vmem:[#allocation2 + $0x6c] ss:$0 sps:$4 sm:$0x22]  }
 0x21f   :  { %v3557_v41 = vsel %vm1191_vm12, %v3556_v31, %v3555_v36  ;;  %v3901_v31 = vunpack.c.l.b16 %v10206_v18  ;;  %v10225_v28 = vld [vmem:[#allocation2 + $0xcc] ss:$0 sps:$4 sm:$0x22]  }
 0x220   :  { %9519 = vmatpush3.bf16.msra.mxu0 %v3264_v40  ;;  %9531 = vmatpush3.bf16.msra.mxu1 %v3358_v42  ;;  %v3463_v40 = vsel %vm1191_vm12, %v3462_v29, %v3461_v35  ;;  %v3672_v42 = vunpack.c.l.b16 %v10189_v22  ;;  %v3558_v52 = vpack.c.b16 %v3557_v41, %v3557_v41  ;;  %v3783_v22 = vrot.slane %v3676_v2, 1  ;;  %v11328_v29 = vld [vmem:[#allocation2 + $0xcc] ss:$0 sps:$4 sm:$0x11]  }
 0x221   :  { %9536 = vmatprep.subr.bf16.mxu0 %v10467_v49  ;;  %9548 = vmatprep.subr.bf16.mxu1 %v10467_v49  ;;  %v3464_v51 = vpack.c.b16 %v3463_v40, %v3463_v40  ;;  %v10196_v40 = vld [vmem:[%s12422_s1 + $0x320] sm:$0xff]   ;;  %v10210_v41 = vld [vmem:[#allocation2 + $0xec] ss:$0 sps:$4 sm:$0x11]   ;;  %v4004_v56 = vrot.slane %v3901_v31, 6 }
 0x222   :  { %v3681_v57 = vrot.slane %v3672_v42, 4  ;;  %v3775_v58 = vrot.slane %v3672_v42, 5  ;;  %v3908_v42 = vrot.slane %v3900_v27, 6 }
 0x223   :  { %9521 = vmatmul.mubr.msk.bf16.vlgmr.msra.gmra.mrb[68].mxu0 %vm1217_vm13, %v3236_v62  ;;  %9533 = vmatmul.mubr.msk.bf16.vlgmr.msra.gmra.mrb[68].mxu1 %vm1217_vm13, %v3330_v63  ;;  %v3777_v63 = vrot.slane %v3673_v46, 4  ;;  %v3910_v46 = vrot.slane %v3901_v31, 5 }
 0x224   :  { %9537 = vmatpush3.bf16.msra.mxu0 %v10163_v54  ;;  %9549 = vmatpush3.bf16.msra.mxu1 %v10164_v55  ;;  %v3772_v54 = vrot.slane %v3670_v38, 7  ;;  %v3674_v55 = vunpack.c.l.b16 %v10191_v33  ;;  %v3682_v4 = vsel %vm1176_vm7, %v3681_v57, %v3680_v60  ;;  %v3720_v33 = vsel %vm1221_vm2, %v10185_v15, 0 }
 0x225   :  { %9538 = vmatprep.subr.bf16.mxu0 %v10467_v49  ;;  %9550 = vmatprep.subr.bf16.mxu1 %v10467_v49  ;;  %v3684_v9 = vsel %vm1179_vm8, %v3683_v61, %v3682_v4  ;;  %v3905_v57 = vunpack.c.l.b16 %v10210_v41  ;;  %v3914_v60 = vrot.slane %v3903_v44, 3 }
 0x226   :  { %9544 = vmatprep.mubr.msk.bf16.mxu0 %vm10468_vm3, %v10467_v49  ;;  %9556 = vmatprep.mubr.msk.bf16.mxu1 %vm10468_vm3, %v10467_v49  ;;  %v3774_v62 = vsel %vm1173_vm6, %v3773_v48, %v3772_v54  ;;  %v3685_v5 = vrot.slane %v3674_v55, 2  ;;  %v3904_v54 = vunpack.c.l.b16 %v11328_v29  ;;  %v4129_v29 = vunpack.c.l.b16 %v11381_v13  ;;  %v11444_v13 = vld [vmem:[#allocation2 + $0xac] ss:$0 sps:$4 sm:$0x44]  }
 0x228   :  { %9539 = vmatpush3.bf16.msra.mxu0 %v10165_v6  ;;  %9551 = vmatpush3.bf16.msra.mxu1 %v10166_v7  ;;  %v3776_v6 = vsel %vm1176_vm7, %v3775_v58, %v3774_v62  ;;  %v3779_v7 = vrot.slane %v3674_v55, 3  ;;  %v3686_v20 = vsel %vm1182_vm9, %v3685_v5, %v3684_v9  ;;  %v4008_v5 = vrot.slane %v3903_v44, 4 }
 0x229   :  { %9540 = vmatprep.subr.bf16.mxu0 %v10467_v49  ;;  %9552 = vmatprep.subr.bf16.mxu1 %v10467_v49  ;;  %v3778_v11 = vsel %vm1179_vm8, %v3777_v63, %v3776_v6  ;;  %v3688_v24 = vsel %vm1185_vm10, %v3687_v10, %v3686_v20  ;;  %v10200_v6 = vld [vmem:[%s12422_s1 + $0x330] sm:$0xff]   ;;  %v3918_v9 = vrot.slane %v3905_v57, 1  ;;  %v10219_v10 = vld [vmem:[#allocation2 + $0xc] ss:$0 sps:$4 sm:$0x22]   ;;  %v4010_v15 = vrot.slane %v3904_v54, 3 }
 0x22a   :  { %v3780_v21 = vsel %vm1182_vm9, %v3779_v7, %v3778_v11  ;;  %v3689_v35 = vsel %vm1188_vm11, %v3676_v2, %v3688_v24  ;;  %v10201_v2 = vld [vmem:[%s12422_s1 + $0x318] sm:$0x1f]   ;;  %v4138_v44 = vrot.slane %v4129_v29, 7 }
 0x22b   :  { %v3782_v26 = vsel %vm1185_vm10, %v3781_v12, %v3780_v21  ;;  %v3691_v37 = vsel %vm1191_vm12, %v3690_v25, %v3689_v35  ;;  %v10221_v12 = vld [vmem:[#allocation2 + $0x4c] ss:$0 sps:$4 sm:$0x22]  }
 0x22c   :  { %9541 = vmatpush3.bf16.msra.mxu0 %v10167_v16  ;;  %9553 = vmatpush3.bf16.msra.mxu1 %v10168_v17  ;;  %v10186_v16 = vld [vmem:[%s12422_s1 + $0x2f8] sm:$0x1f]   ;;  %v10203_v17 = vld [vmem:[#allocation2 + $0xc] ss:$0 sps:$4 sm:$0x11]   ;;  %v3784_v36 = vsel %vm1188_vm11, %v3783_v22, %v3782_v26  ;;  %v3692_v48 = vpack.c.b16 %v3691_v37, %v3691_v37  ;;  %v4126_v22 = vunpack.c.l.b16 %v10219_v10  ;;  %v4128_v26 = vunpack.c.l.b16 %v10221_v12 }
 0x22d   :  { %9542 = vmatprep.subr.bf16.mxu0 %v10467_v49  ;;  %9554 = vmatprep.subr.bf16.mxu1 %v10467_v49  ;;  %v3898_v30 = vunpack.c.l.b16 %v10203_v17  ;;  %v3785_v38 = vsel %vm1191_vm12, %v3677_v3, %v3784_v36  ;;  %v10202_v3 = vld [vmem:[%s12422_s1 + $0x338] sm:$0x1f]   ;;  %v4127_v17 = vunpack.c.l.b16 %v10220_v0  ;;  %v10224_v21 = vld [vmem:[#allocation2 + $0xac] ss:$0 sps:$4 sm:$0x22]  }
 0x22e   :  { %v4042_v24 = vsel %vm1221_vm2, %v10202_v3, 0  ;;  %v4131_v36 = vunpack.c.l.b16 %v10224_v21  ;;  %v4134_v37 = vrot.slane %v4126_v22, 2  ;;  %v4231_v41 = vrot.slane %v4128_v26, 1  ;;  %v10218_v3 = vld [vmem:[%s12422_s1 + $0x378] sm:$0x1f]  }
 0x22f   :  { %v3907_v45 = vsel %vm1173_vm6, %v3906_v32, %v3898_v30  ;;  %v4000_v47 = vrot.slane %v3898_v30, 1  ;;  %v4135_v30 = vrot.slane %v4127_v17, 1  ;;  %v4229_v31 = vrot.slane %v4127_v17, 2  ;;  %v11442_v12 = vld [vmem:[#allocation2 + $0x8c] ss:$0 sps:$4 sm:$0x44]  }
 0x230   :  { %9543 = vmatpush3.bf16.msra.mxu0 %v3492_v34  ;;  %9555 = vmatpush3.bf16.msra.mxu1 %v3586_v39  ;;  %v3814_v34 = vsel %vm1221_vm2, %v10186_v16, 0  ;;  %v10195_v39 = vld [vmem:[%s12422_s1 + $0x300] sm:$0xff]   ;;  %v3909_v58 = vsel %vm1176_vm7, %v3908_v42, %v3907_v45  ;;  %v10223_v16 = vld [vmem:[#allocation2 + $0x8c] ss:$0 sps:$4 sm:$0x22]  }
 0x231   :  { %9560 = vmatprep.subr.bf16.mxu0 %v10467_v49  ;;  %9572 = vmatprep.subr.bf16.mxu1 %v10467_v49  ;;  %v4001_v55 = vsel %vm1173_vm6, %v3899_v19, %v4000_v47  ;;  %v3911_v61 = vsel %vm1179_vm8, %v3910_v46, %v3909_v58  ;;  %v4012_v19 = vrot.slane %v3905_v57, 2  ;;  %v4130_v35 = vunpack.c.l.b16 %v10223_v16  ;;  %v10213_v46 = vld [vmem:[%s12422_s1 + $0x348] sm:$0xff]  }
 0x232   :  { %v10214_v47 = vld [vmem:[%s12422_s1 + $0x368] sm:$0xff]  }
 0x233   :  { %9545 = vmatmul.mubr.msk.bf16.vlgmr.msra.gmra.mrb[72].mxu0 %vm1217_vm13, %v3464_v51  ;;  %9557 = vmatmul.mubr.msk.bf16.vlgmr.msra.gmra.mrb[72].mxu1 %vm1217_vm13, %v3558_v52  ;;  %v4002_v51 = vrot.slane %v3900_v27, 7  ;;  %v10197_v52 = vld [vmem:[%s12422_s1 + $0x308] sm:$0xff]  }
 0x234   :  { %9561 = vmatpush3.bf16.msra.mxu0 %v10179_v43  ;;  %9573 = vmatpush3.bf16.msra.mxu1 %v10180_v50  ;;  %v3902_v43 = vunpack.c.l.b16 %v10207_v23  ;;  %v3786_v50 = vpack.c.b16 %v3785_v38, %v3785_v38  ;;  %v3948_v23 = vsel %vm1221_vm2, %v10201_v2, 0  ;;  %v4228_v38 = vrot.slane %v4126_v22, 3  ;;  %v10235_v57 = vld [vmem:[#allocation2 + $0xc] ss:$0 sps:$4 sm:$0x44]   ;;  %v10216_v2 = vld [vmem:[%s12422_s1 + $0x370] sm:$0xff]  }
 0x235   :  { %9562 = vmatprep.subr.bf16.mxu0 %v10467_v49  ;;  %9574 = vmatprep.subr.bf16.mxu1 %v10467_v49  ;;  %v4003_v62 = vsel %vm1176_vm7, %v4002_v51, %v4001_v55  ;;  %v4140_v51 = vrot.slane %v4130_v35, 6  ;;  %v4234_v55 = vrot.slane %v4130_v35, 7 }
 0x236   :  { %9568 = vmatprep.mubr.msk.bf16.mxu0 %vm10468_vm3, %v10467_v49  ;;  %9580 = vmatprep.mubr.msk.bf16.mxu1 %vm10468_vm3, %v10467_v49  ;;  %v4006_v63 = vrot.slane %v3902_v43, 5  ;;  %v4005_v4 = vsel %vm1179_vm8, %v4004_v56, %v4003_v62  ;;  %v4230_v45 = vsel %vm1173_vm6, %v4229_v31, %v4228_v38  ;;  %v4236_v56 = vrot.slane %v4131_v36, 6  ;;  %v10238_v62 = vld [vmem:[#allocation2 + $0x6c] ss:$0 sps:$4 sm:$0x44]  }
 0x237   :  { %v4357_v16 = vunpack.c.l.b16 %v10238_v62 }
 0x238   :  { %9563 = vmatpush3.bf16.msra.mxu0 %v10181_v59  ;;  %9575 = vmatpush3.bf16.msra.mxu1 %v10182_v1  ;;  %v3912_v59 = vrot.slane %v3902_v43, 4  ;;  %v10199_v1 = vld [vmem:[%s12422_s1 + $0x310] sm:$0xff]   ;;  %v4136_v43 = vsel %vm1173_vm6, %v4135_v30, %v4134_v37 }
 0x239   :  { %9564 = vmatprep.subr.bf16.mxu0 %v10467_v49  ;;  %9576 = vmatprep.subr.bf16.mxu1 %v10467_v49  ;;  %v4367_v31 = vrot.slane %v4357_v16, 1  ;;  %v4461_v35 = vrot.slane %v4357_v16, 2 }
 0x23a   :  { %v3913_v7 = vsel %vm1182_vm9, %v3912_v59, %v3911_v61  ;;  %v10237_v61 = vld [vmem:[#allocation2 + $0x4c] ss:$0 sps:$4 sm:$0x44]  }
 0x23b   :  { %v3915_v11 = vsel %vm1185_vm10, %v3914_v60, %v3913_v7 }
 0x23c   :  { %9565 = vmatpush3.bf16.msra.mxu0 %v10183_v8  ;;  %9577 = vmatpush3.bf16.msra.mxu1 %v10184_v14  ;;  %v3916_v8 = vrot.slane %v3904_v54, 2  ;;  %v4007_v14 = vsel %vm1182_vm9, %v4006_v63, %v4005_v4  ;;  %v4232_v54 = vsel %vm1176_vm7, %v4231_v41, %v4230_v45  ;;  %v10217_v63 = vld [vmem:[%s12422_s1 + $0x358] sm:$0x1f]  }
 0x23d   :  { %9566 = vmatprep.subr.bf16.mxu0 %v10467_v49  ;;  %9578 = vmatprep.subr.bf16.mxu1 %v10467_v49  ;;  %v4009_v18 = vsel %vm1185_vm10, %v4008_v5, %v4007_v14  ;;  %v4233_v60 = vsel %vm1179_vm8, %v4129_v29, %v4232_v54  ;;  %v4354_v14 = vunpack.c.l.b16 %v10235_v57  ;;  %v4176_v17 = vsel %vm1221_vm2, %v10217_v63, 0  ;;  %v10232_v57 = vld [vmem:[%s12422_s1 + $0x3b0] sm:$0xff]  }
 0x23e   :  { %v3917_v20 = vsel %vm1188_vm11, %v3916_v8, %v3915_v11  ;;  %v4011_v27 = vsel %vm1188_vm11, %v4010_v15, %v4009_v18  ;;  %v4235_v5 = vsel %vm1182_vm9, %v4234_v55, %v4233_v60  ;;  %v4356_v15 = vunpack.c.l.b16 %v10237_v61 }
 0x23f   :  { %v3919_v25 = vsel %vm1191_vm12, %v3918_v9, %v3917_v20  ;;  %v4013_v32 = vsel %vm1191_vm12, %v4012_v19, %v4011_v27  ;;  %v4237_v10 = vsel %vm1185_vm10, %v4236_v56, %v4235_v5  ;;  %v10241_v20 = vld [vmem:[#allocation2 + $0xcc] ss:$0 sps:$4 sm:$0x44]   ;;  %v10227_v27 = vld [vmem:[%s12422_s1 + $0x380] sm:$0xff]   ;;  %v4362_v29 = vrot.slane %v4354_v14, 4  ;;  %v10231_v56 = vld [vmem:[%s12422_s1 + $0x390] sm:$0xff]  }
 0x240   :  { %9567 = vmatpush3.bf16.msra.mxu0 %v3720_v33  ;;  %9579 = vmatpush3.bf16.msra.mxu1 %v3814_v34  ;;  %v10211_v33 = vld [vmem:[%s12422_s1 + $0x340] sm:$0xff]   ;;  %v10226_v34 = vld [vmem:[#allocation2 + $0xec] ss:$0 sps:$4 sm:$0x22]   ;;  %v4014_v42 = vpack.c.b16 %v4013_v32, %v4013_v32  ;;  %v4365_v30 = vrot.slane %v4356_v15, 2  ;;  %v4456_v32 = vrot.slane %v4354_v14, 5  ;;  %v4360_v41 = vunpack.c.l.b16 %v10241_v20 }
 0x241   :  { %9584 = vmatprep.subr.bf16.mxu0 %v10467_v49  ;;  %9596 = vmatprep.subr.bf16.mxu1 %v10467_v49  ;;  %v4133_v58 = vunpack.c.l.b16 %v10226_v34  ;;  %v4459_v34 = vrot.slane %v4356_v15, 3 }
 0x243   :  { %9569 = vmatmul.mubr.msk.bf16.vlgmr.msra.gmra.mrb[76].mxu0 %vm1217_vm13, %v3692_v48  ;;  %9581 = vmatmul.mubr.msk.bf16.vlgmr.msra.gmra.mrb[76].mxu1 %vm1217_vm13, %v3786_v50  ;;  %v10236_v48 = vld [vmem:[#allocation2 + $0x2c] ss:$0 sps:$4 sm:$0x44]   ;;  %v4132_v50 = vunpack.c.l.b16 %v10225_v28  ;;  %v4146_v9 = vrot.slane %v4133_v58, 3  ;;  %v4240_v11 = vrot.slane %v4133_v58, 4  ;;  %v10228_v28 = vld [vmem:[%s12422_s1 + $0x3a0] sm:$0xff]  }
 0x244   :  { %9585 = vmatpush3.bf16.msra.mxu0 %v10195_v39  ;;  %9597 = vmatpush3.bf16.msra.mxu1 %v10196_v40  ;;  %v3920_v39 = vpack.c.b16 %v3919_v25, %v3919_v25  ;;  %v10212_v40 = vld [vmem:[%s12422_s1 + $0x360] sm:$0xff]   ;;  %v4355_v7 = vunpack.c.l.b16 %v10236_v48  ;;  %v10230_v48 = vld [vmem:[%s12422_s1 + $0x3a8] sm:$0xff]   ;;  %v10234_v58 = vld [vmem:[%s12422_s1 + $0x3b8] sm:$0x1f]  }
 0x245   :  { %9586 = vmatprep.subr.bf16.mxu0 %v10467_v49  ;;  %9598 = vmatprep.subr.bf16.mxu1 %v10467_v49  ;;  %v4144_v0 = vrot.slane %v4132_v50, 4  ;;  %v4498_v20 = vsel %vm1221_vm2, %v10234_v58, 0 }
 0x246   :  { %9592 = vmatprep.mubr.msk.bf16.mxu0 %vm10468_vm3, %v10467_v49  ;;  %9604 = vmatprep.mubr.msk.bf16.mxu1 %vm10468_vm3, %v10467_v49  ;;  %v4363_v21 = vrot.slane %v4355_v7, 3  ;;  %v4457_v22 = vrot.slane %v4355_v7, 4 }
 0x248   :  { %9587 = vmatpush3.bf16.msra.mxu0 %v10197_v52  ;;  %9599 = vmatpush3.bf16.msra.mxu1 %v10198_v53  ;;  %v4142_v52 = vrot.slane %v4131_v36, 5  ;;  %v4137_v53 = vsel %vm1176_vm7, %v4128_v26, %v4136_v43  ;;  %v10242_v26 = vld [vmem:[#allocation2 + $0xec] ss:$0 sps:$4 sm:$0x44]   ;;  %v4359_v36 = vunpack.c.l.b16 %v11444_v13  ;;  %v4364_v37 = vsel %vm1173_vm6, %v4363_v21, %v4362_v29  ;;  %v10244_v29 = vld [vmem:[%s12422_s1 + $0x3e0] sm:$0xff]  }
 0x249   :  { %9588 = vmatprep.subr.bf16.mxu0 %v10467_v49  ;;  %9600 = vmatprep.subr.bf16.mxu1 %v10467_v49  ;;  %v4139_v59 = vsel %vm1179_vm8, %v4138_v44, %v4137_v53  ;;  %v4458_v38 = vsel %vm1173_vm6, %v4457_v22, %v4456_v32  ;;  %v10229_v43 = vld [vmem:[%s12422_s1 + $0x388] sm:$0xff]   ;;  %v4366_v44 = vsel %vm1176_vm7, %v4365_v30, %v4364_v37 }
 0x24a   :  { %v4141_v4 = vsel %vm1182_vm9, %v4140_v51, %v4139_v59  ;;  %v4460_v45 = vsel %vm1176_vm7, %v4459_v34, %v4458_v38  ;;  %v4368_v51 = vsel %vm1179_vm8, %v4367_v31, %v4366_v44  ;;  %v4372_v59 = vrot.slane %v4360_v41, 6  ;;  %v11520_v30 = vld [vmem:[#allocation2 + $0xec] ss:$0 sps:$4 sm:$0x88]  }
 0x24b   :  { %v4143_v8 = vsel %vm1185_vm10, %v4142_v52, %v4141_v4  ;;  %v4370_v52 = vrot.slane %v4359_v36, 7  ;;  %v4462_v53 = vsel %vm1179_vm8, %v4461_v35, %v4460_v45  ;;  %v4589_v45 = vunpack.c.l.b16 %v11520_v30  ;;  %v10259_v30 = vld [vmem:[%s12422_s1 + $0x400] sm:$0xff]  }
 0x24c   :  { %9589 = vmatpush3.bf16.msra.mxu0 %v10199_v1  ;;  %9601 = vmatpush3.bf16.msra.mxu1 %v10200_v6  ;;  %v10215_v1 = vld [vmem:[%s12422_s1 + $0x350] sm:$0xff]   ;;  %v4238_v6 = vrot.slane %v4132_v50, 5  ;;  %v4145_v18 = vsel %vm1188_vm11, %v4144_v0, %v4143_v8  ;;  %v10233_v50 = vld [vmem:[%s12422_s1 + $0x398] sm:$0x1f]  }
 0x24d   :  { %9590 = vmatprep.subr.bf16.mxu0 %v10467_v49  ;;  %9602 = vmatprep.subr.bf16.mxu1 %v10467_v49  ;;  %v4404_v14 = vsel %vm1221_vm2, %v10233_v50, 0 }
 0x24e   :  { %v4239_v19 = vsel %vm1188_vm11, %v4238_v6, %v4237_v10 }
 0x24f   :  { %v4241_v25 = vsel %vm1191_vm12, %v4240_v11, %v4239_v19 }
 0x250   :  { %9591 = vmatpush3.bf16.msra.mxu0 %v3948_v23  ;;  %9603 = vmatpush3.bf16.msra.mxu1 %v4042_v24  ;;  %v4270_v23 = vsel %vm1221_vm2, %v10218_v3, 0  ;;  %v4147_v24 = vsel %vm1191_vm12, %v4146_v9, %v4145_v18  ;;  %v10251_v3 = vld [vmem:[#allocation2 + $0xc] ss:$0 sps:$4 sm:$0x88]  }
 0x251   :  { %9608 = vmatprep.subr.bf16.mxu0 %v10467_v49  ;;  %9620 = vmatprep.subr.bf16.mxu1 %v10467_v49  ;;  %v10253_v9 = vld [vmem:[#allocation2 + $0x4c] ss:$0 sps:$4 sm:$0x88]   ;;  %v4582_v19 = vunpack.c.l.b16 %v10251_v3  ;;  %v10269_v3 = vld [vmem:[#allocation2 + $0x50] ss:$0 sps:$4 sm:$0x11]  }
 0x252   :  { %v10256_v18 = vld [vmem:[#allocation2 + $0xac] ss:$0 sps:$4 sm:$0x88]  }
 0x253   :  { %9593 = vmatmul.mubr.msk.bf16.vlgmr.msra.gmra.mrb[80].mxu0 %vm1217_vm13, %v3920_v39  ;;  %9605 = vmatmul.mubr.msk.bf16.vlgmr.msra.gmra.mrb[80].mxu1 %vm1217_vm13, %v4014_v42  ;;  %v4148_v39 = vpack.c.b16 %v4147_v24, %v4147_v24  ;;  %v4361_v42 = vunpack.c.l.b16 %v10242_v26  ;;  %v4584_v24 = vunpack.c.l.b16 %v10253_v9  ;;  %v4684_v34 = vrot.slane %v4582_v19, 7 }
 0x254   :  { %9609 = vmatpush3.bf16.msra.mxu0 %v10211_v33  ;;  %9621 = vmatpush3.bf16.msra.mxu1 %v10212_v40  ;;  %v4358_v33 = vunpack.c.l.b16 %v11442_v12  ;;  %v4242_v40 = vpack.c.b16 %v4241_v25, %v4241_v25  ;;  %v10254_v12 = vld [vmem:[#allocation2 + $0x6c] ss:$0 sps:$4 sm:$0x88]  }
 0x255   :  { %9610 = vmatprep.subr.bf16.mxu0 %v10467_v49  ;;  %9622 = vmatprep.subr.bf16.mxu1 %v10467_v49  ;;  %v4374_v60 = vrot.slane %v4361_v42, 5  ;;  %v4468_v8 = vrot.slane %v4361_v42, 6  ;;  %v4585_v25 = vunpack.c.l.b16 %v10254_v12  ;;  %v4593_v37 = vrot.slane %v4584_v24, 4 }
 0x256   :  { %9616 = vmatprep.mubr.msk.bf16.mxu0 %vm10468_vm3, %v10467_v49  ;;  %9628 = vmatprep.mubr.msk.bf16.mxu1 %vm10468_vm3, %v10467_v49  ;;  %v4369_v0 = vsel %vm1182_vm9, %v4358_v33, %v4368_v51  ;;  %v4687_v38 = vrot.slane %v4584_v24, 5  ;;  %v4812_v24 = vunpack.c.l.b16 %v10269_v3 }
 0x257   :  { %v4371_v6 = vsel %vm1185_vm10, %v4370_v52, %v4369_v0  ;;  %v4689_v42 = vrot.slane %v4585_v25, 4  ;;  %v4602_v0 = vrot.slane %v4589_v45, 7 }
 0x258   :  { %9611 = vmatpush3.bf16.msra.mxu0 %v10213_v46  ;;  %9623 = vmatpush3.bf16.msra.mxu1 %v10214_v47  ;;  %v4463_v46 = vrot.slane %v4358_v33, 1  ;;  %v10252_v47 = vld [vmem:[#allocation2 + $0x2c] ss:$0 sps:$4 sm:$0x88]   ;;  %v4373_v15 = vsel %vm1188_vm11, %v4372_v59, %v4371_v6  ;;  %v4590_v33 = vrot.slane %v4582_v19, 6 }
 0x259   :  { %9612 = vmatprep.subr.bf16.mxu0 %v10467_v49  ;;  %9624 = vmatprep.subr.bf16.mxu1 %v10467_v49  ;;  %v4583_v13 = vunpack.c.l.b16 %v10252_v47  ;;  %v4375_v21 = vsel %vm1191_vm12, %v4374_v60, %v4373_v15  ;;  %v11536_v47 = vld [vmem:[#allocation2 + $0x30] ss:$0 sps:$4 sm:$0x11]  }
 0x25a   :  { %v4376_v31 = vpack.c.b16 %v4375_v21, %v4375_v21  ;;  %v10270_v15 = vld [vmem:[#allocation2 + $0x70] ss:$0 sps:$4 sm:$0x11]  }
 0x25b   :  { %v4591_v26 = vrot.slane %v4583_v13, 5  ;;  %v10271_v19 = vld [vmem:[#allocation2 + $0x90] ss:$0 sps:$4 sm:$0x11]  }
 0x25c   :  { %9613 = vmatpush3.bf16.msra.mxu0 %v10215_v1  ;;  %9625 = vmatpush3.bf16.msra.mxu1 %v10216_v2  ;;  %v4464_v1 = vsel %vm1182_vm9, %v4463_v46, %v4462_v53  ;;  %v4466_v2 = vrot.slane %v4360_v41, 7  ;;  %v10246_v46 = vld [vmem:[%s12422_s1 + $0x3e8] sm:$0xff]   ;;  %v10249_v53 = vld [vmem:[%s12422_s1 + $0x3d8] sm:$0x1f]  }
 0x25d   :  { %9614 = vmatprep.subr.bf16.mxu0 %v10467_v49  ;;  %9626 = vmatprep.subr.bf16.mxu1 %v10467_v49  ;;  %v4465_v7 = vsel %vm1185_vm10, %v4359_v36, %v4464_v1  ;;  %v4587_v36 = vunpack.c.l.b16 %v10256_v18 }
 0x25e   :  { %v4467_v16 = vsel %vm1188_vm11, %v4466_v2, %v4465_v7  ;;  %v10267_v2 = vld [vmem:[#allocation2 + $0x10] ss:$0 sps:$4 sm:$0x11]  }
 0x25f   :  { %v4469_v22 = vsel %vm1191_vm12, %v4468_v8, %v4467_v16  ;;  %v4693_v58 = vrot.slane %v4587_v36, 2  ;;  %v4811_v16 = vunpack.c.l.b16 %v11536_v47 }
 0x260   :  { %9615 = vmatpush3.bf16.msra.mxu0 %v4176_v17  ;;  %9627 = vmatpush3.bf16.msra.mxu1 %v4270_v23  ;;  %v10255_v17 = vld [vmem:[#allocation2 + $0x8c] ss:$0 sps:$4 sm:$0x88]   ;;  %v4470_v32 = vpack.c.b16 %v4469_v22, %v4469_v22  ;;  %v10272_v22 = vld [vmem:[#allocation2 + $0xb0] ss:$0 sps:$4 sm:$0x11]  }
 0x261   :  { %9632 = vmatprep.subr.bf16.mxu0 %v10467_v49  ;;  %9644 = vmatprep.subr.bf16.mxu1 %v10467_v49  ;;  %v11510_v23 = vld [vmem:[#allocation2 + $0xcc] ss:$0 sps:$4 sm:$0x88]   ;;  %v4586_v35 = vunpack.c.l.b16 %v10255_v17  ;;  %v4632_v17 = vsel %vm1221_vm2, %v10249_v53, 0 }
 0x262   :  { %v4588_v44 = vunpack.c.l.b16 %v11510_v23  ;;  %v4810_v23 = vunpack.c.l.b16 %v10267_v2 }
 0x263   :  { %9617 = vmatmul.mubr.msk.bf16.vlgmr.msra.gmra.mrb[84].mxu0 %vm1217_vm13, %v4148_v39  ;;  %9629 = vmatmul.mubr.msk.bf16.vlgmr.msra.gmra.mrb[84].mxu1 %vm1217_vm13, %v4242_v40  ;;  %v4592_v39 = vsel %vm1173_vm6, %v4591_v26, %v4590_v33  ;;  %v4595_v40 = vrot.slane %v4585_v25, 3  ;;  %v4597_v50 = vrot.slane %v4586_v35, 2  ;;  %v4691_v52 = vrot.slane %v4586_v35, 3 }
 0x264   :  { %9633 = vmatpush3.bf16.msra.mxu0 %v10227_v27  ;;  %9645 = vmatpush3.bf16.msra.mxu1 %v10228_v28  ;;  %v4685_v27 = vrot.slane %v4583_v13, 6  ;;  %v10243_v28 = vld [vmem:[%s12422_s1 + $0x3c0] sm:$0xff]   ;;  %v4695_v1 = vrot.slane %v4588_v44, 1  ;;  %v4814_v33 = vunpack.c.l.b16 %v10271_v19 }
 0x265   :  { %9634 = vmatprep.subr.bf16.mxu0 %v10467_v49  ;;  %9646 = vmatprep.subr.bf16.mxu1 %v10467_v49 }
 0x266   :  { %v1259_v54 = vpop.f32.mrb[32].mxu0  ;;  %v1343_v55 = vpop.f32.mrb[32].mxu1  ;;  %9640 = vmatprep.mubr.msk.bf16.mxu0 %vm10468_vm3, %v10467_v49  ;;  %9652 = vmatprep.mubr.msk.bf16.mxu1 %vm10468_vm3, %v10467_v49  ;;  %v4686_v41 = vsel %vm1173_vm6, %v4685_v27, %v4684_v34  ;;  %v10273_v27 = vld [vmem:[#allocation2 + $0xd0] ss:$0 sps:$4 sm:$0x11]  }
 0x267   :  { %v11496_v61 = vadd.f32 %v1343_v55, %v1259_v54  ;;  %v9306_v62 = vpop.f32.mrb[33].mxu0  ;;  %v9318_v63 = vpop.f32.mrb[33].mxu1  ;;  %v4688_v51 = vsel %vm1176_vm7, %v4687_v38, %v4686_v41  ;;  %v10250_v54 = vld [vmem:[%s12422_s1 + $0x3f8] sm:$0x1f]   ;;  %v4815_v38 = vunpack.c.l.b16 %v10272_v22  ;;  %v4914_v41 = vrot.slane %v4812_v24, 7 }
 0x268   :  { %9635 = vmatpush3.bf16.msra.mxu0 %v10229_v43  ;;  %9647 = vmatpush3.bf16.msra.mxu1 %v10230_v48  ;;  %v1262_v4 = vpop.f32.mrb[34].mxu0  ;;  %v1346_v5 = vpop.f32.mrb[34].mxu1  ;;  %v10245_v43 = vld [vmem:[%s12422_s1 + $0x3c8] sm:$0xff]   ;;  %v4594_v48 = vsel %vm1176_vm7, %v4593_v37, %v4592_v39  ;;  %v10247_v62 = vld [vmem:[%s12422_s1 + $0x3d0] sm:$0xff]   ;;  %v4726_v18 = vsel %vm1221_vm2, %v10250_v54, 0  ;;  %v4912_v37 = vrot.slane %v4810_v23, 1  ;;  %v4816_v47 = vunpack.c.l.b16 %v10273_v27 }
 0x269   :  { %v9307_v10 = vpop.f32.mrb[35].mxu0  ;;  %v9319_v11 = vpop.f32.mrb[35].mxu1  ;;  %9636 = vmatprep.subr.bf16.mxu0 %v10467_v49  ;;  %9648 = vmatprep.subr.bf16.mxu1 %v10467_v49  ;;  %v4596_v55 = vsel %vm1179_vm8, %v4595_v40, %v4594_v48  ;;  %v10248_v63 = vld [vmem:[%s12422_s1 + $0x3f0] sm:$0xff]   ;;  %v4826_v54 = vrot.slane %v4815_v38, 3 }
 0x26a   :  { %v4598_v9 = vsel %vm1182_vm9, %v4597_v50, %v4596_v55  ;;  %v4824_v50 = vrot.slane %v4814_v33, 4  ;;  %v10288_v22 = vld [vmem:[#allocation2 + $0xb0] ss:$0 sps:$4 sm:$0x22]  }
 0x26c   :  { %9637 = vmatpush3.bf16.msra.mxu0 %v10231_v56  ;;  %9649 = vmatpush3.bf16.msra.mxu1 %v10232_v57  ;;  %v4599_v56 = vrot.slane %v4587_v36, 1  ;;  %v4690_v57 = vsel %vm1179_vm8, %v4689_v42, %v4688_v51  ;;  %v4820_v36 = vrot.slane %v4812_v24, 6  ;;  %v10261_v42 = vld [vmem:[%s12422_s1 + $0x408] sm:$0xff]  }
 0x26d   :  { %9638 = vmatprep.subr.bf16.mxu0 %v10467_v49  ;;  %9650 = vmatprep.subr.bf16.mxu1 %v10467_v49  ;;  %v4692_v10 = vsel %vm1182_vm9, %v4691_v52, %v4690_v57  ;;  %v10283_v52 = vld [vmem:[#allocation2 + $0x10] ss:$0 sps:$4 sm:$0x22]  }
 0x26e   :  { %v11601_v57 = vld [vmem:[#allocation2 + $0x50] ss:$0 sps:$4 sm:$0x22]  }
 0x270   :  { %9639 = vmatpush3.bf16.msra.mxu0 %v4404_v14  ;;  %9651 = vmatpush3.bf16.msra.mxu1 %v4498_v20  ;;  %v4694_v14 = vsel %vm1185_vm10, %v4693_v58, %v4692_v10 }
 0x271   :  { %9656 = vmatprep.subr.bf16.mxu0 %v10467_v49  ;;  %9668 = vmatprep.subr.bf16.mxu1 %v10467_v49  ;;  %v4696_v21 = vsel %vm1188_vm11, %v4695_v1, %v4694_v14  ;;  %v11614_v1 = vld [vmem:[#allocation2 + $0x70] ss:$0 sps:$4 sm:$0x22]  }
 0x272   :  { %v4697_v26 = vsel %vm1191_vm12, %v4589_v45, %v4696_v21  ;;  %v10284_v45 = vld [vmem:[#allocation2 + $0x30] ss:$0 sps:$4 sm:$0x22]   ;;  %v5038_v21 = vunpack.c.l.b16 %v10283_v52 }
 0x273   :  { %9641 = vmatmul.mubr.msk.bf16.vlgmr.msra.gmra.mrb[88].mxu0 %vm1217_vm13, %v4376_v31  ;;  %9653 = vmatmul.mubr.msk.bf16.vlgmr.msra.gmra.mrb[88].mxu1 %vm1217_vm13, %v4470_v32  ;;  %v10260_v31 = vld [vmem:[%s12422_s1 + $0x420] sm:$0xff]   ;;  %v10274_v32 = vld [vmem:[#allocation2 + $0xf0] ss:$0 sps:$4 sm:$0x11]   ;;  %v4698_v35 = vpack.c.b16 %v4697_v26, %v4697_v26  ;;  %v5039_v14 = vunpack.c.l.b16 %v10284_v45  ;;  %v5041_v26 = vunpack.c.l.b16 %v11614_v1 }
 0x274   :  { %9657 = vmatpush3.bf16.msra.mxu0 %v10243_v28  ;;  %9669 = vmatpush3.bf16.msra.mxu1 %v10244_v29  ;;  %v4813_v28 = vunpack.c.l.b16 %v10270_v15  ;;  %v4818_v29 = vrot.slane %v4811_v16, 7  ;;  %v4817_v48 = vunpack.c.l.b16 %v10274_v32 }
 0x275   :  { %9658 = vmatprep.subr.bf16.mxu0 %v10467_v49  ;;  %9670 = vmatprep.subr.bf16.mxu1 %v10467_v49  ;;  %v5047_v27 = vrot.slane %v5039_v14, 1 }
 0x276   :  { %v1476_v59 = vpop.f32.mrb[36].mxu0  ;;  %v1570_v60 = vpop.f32.mrb[36].mxu1  ;;  %9664 = vmatprep.mubr.msk.bf16.mxu0 %vm10468_vm3, %v10467_v49  ;;  %9676 = vmatprep.mubr.msk.bf16.mxu1 %vm10468_vm3, %v10467_v49  ;;  %v4819_v39 = vsel %vm1173_vm6, %v4818_v29, %v4810_v23  ;;  %v4822_v40 = vrot.slane %v4813_v28, 5  ;;  %v5040_v23 = vunpack.c.l.b16 %v11601_v57  ;;  %v10281_v57 = vld [vmem:[%s12422_s1 + $0x458] sm:$0x1f]  }
 0x277   :  { %v1482_v4 = vadd.f32 %v1476_v59, %v11496_v61  ;;  %v9330_v5 = vpop.f32.mrb[37].mxu0  ;;  %v9342_v6 = vpop.f32.mrb[37].mxu1  ;;  %v4600_v61 = vsel %vm1185_vm10, %v4599_v56, %v4598_v9  ;;  %v4821_v51 = vsel %vm1176_vm7, %v4820_v36, %v4819_v39  ;;  %v4918_v56 = vrot.slane %v4814_v33, 5 }
 0x278   :  { %v1479_v7 = vpop.f32.mrb[38].mxu0  ;;  %v1573_v8 = vpop.f32.mrb[38].mxu1  ;;  %9659 = vmatpush3.bf16.msra.mxu0 %v10245_v43  ;;  %9671 = vmatpush3.bf16.msra.mxu1 %v10246_v46  ;;  %v4601_v20 = vsel %vm1188_vm11, %v4588_v44, %v4600_v61  ;;  %v4913_v43 = vsel %vm1173_vm6, %v4811_v16, %v4912_v37  ;;  %v4916_v44 = vrot.slane %v4813_v28, 6  ;;  %v10262_v46 = vld [vmem:[%s12422_s1 + $0x428] sm:$0xff]   ;;  %v4823_v53 = vsel %vm1179_vm8, %v4822_v40, %v4821_v51  ;;  %v10265_v5 = vld [vmem:[%s12422_s1 + $0x418] sm:$0x1f]  }
 0x279   :  { %v11563_v11 = vadd.f32 %v1570_v60, %v1482_v4  ;;  %v9331_v12 = vpop.f32.mrb[39].mxu0  ;;  %v9343_v13 = vpop.f32.mrb[39].mxu1  ;;  %9660 = vmatprep.subr.bf16.mxu0 %v10467_v49  ;;  %9672 = vmatprep.subr.bf16.mxu1 %v10467_v49  ;;  %v4603_v25 = vsel %vm1191_vm12, %v4602_v0, %v4601_v20  ;;  %v4915_v55 = vsel %vm1176_vm7, %v4914_v41, %v4913_v43  ;;  %v10263_v60 = vld [vmem:[%s12422_s1 + $0x410] sm:$0xff]   ;;  %v4920_v0 = vrot.slane %v4815_v38, 4  ;;  %v10266_v6 = vld [vmem:[%s12422_s1 + $0x438] sm:$0x1f]  }
 0x27a   :  { %v4604_v34 = vpack.c.b16 %v4603_v25, %v4603_v25  ;;  %v4828_v7 = vrot.slane %v4816_v47, 2  ;;  %v4830_v8 = vrot.slane %v4817_v48, 1  ;;  %v4825_v12 = vsel %vm1182_vm9, %v4824_v50, %v4823_v53  ;;  %v10287_v61 = vld [vmem:[#allocation2 + $0x90] ss:$0 sps:$4 sm:$0x22]   ;;  %v10275_v38 = vld [vmem:[%s12422_s1 + $0x440] sm:$0xff]  }
 0x27b   :  { %v4922_v13 = vrot.slane %v4816_v47, 3  ;;  %v10289_v25 = vld [vmem:[#allocation2 + $0xd0] ss:$0 sps:$4 sm:$0x22]   ;;  %v5141_v28 = vrot.slane %v5039_v14, 2  ;;  %v4860_v29 = vsel %vm1221_vm2, %v10265_v5, 0  ;;  %v5043_v39 = vunpack.c.l.b16 %v10288_v22 }
 0x27c   :  { %9661 = vmatpush3.bf16.msra.mxu0 %v10247_v62  ;;  %9673 = vmatpush3.bf16.msra.mxu1 %v10248_v63  ;;  %v10264_v62 = vld [vmem:[%s12422_s1 + $0x430] sm:$0xff]   ;;  %v4917_v63 = vsel %vm1179_vm8, %v4916_v44, %v4915_v55  ;;  %v5046_v36 = vrot.slane %v5038_v21, 2  ;;  %v5140_v37 = vrot.slane %v5038_v21, 3  ;;  %v5143_v40 = vrot.slane %v5040_v23, 1  ;;  %v10276_v41 = vld [vmem:[%s12422_s1 + $0x460] sm:$0xff]   ;;  %v10278_v50 = vld [vmem:[%s12422_s1 + $0x468] sm:$0xff]  }
 0x27d   :  { %9662 = vmatprep.subr.bf16.mxu0 %v10467_v49  ;;  %9674 = vmatprep.subr.bf16.mxu1 %v10467_v49  ;;  %v4919_v19 = vsel %vm1182_vm9, %v4918_v56, %v4917_v63  ;;  %v5050_v44 = vrot.slane %v5041_v26, 7  ;;  %v10300_v63 = vld [vmem:[#allocation2 + $0x30] ss:$0 sps:$4 sm:$0x44]   ;;  %v5088_v22 = vsel %vm1221_vm2, %v10281_v57, 0 }
 0x27e   :  { %v4921_v20 = vsel %vm1185_vm10, %v4920_v0, %v4919_v19  ;;  %v5048_v43 = vsel %vm1173_vm6, %v5047_v27, %v5046_v36  ;;  %v5142_v45 = vsel %vm1173_vm6, %v5141_v28, %v5140_v37  ;;  %v10302_v19 = vld [vmem:[#allocation2 + $0x70] ss:$0 sps:$4 sm:$0x44]  }
 0x27f   :  { %v4923_v32 = vsel %vm1188_vm11, %v4922_v13, %v4921_v20  ;;  %v5049_v53 = vsel %vm1176_vm7, %v5040_v23, %v5048_v43  ;;  %v5144_v55 = vsel %vm1176_vm7, %v5143_v40, %v5142_v45  ;;  %v11691_v23 = vld [vmem:[#allocation2 + $0xb0] ss:$0 sps:$4 sm:$0x44]   ;;  %v10291_v40 = vld [vmem:[%s12422_s1 + $0x480] sm:$0xff]  }
 0x280   :  { %9663 = vmatpush3.bf16.msra.mxu0 %v4632_v17  ;;  %9675 = vmatpush3.bf16.msra.mxu1 %v4726_v18  ;;  %v4827_v18 = vsel %vm1185_vm10, %v4826_v54, %v4825_v12  ;;  %v5054_v54 = vrot.slane %v5043_v39, 5  ;;  %v10316_v57 = vld [vmem:[#allocation2 + $0x30] ss:$0 sps:$4 sm:$0x88]  }
 0x281   :  { %9680 = vmatprep.subr.bf16.mxu0 %v10467_v49  ;;  %9692 = vmatprep.subr.bf16.mxu1 %v10467_v49  ;;  %v4829_v24 = vsel %vm1188_vm11, %v4828_v7, %v4827_v18  ;;  %v10299_v7 = vld [vmem:[#allocation2 + $0x10] ss:$0 sps:$4 sm:$0x44]  }
 0x283   :  { %9665 = vmatmul.mubr.msk.bf16.vlgmr.msra.gmra.mrb[92].mxu0 %vm1217_vm13, %v4604_v34  ;;  %9677 = vmatmul.mubr.msk.bf16.vlgmr.msra.gmra.mrb[92].mxu1 %vm1217_vm13, %v4698_v35  ;;  %v10290_v34 = vld [vmem:[#allocation2 + $0xf0] ss:$0 sps:$4 sm:$0x22]   ;;  %v5042_v35 = vunpack.c.l.b16 %v10287_v61 }
 0x284   :  { %9681 = vmatpush3.bf16.msra.mxu0 %v10259_v30  ;;  %9693 = vmatpush3.bf16.msra.mxu1 %v10260_v31  ;;  %v4954_v30 = vsel %vm1221_vm2, %v10266_v6, 0  ;;  %v4831_v31 = vsel %vm1191_vm12, %v4830_v8, %v4829_v24  ;;  %v5045_v51 = vunpack.c.l.b16 %v10290_v34  ;;  %v5267_v24 = vunpack.c.l.b16 %v10300_v63  ;;  %v10298_v63 = vld [vmem:[%s12422_s1 + $0x4b8] sm:$0x1f]  }
 0x285   :  { %9682 = vmatprep.subr.bf16.mxu0 %v10467_v49  ;;  %9694 = vmatprep.subr.bf16.mxu1 %v10467_v49  ;;  %v5052_v52 = vrot.slane %v5042_v35, 6  ;;  %v5146_v56 = vrot.slane %v5042_v35, 7  ;;  %v5269_v35 = vunpack.c.l.b16 %v10302_v19 }
 0x286   :  { %v1704_v58 = vpop.f32.mrb[40].mxu0  ;;  %v1798_v59 = vpop.f32.mrb[40].mxu1  ;;  %9688 = vmatprep.mubr.msk.bf16.mxu0 %vm10468_vm3, %v10467_v49  ;;  %9700 = vmatprep.mubr.msk.bf16.mxu1 %vm10468_vm3, %v10467_v49  ;;  %v5058_v5 = vrot.slane %v5045_v51, 3  ;;  %v5152_v18 = vrot.slane %v5045_v51, 4  ;;  %v5275_v36 = vrot.slane %v5267_v24, 3  ;;  %v5369_v37 = vrot.slane %v5267_v24, 4 }
 0x287   :  { %v1710_v2 = vadd.f32 %v1704_v58, %v11563_v11  ;;  %v9354_v3 = vpop.f32.mrb[41].mxu0  ;;  %v9366_v4 = vpop.f32.mrb[41].mxu1  ;;  %v4924_v11 = vrot.slane %v4817_v48, 2  ;;  %v10277_v48 = vld [vmem:[%s12422_s1 + $0x448] sm:$0xff]   ;;  %v5051_v58 = vsel %vm1179_vm8, %v5050_v44, %v5049_v53  ;;  %v5279_v53 = vrot.slane %v5269_v35, 1 }
 0x288   :  { %v1707_v9 = vpop.f32.mrb[42].mxu0  ;;  %v1801_v10 = vpop.f32.mrb[42].mxu1  ;;  %9683 = vmatpush3.bf16.msra.mxu0 %v10261_v42  ;;  %9695 = vmatpush3.bf16.msra.mxu1 %v10262_v46  ;;  %v5044_v42 = vunpack.c.l.b16 %v10289_v25  ;;  %v4832_v46 = vpack.c.b16 %v4831_v31, %v4831_v31  ;;  %v10280_v3 = vld [vmem:[%s12422_s1 + $0x470] sm:$0xff]   ;;  %v10282_v4 = vld [vmem:[%s12422_s1 + $0x478] sm:$0x1f]   ;;  %v5053_v12 = vsel %vm1182_vm9, %v5052_v52, %v5051_v58  ;;  %v5266_v31 = vunpack.c.l.b16 %v10299_v7  ;;  %v10293_v51 = vld [vmem:[%s12422_s1 + $0x488] sm:$0xff]  }
 0x289   :  { %v11624_v15 = vadd.f32 %v1798_v59, %v1710_v2  ;;  %v9355_v16 = vpop.f32.mrb[43].mxu0  ;;  %v9367_v17 = vpop.f32.mrb[43].mxu1  ;;  %9684 = vmatprep.subr.bf16.mxu0 %v10467_v49  ;;  %9696 = vmatprep.subr.bf16.mxu1 %v10467_v49  ;;  %v4925_v33 = vsel %vm1191_vm12, %v4924_v11, %v4923_v32  ;;  %v10279_v2 = vld [vmem:[%s12422_s1 + $0x450] sm:$0xff]   ;;  %v5182_v27 = vsel %vm1221_vm2, %v10282_v4, 0 }
 0x28a   :  { %v4926_v47 = vpack.c.b16 %v4925_v33, %v4925_v33  ;;  %v5056_v59 = vrot.slane %v5044_v42, 4  ;;  %v5150_v6 = vrot.slane %v5044_v42, 5  ;;  %v10301_v11 = vld [vmem:[#allocation2 + $0x50] ss:$0 sps:$4 sm:$0x44]   ;;  %v5055_v16 = vsel %vm1185_vm10, %v5054_v54, %v5053_v12 }
 0x28b   :  { %v11702_v32 = vld [vmem:[#allocation2 + $0x90] ss:$0 sps:$4 sm:$0x44]   ;;  %v5268_v34 = vunpack.c.l.b16 %v10301_v11  ;;  %v5271_v42 = vunpack.c.l.b16 %v11691_v23  ;;  %v5274_v44 = vrot.slane %v5266_v31, 4  ;;  %v5368_v45 = vrot.slane %v5266_v31, 5 }
 0x28c   :  { %9685 = vmatpush3.bf16.msra.mxu0 %v10263_v60  ;;  %9697 = vmatpush3.bf16.msra.mxu1 %v10264_v62  ;;  %v5145_v60 = vsel %vm1179_vm8, %v5041_v26, %v5144_v55  ;;  %v5148_v62 = vrot.slane %v5043_v39, 6  ;;  %v5057_v25 = vsel %vm1188_vm11, %v5056_v59, %v5055_v16  ;;  %v11704_v33 = vld [vmem:[#allocation2 + $0xf0] ss:$0 sps:$4 sm:$0x44]   ;;  %v5373_v55 = vrot.slane %v5269_v35, 2 }
 0x28d   :  { %9686 = vmatprep.subr.bf16.mxu0 %v10467_v49  ;;  %9698 = vmatprep.subr.bf16.mxu1 %v10467_v49  ;;  %v5147_v13 = vsel %vm1182_vm9, %v5146_v56, %v5145_v60  ;;  %v5059_v28 = vsel %vm1191_vm12, %v5058_v5, %v5057_v25  ;;  %v5276_v52 = vsel %vm1173_vm6, %v5275_v36, %v5274_v44  ;;  %v10294_v56 = vld [vmem:[%s12422_s1 + $0x4a8] sm:$0xff]   ;;  %v5282_v58 = vrot.slane %v5271_v42, 7  ;;  %v10315_v60 = vld [vmem:[#allocation2 + $0x10] ss:$0 sps:$4 sm:$0x88]  }
 0x28e   :  { %v5149_v17 = vsel %vm1185_vm10, %v5148_v62, %v5147_v13  ;;  %v5370_v54 = vsel %vm1173_vm6, %v5369_v37, %v5368_v45  ;;  %v10297_v62 = vld [vmem:[%s12422_s1 + $0x498] sm:$0x1f]   ;;  %v10317_v4 = vld [vmem:[#allocation2 + $0x50] ss:$0 sps:$4 sm:$0x88]   ;;  %v10307_v45 = vld [vmem:[%s12422_s1 + $0x4c0] sm:$0xff]  }
 0x28f   :  { %v5151_v26 = vsel %vm1188_vm11, %v5150_v6, %v5149_v17  ;;  %v10295_v7 = vld [vmem:[%s12422_s1 + $0x490] sm:$0xff]   ;;  %v5495_v17 = vunpack.c.l.b16 %v10316_v57  ;;  %v5496_v31 = vunpack.c.l.b16 %v10317_v4  ;;  %v10310_v57 = vld [vmem:[%s12422_s1 + $0x4e8] sm:$0xff]  }
 0x290   :  { %9687 = vmatpush3.bf16.msra.mxu0 %v4860_v29  ;;  %9699 = vmatpush3.bf16.msra.mxu1 %v4954_v30  ;;  %v5153_v29 = vsel %vm1191_vm12, %v5152_v18, %v5151_v26  ;;  %v11698_v30 = vld [vmem:[#allocation2 + $0xd0] ss:$0 sps:$4 sm:$0x44]  }
 0x291   :  { %9704 = vmatprep.subr.bf16.mxu0 %v10467_v49  ;;  %9716 = vmatprep.subr.bf16.mxu1 %v10467_v49  ;;  %v5154_v39 = vpack.c.b16 %v5153_v29, %v5153_v29  ;;  %v5272_v43 = vunpack.c.l.b16 %v11698_v30  ;;  %v10318_v12 = vld [vmem:[#allocation2 + $0x70] ss:$0 sps:$4 sm:$0x88]   ;;  %v5316_v29 = vsel %vm1221_vm2, %v10297_v62, 0  ;;  %v5410_v30 = vsel %vm1221_vm2, %v10298_v63, 0 }
 0x292   :  { %v10319_v23 = vld [vmem:[#allocation2 + $0x90] ss:$0 sps:$4 sm:$0x88]  }
 0x293   :  { %9689 = vmatmul.mubr.msk.bf16.vlgmr.msra.gmra.mrb[96].mxu0 %vm1217_vm13, %v4832_v46  ;;  %9701 = vmatmul.mubr.msk.bf16.vlgmr.msra.gmra.mrb[96].mxu1 %vm1217_vm13, %v4926_v47  ;;  %v5270_v46 = vunpack.c.l.b16 %v11702_v32  ;;  %v5273_v47 = vunpack.c.l.b16 %v11704_v33  ;;  %v5284_v59 = vrot.slane %v5272_v43, 6  ;;  %v5497_v32 = vunpack.c.l.b16 %v10318_v12  ;;  %v10331_v12 = vld [vmem:[#allocation2 + $0x14] ss:$0 sps:$4 sm:$0x11]  }
 0x294   :  { %9705 = vmatpush3.bf16.msra.mxu0 %v10275_v38  ;;  %9717 = vmatpush3.bf16.msra.mxu1 %v10276_v41  ;;  %v5060_v38 = vpack.c.b16 %v5059_v28, %v5059_v28  ;;  %v10292_v41 = vld [vmem:[%s12422_s1 + $0x4a0] sm:$0xff]   ;;  %v5494_v28 = vunpack.c.l.b16 %v10315_v60  ;;  %v5503_v33 = vrot.slane %v5495_v17, 5 }
 0x295   :  { %9706 = vmatprep.subr.bf16.mxu0 %v10467_v49  ;;  %9718 = vmatprep.subr.bf16.mxu1 %v10467_v49  ;;  %v5380_v26 = vrot.slane %v5273_v47, 6 }
 0x296   :  { %v1932_v0 = vpop.f32.mrb[44].mxu0  ;;  %v2026_v1 = vpop.f32.mrb[44].mxu1  ;;  %9712 = vmatprep.mubr.msk.bf16.mxu0 %vm10468_vm3, %v10467_v49  ;;  %9724 = vmatprep.mubr.msk.bf16.mxu1 %vm10468_vm3, %v10467_v49  ;;  %v5596_v44 = vrot.slane %v5494_v28, 7 }
 0x297   :  { %v1938_v8 = vadd.f32 %v1932_v0, %v11624_v15  ;;  %v9378_v9 = vpop.f32.mrb[45].mxu0  ;;  %v9390_v10 = vpop.f32.mrb[45].mxu1 }
 0x298   :  { %v1935_v61 = vpop.f32.mrb[46].mxu0  ;;  %v2029_v14 = vpop.f32.mrb[46].mxu1  ;;  %9707 = vmatpush3.bf16.msra.mxu0 %v10277_v48  ;;  %9719 = vmatpush3.bf16.msra.mxu1 %v10278_v50  ;;  %v5277_v48 = vrot.slane %v5268_v34, 2  ;;  %v5371_v50 = vrot.slane %v5268_v34, 3  ;;  %v5597_v34 = vrot.slane %v5495_v17, 6 }
 0x299   :  { %v11686_v20 = vadd.f32 %v2026_v1, %v1938_v8  ;;  %v9379_v15 = vpop.f32.mrb[47].mxu0  ;;  %v9391_v21 = vpop.f32.mrb[47].mxu1  ;;  %9708 = vmatprep.subr.bf16.mxu0 %v10467_v49  ;;  %9720 = vmatprep.subr.bf16.mxu1 %v10467_v49  ;;  %v5286_v1 = vrot.slane %v5273_v47, 5  ;;  %v10296_v8 = vld [vmem:[%s12422_s1 + $0x4b0] sm:$0xff]  }
 0x29a   :  { %v5278_v0 = vsel %vm1176_vm7, %v5277_v48, %v5276_v52 }
 0x29b   :  { %v5280_v9 = vsel %vm1179_vm8, %v5279_v53, %v5278_v0 }
 0x29c   :  { %9709 = vmatpush3.bf16.msra.mxu0 %v10279_v2  ;;  %9721 = vmatpush3.bf16.msra.mxu1 %v10280_v3  ;;  %v5372_v2 = vsel %vm1176_vm7, %v5371_v50, %v5370_v54  ;;  %v5375_v3 = vrot.slane %v5270_v46, 1  ;;  %v5281_v21 = vsel %vm1182_vm9, %v5270_v46, %v5280_v9  ;;  %v10308_v46 = vld [vmem:[%s12422_s1 + $0x4e0] sm:$0xff]   ;;  %v5507_v50 = vrot.slane %v5497_v32, 3  ;;  %v10311_v9 = vld [vmem:[%s12422_s1 + $0x4d0] sm:$0xff]  }
 0x29d   :  { %9710 = vmatprep.subr.bf16.mxu0 %v10467_v49  ;;  %9722 = vmatprep.subr.bf16.mxu1 %v10467_v49  ;;  %v5374_v10 = vsel %vm1179_vm8, %v5373_v55, %v5372_v2  ;;  %v5283_v24 = vsel %vm1185_vm10, %v5282_v58, %v5281_v21  ;;  %v5598_v54 = vsel %vm1173_vm6, %v5597_v34, %v5596_v44  ;;  %v5601_v55 = vrot.slane %v5497_v32, 4  ;;  %v10336_v32 = vld [vmem:[#allocation2 + $0xb4] ss:$0 sps:$4 sm:$0x11]  }
 0x29e   :  { %v5285_v35 = vsel %vm1188_vm11, %v5284_v59, %v5283_v24 }
 0x29f   :  { %v5287_v37 = vsel %vm1191_vm12, %v5286_v1, %v5285_v35  ;;  %v5722_v35 = vunpack.c.l.b16 %v10331_v12 }
 0x2a0   :  { %9711 = vmatpush3.bf16.msra.mxu0 %v5088_v22  ;;  %9723 = vmatpush3.bf16.msra.mxu1 %v5182_v27  ;;  %v5376_v22 = vsel %vm1182_vm9, %v5375_v3, %v5374_v10  ;;  %v10320_v27 = vld [vmem:[#allocation2 + $0xb0] ss:$0 sps:$4 sm:$0x88]   ;;  %v5288_v52 = vpack.c.b16 %v5287_v37, %v5287_v37  ;;  %v10313_v3 = vld [vmem:[%s12422_s1 + $0x4d8] sm:$0x1f]  }
 0x2a1   :  { %9728 = vmatprep.subr.bf16.mxu0 %v10467_v49  ;;  %9740 = vmatprep.subr.bf16.mxu1 %v10467_v49  ;;  %v5377_v25 = vsel %vm1185_vm10, %v5271_v42, %v5376_v22  ;;  %v5498_v42 = vunpack.c.l.b16 %v10319_v23  ;;  %v5499_v47 = vunpack.c.l.b16 %v10320_v27  ;;  %v10312_v10 = vld [vmem:[%s12422_s1 + $0x4f0] sm:$0xff]  }
 0x2a3   :  { %9713 = vmatmul.mubr.msk.bf16.vlgmr.msra.gmra.mrb[100].mxu0 %vm1217_vm13, %v5060_v38  ;;  %9725 = vmatmul.mubr.msk.bf16.vlgmr.msra.gmra.mrb[100].mxu1 %vm1217_vm13, %v5154_v39  ;;  %v11767_v39 = vld [vmem:[#allocation2 + $0xd0] ss:$0 sps:$4 sm:$0x88]   ;;  %v5509_v62 = vrot.slane %v5498_v42, 2  ;;  %v5511_v0 = vrot.slane %v5499_v47, 1  ;;  %v5603_v2 = vrot.slane %v5498_v42, 3 }
 0x2a4   :  { %9729 = vmatpush3.bf16.msra.mxu0 %v10291_v40  ;;  %9741 = vmatpush3.bf16.msra.mxu1 %v10292_v41  ;;  %v5502_v40 = vrot.slane %v5494_v28, 6  ;;  %v11769_v41 = vld [vmem:[#allocation2 + $0xf0] ss:$0 sps:$4 sm:$0x88]   ;;  %v5500_v58 = vunpack.c.l.b16 %v11767_v39  ;;  %v10323_v42 = vld [vmem:[%s12422_s1 + $0x500] sm:$0xff]  }
 0x2a5   :  { %9730 = vmatprep.subr.bf16.mxu0 %v10467_v49  ;;  %9742 = vmatprep.subr.bf16.mxu1 %v10467_v49  ;;  %v5501_v59 = vunpack.c.l.b16 %v11769_v41  ;;  %v10337_v39 = vld [vmem:[#allocation2 + $0xd4] ss:$0 sps:$4 sm:$0x11]  }
 0x2a6   :  { %v2160_v5 = vpop.f32.mrb[48].mxu0  ;;  %v2254_v6 = vpop.f32.mrb[48].mxu1  ;;  %9736 = vmatprep.mubr.msk.bf16.mxu0 %vm10468_vm3, %v10467_v49  ;;  %9748 = vmatprep.mubr.msk.bf16.mxu1 %vm10468_vm3, %v10467_v49  ;;  %v5504_v48 = vsel %vm1173_vm6, %v5503_v33, %v5502_v40  ;;  %v5607_v24 = vrot.slane %v5500_v58, 1 }
 0x2a7   :  { %v2166_v13 = vadd.f32 %v2160_v5, %v11686_v20  ;;  %v9402_v11 = vpop.f32.mrb[49].mxu0  ;;  %v9414_v61 = vpop.f32.mrb[49].mxu1  ;;  %v5378_v20 = vrot.slane %v5272_v43, 7  ;;  %v5505_v43 = vrot.slane %v5496_v31, 4  ;;  %v5605_v5 = vrot.slane %v5499_v47, 2 }
 0x2a8   :  { %v2163_v14 = vpop.f32.mrb[50].mxu0  ;;  %v2257_v16 = vpop.f32.mrb[50].mxu1  ;;  %9731 = vmatpush3.bf16.msra.mxu0 %v10293_v51  ;;  %9743 = vmatpush3.bf16.msra.mxu1 %v10294_v56  ;;  %v5599_v51 = vrot.slane %v5496_v31, 5  ;;  %v10309_v56 = vld [vmem:[%s12422_s1 + $0x4c8] sm:$0xff]  }
 0x2a9   :  { %v11751_v18 = vadd.f32 %v2254_v6, %v2166_v13  ;;  %v9403_v19 = vpop.f32.mrb[51].mxu0  ;;  %v9415_v15 = vpop.f32.mrb[51].mxu1  ;;  %9732 = vmatprep.subr.bf16.mxu0 %v10467_v49  ;;  %9744 = vmatprep.subr.bf16.mxu1 %v10467_v49  ;;  %v5379_v36 = vsel %vm1188_vm11, %v5378_v20, %v5377_v25  ;;  %v5506_v60 = vsel %vm1176_vm7, %v5505_v43, %v5504_v48  ;;  %v11800_v6 = vld [vmem:[#allocation2 + $0x34] ss:$0 sps:$4 sm:$0x11]   ;;  %v5514_v20 = vrot.slane %v5501_v59, 7 }
 0x2aa   :  { %v5381_v38 = vsel %vm1191_vm12, %v5380_v26, %v5379_v36  ;;  %v5508_v63 = vsel %vm1179_vm8, %v5507_v50, %v5506_v60  ;;  %v5600_v1 = vsel %vm1176_vm7, %v5599_v51, %v5598_v54  ;;  %v10333_v13 = vld [vmem:[#allocation2 + $0x54] ss:$0 sps:$4 sm:$0x11]   ;;  %v10314_v16 = vld [vmem:[%s12422_s1 + $0x4f8] sm:$0x1f]   ;;  %v5723_v28 = vunpack.c.l.b16 %v11800_v6  ;;  %v10326_v60 = vld [vmem:[%s12422_s1 + $0x528] sm:$0xff]  }
 0x2ab   :  { %v5382_v53 = vpack.c.b16 %v5381_v38, %v5381_v38  ;;  %v5602_v4 = vsel %vm1179_vm8, %v5601_v55, %v5600_v1  ;;  %v5510_v17 = vsel %vm1182_vm9, %v5509_v62, %v5508_v63  ;;  %v10334_v19 = vld [vmem:[#allocation2 + $0x74] ss:$0 sps:$4 sm:$0x11]   ;;  %v5724_v36 = vunpack.c.l.b16 %v10333_v13  ;;  %v10329_v1 = vld [vmem:[%s12422_s1 + $0x518] sm:$0x1f]  }
 0x2ac   :  { %9733 = vmatpush3.bf16.msra.mxu0 %v10295_v7  ;;  %9745 = vmatpush3.bf16.msra.mxu1 %v10296_v8  ;;  %v5512_v22 = vsel %vm1185_vm10, %v5511_v0, %v5510_v17  ;;  %v5604_v23 = vsel %vm1182_vm9, %v5603_v2, %v5602_v4  ;;  %v5638_v37 = vsel %vm1221_vm2, %v10314_v16, 0  ;;  %v5725_v40 = vunpack.c.l.b16 %v10334_v19  ;;  %v10347_v6 = vld [vmem:[#allocation2 + $0x14] ss:$0 sps:$4 sm:$0x22]  }
 0x2ad   :  { %9734 = vmatprep.subr.bf16.mxu0 %v10467_v49  ;;  %9746 = vmatprep.subr.bf16.mxu1 %v10467_v49  ;;  %v5606_v27 = vsel %vm1185_vm10, %v5605_v5, %v5604_v23  ;;  %v5513_v31 = vsel %vm1188_vm11, %v5500_v58, %v5512_v22  ;;  %v5730_v41 = vrot.slane %v5723_v28, 7  ;;  %v5732_v48 = vrot.slane %v5724_v36, 6  ;;  %v10328_v19 = vld [vmem:[%s12422_s1 + $0x530] sm:$0xff]  }
 0x2ae   :  { %v5515_v33 = vsel %vm1191_vm12, %v5514_v20, %v5513_v31  ;;  %v5608_v34 = vsel %vm1188_vm11, %v5607_v24, %v5606_v27  ;;  %v5824_v50 = vrot.slane %v5722_v35, 1  ;;  %v5727_v51 = vunpack.c.l.b16 %v10336_v32 }
 0x2af   :  { %v5609_v38 = vsel %vm1191_vm12, %v5501_v59, %v5608_v34  ;;  %v5516_v43 = vpack.c.b16 %v5515_v33, %v5515_v33  ;;  %v5826_v54 = vrot.slane %v5724_v36, 7  ;;  %v5728_v58 = vunpack.c.l.b16 %v10337_v39  ;;  %v11850_v59 = vld [vmem:[#allocation2 + $0x34] ss:$0 sps:$4 sm:$0x22]  }
 0x2b0   :  { %9735 = vmatpush3.bf16.msra.mxu0 %v5316_v29  ;;  %9747 = vmatpush3.bf16.msra.mxu1 %v5410_v30  ;;  %v10335_v29 = vld [vmem:[#allocation2 + $0x94] ss:$0 sps:$4 sm:$0x11]   ;;  %v5544_v30 = vsel %vm1221_vm2, %v10313_v3, 0  ;;  %v5610_v44 = vpack.c.b16 %v5609_v38, %v5609_v38  ;;  %v5825_v55 = vsel %vm1173_vm6, %v5723_v28, %v5824_v50  ;;  %v5738_v3 = vrot.slane %v5727_v51, 3 }
 0x2b1   :  { %9752 = vmatprep.subr.bf16.mxu0 %v10467_v49  ;;  %9764 = vmatprep.subr.bf16.mxu1 %v10467_v49  ;;  %v5726_v47 = vunpack.c.l.b16 %v10335_v29  ;;  %v5827_v4 = vsel %vm1176_vm7, %v5826_v54, %v5825_v55  ;;  %v5832_v13 = vrot.slane %v5727_v51, 4  ;;  %v5834_v24 = vrot.slane %v5728_v58, 3  ;;  %v10351_v29 = vld [vmem:[#allocation2 + $0x94] ss:$0 sps:$4 sm:$0x22]  }
 0x2b2   :  { %v5951_v31 = vunpack.c.l.b16 %v11850_v59  ;;  %v5772_v34 = vsel %vm1221_vm2, %v10329_v1, 0  ;;  %v5954_v50 = vunpack.c.l.b16 %v10351_v29  ;;  %v11920_v1 = vld [vmem:[#allocation2 + $0x34] ss:$0 sps:$4 sm:$0x44]  }
 0x2b3   :  { %9737 = vmatmul.mubr.msk.bf16.vlgmr.msra.gmra.mrb[104].mxu0 %vm1217_vm13, %v5288_v52  ;;  %9749 = vmatmul.mubr.msk.bf16.vlgmr.msra.gmra.mrb[104].mxu1 %vm1217_vm13, %v5382_v53  ;;  %v5731_v52 = vsel %vm1173_vm6, %v5730_v41, %v5722_v35  ;;  %v5734_v53 = vrot.slane %v5725_v40, 5  ;;  %v5736_v0 = vrot.slane %v5726_v47, 4  ;;  %v5830_v5 = vrot.slane %v5726_v47, 5  ;;  %v10339_v47 = vld [vmem:[%s12422_s1 + $0x540] sm:$0xff]  }
 0x2b4   :  { %9753 = vmatpush3.bf16.msra.mxu0 %v10307_v45  ;;  %9765 = vmatpush3.bf16.msra.mxu1 %v10308_v46  ;;  %v10324_v45 = vld [vmem:[%s12422_s1 + $0x520] sm:$0xff]   ;;  %v11839_v46 = vld [vmem:[#allocation2 + $0xf4] ss:$0 sps:$4 sm:$0x11]   ;;  %v5733_v63 = vsel %vm1176_vm7, %v5732_v48, %v5731_v52  ;;  %v5950_v35 = vunpack.c.l.b16 %v10347_v6 }
 0x2b5   :  { %9754 = vmatprep.subr.bf16.mxu0 %v10467_v49  ;;  %9766 = vmatprep.subr.bf16.mxu1 %v10467_v49  ;;  %v5729_v62 = vunpack.c.l.b16 %v11839_v46  ;;  %v5735_v2 = vsel %vm1179_vm8, %v5734_v53, %v5733_v63  ;;  %v10340_v48 = vld [vmem:[%s12422_s1 + $0x560] sm:$0xff]   ;;  %v5964_v63 = vrot.slane %v5954_v50, 6  ;;  %v10366_v29 = vld [vmem:[#allocation2 + $0x74] ss:$0 sps:$4 sm:$0x44]  }
 0x2b6   :  { %v2388_v7 = vpop.f32.mrb[52].mxu0  ;;  %v2482_v8 = vpop.f32.mrb[52].mxu1  ;;  %9760 = vmatprep.mubr.msk.bf16.mxu0 %vm10468_vm3, %v10467_v49  ;;  %9772 = vmatprep.mubr.msk.bf16.mxu1 %vm10468_vm3, %v10467_v49  ;;  %v5737_v20 = vsel %vm1182_vm9, %v5736_v0, %v5735_v2  ;;  %v5958_v52 = vrot.slane %v5950_v35, 2  ;;  %v6052_v53 = vrot.slane %v5950_v35, 3  ;;  %v10341_v2 = vld [vmem:[%s12422_s1 + $0x548] sm:$0xff]  }
 0x2b7   :  { %v2394_v11 = vadd.f32 %v2388_v7, %v11751_v18  ;;  %v9426_v61 = vpop.f32.mrb[53].mxu0  ;;  %v9438_v14 = vpop.f32.mrb[53].mxu1  ;;  %v5742_v23 = vrot.slane %v5729_v62, 1  ;;  %v5836_v33 = vrot.slane %v5729_v62, 2 }
 0x2b8   :  { %v2391_v15 = vpop.f32.mrb[54].mxu0  ;;  %v2485_v21 = vpop.f32.mrb[54].mxu1  ;;  %9755 = vmatpush3.bf16.msra.mxu0 %v10309_v56  ;;  %9767 = vmatpush3.bf16.msra.mxu1 %v10310_v57  ;;  %v5828_v56 = vrot.slane %v5725_v40, 6  ;;  %v10325_v57 = vld [vmem:[%s12422_s1 + $0x508] sm:$0xff]  }
 0x2b9   :  { %v11819_v18 = vadd.f32 %v2482_v8, %v2394_v11  ;;  %v9427_v25 = vpop.f32.mrb[55].mxu0  ;;  %v9439_v26 = vpop.f32.mrb[55].mxu1  ;;  %9756 = vmatprep.subr.bf16.mxu0 %v10467_v49  ;;  %9768 = vmatprep.subr.bf16.mxu1 %v10467_v49  ;;  %v11875_v11 = vld [vmem:[#allocation2 + $0x54] ss:$0 sps:$4 sm:$0x22]   ;;  %v5740_v15 = vrot.slane %v5728_v58, 2 }
 0x2ba   :  { %v5829_v12 = vsel %vm1179_vm8, %v5828_v56, %v5827_v4  ;;  %v11877_v61 = vld [vmem:[#allocation2 + $0x74] ss:$0 sps:$4 sm:$0x22]   ;;  %v5952_v38 = vunpack.c.l.b16 %v11875_v11  ;;  %v10345_v4 = vld [vmem:[%s12422_s1 + $0x558] sm:$0x1f]  }
 0x2bb   :  { %v5831_v28 = vsel %vm1182_vm9, %v5830_v5, %v5829_v12  ;;  %v5953_v39 = vunpack.c.l.b16 %v11877_v61  ;;  %v10363_v12 = vld [vmem:[#allocation2 + $0x14] ss:$0 sps:$4 sm:$0x44]   ;;  %v6000_v35 = vsel %vm1221_vm2, %v10345_v4, 0  ;;  %v10361_v4 = vld [vmem:[%s12422_s1 + $0x598] sm:$0x1f]  }
 0x2bc   :  { %9757 = vmatpush3.bf16.msra.mxu0 %v10311_v9  ;;  %9769 = vmatpush3.bf16.msra.mxu1 %v10312_v10  ;;  %v10327_v9 = vld [vmem:[%s12422_s1 + $0x510] sm:$0xff]   ;;  %v10330_v10 = vld [vmem:[%s12422_s1 + $0x538] sm:$0x1f]   ;;  %v5833_v32 = vsel %vm1185_vm10, %v5832_v13, %v5831_v28  ;;  %v6055_v56 = vrot.slane %v5952_v38, 1 }
 0x2bd   :  { %9758 = vmatprep.subr.bf16.mxu0 %v10467_v49  ;;  %9770 = vmatprep.subr.bf16.mxu1 %v10467_v49  ;;  %v5866_v36 = vsel %vm1221_vm2, %v10330_v10, 0  ;;  %v5835_v41 = vsel %vm1188_vm11, %v5834_v24, %v5833_v32  ;;  %v5962_v55 = vrot.slane %v5953_v39, 7  ;;  %v11937_v13 = vld [vmem:[#allocation2 + $0x54] ss:$0 sps:$4 sm:$0x44]  }
 0x2be   :  { %v5837_v46 = vsel %vm1191_vm12, %v5836_v33, %v5835_v41 }
 0x2c0   :  { %9759 = vmatpush3.bf16.msra.mxu0 %v5544_v30  ;;  %9771 = vmatpush3.bf16.msra.mxu1 %v5638_v37  ;;  %v10352_v30 = vld [vmem:[#allocation2 + $0xb4] ss:$0 sps:$4 sm:$0x22]  }
 0x2c1   :  { %9776 = vmatprep.subr.bf16.mxu0 %v10467_v49  ;;  %9788 = vmatprep.subr.bf16.mxu1 %v10467_v49  ;;  %v5955_v51 = vunpack.c.l.b16 %v10352_v30 }
 0x2c3   :  { %9761 = vmatmul.mubr.msk.bf16.vlgmr.msra.gmra.mrb[108].mxu0 %vm1217_vm13, %v5516_v43  ;;  %9773 = vmatmul.mubr.msk.bf16.vlgmr.msra.gmra.mrb[108].mxu1 %vm1217_vm13, %v5610_v44  ;;  %v11903_v43 = vld [vmem:[#allocation2 + $0xf4] ss:$0 sps:$4 sm:$0x22]   ;;  %v5959_v44 = vrot.slane %v5951_v31, 1  ;;  %v5966_v0 = vrot.slane %v5955_v51, 5 }
 0x2c4   :  { %9777 = vmatpush3.bf16.msra.mxu0 %v10323_v42  ;;  %9789 = vmatpush3.bf16.msra.mxu1 %v10324_v45  ;;  %v11901_v42 = vld [vmem:[#allocation2 + $0xd4] ss:$0 sps:$4 sm:$0x22]   ;;  %v6053_v45 = vrot.slane %v5951_v31, 2  ;;  %v5957_v62 = vunpack.c.l.b16 %v11903_v43 }
 0x2c5   :  { %9778 = vmatprep.subr.bf16.mxu0 %v10467_v49  ;;  %9790 = vmatprep.subr.bf16.mxu1 %v10467_v49  ;;  %v5960_v58 = vsel %vm1173_vm6, %v5959_v44, %v5958_v52  ;;  %v11969_v43 = vld [vmem:[#allocation2 + $0xb4] ss:$0 sps:$4 sm:$0x44]   ;;  %v6181_v44 = vunpack.c.l.b16 %v10366_v29 }
 0x2c6   :  { %v2616_v7 = vpop.f32.mrb[56].mxu0  ;;  %v2710_v8 = vpop.f32.mrb[56].mxu1  ;;  %9784 = vmatprep.mubr.msk.bf16.mxu0 %vm10468_vm3, %v10467_v49  ;;  %9796 = vmatprep.mubr.msk.bf16.mxu1 %vm10468_vm3, %v10467_v49  ;;  %v6054_v59 = vsel %vm1173_vm6, %v6053_v45, %v6052_v53  ;;  %v5961_v5 = vsel %vm1176_vm7, %v5952_v38, %v5960_v58  ;;  %v6178_v38 = vunpack.c.l.b16 %v10363_v12 }
 0x2c7   :  { %v2622_v14 = vadd.f32 %v2616_v7, %v11819_v18  ;;  %v9450_v16 = vpop.f32.mrb[57].mxu0  ;;  %v9462_v17 = vpop.f32.mrb[57].mxu1  ;;  %v5739_v18 = vsel %vm1185_vm10, %v5738_v3, %v5737_v20  ;;  %v10342_v3 = vld [vmem:[%s12422_s1 + $0x568] sm:$0xff]   ;;  %v6056_v6 = vsel %vm1176_vm7, %v6055_v56, %v6054_v59  ;;  %v6058_v7 = vrot.slane %v5954_v50, 7 }
 0x2c8   :  { %v2619_v21 = vpop.f32.mrb[58].mxu0  ;;  %v2713_v22 = vpop.f32.mrb[58].mxu1  ;;  %9779 = vmatpush3.bf16.msra.mxu0 %v10325_v57  ;;  %9791 = vmatpush3.bf16.msra.mxu1 %v10326_v60  ;;  %v5741_v37 = vsel %vm1188_vm11, %v5740_v15, %v5739_v18  ;;  %v5838_v57 = vpack.c.b16 %v5837_v46, %v5837_v46  ;;  %v5956_v60 = vunpack.c.l.b16 %v11901_v42  ;;  %v6057_v10 = vsel %vm1179_vm8, %v5953_v39, %v6056_v6  ;;  %v10344_v16 = vld [vmem:[%s12422_s1 + $0x570] sm:$0xff]   ;;  %v10346_v17 = vld [vmem:[%s12422_s1 + $0x578] sm:$0x1f]  }
 0x2c9   :  { %v11884_v25 = vadd.f32 %v2710_v8, %v2622_v14  ;;  %v9451_v26 = vpop.f32.mrb[59].mxu0  ;;  %v9463_v27 = vpop.f32.mrb[59].mxu1  ;;  %9780 = vmatprep.subr.bf16.mxu0 %v10467_v49  ;;  %9792 = vmatprep.subr.bf16.mxu1 %v10467_v49  ;;  %v5743_v40 = vsel %vm1191_vm12, %v5742_v23, %v5741_v37  ;;  %v6060_v8 = vrot.slane %v5955_v51, 6  ;;  %v10343_v14 = vld [vmem:[%s12422_s1 + $0x550] sm:$0xff]   ;;  %v5970_v20 = vrot.slane %v5957_v62, 3 }
 0x2ca   :  { %v5744_v54 = vpack.c.b16 %v5743_v40, %v5743_v40  ;;  %v5968_v22 = vrot.slane %v5956_v60, 4  ;;  %v6179_v23 = vunpack.c.l.b16 %v11920_v1  ;;  %v6059_v18 = vsel %vm1182_vm9, %v6058_v7, %v6057_v10  ;;  %v11964_v37 = vld [vmem:[#allocation2 + $0x94] ss:$0 sps:$4 sm:$0x44]  }
 0x2cb   :  { %v6062_v28 = vrot.slane %v5956_v60, 5  ;;  %v6061_v33 = vsel %vm1185_vm10, %v6060_v8, %v6059_v18  ;;  %v6180_v39 = vunpack.c.l.b16 %v11937_v13  ;;  %v11981_v50 = vld [vmem:[#allocation2 + $0xd4] ss:$0 sps:$4 sm:$0x44]   ;;  %v6186_v52 = vrot.slane %v6178_v38, 4 }
 0x2cc   :  { %9781 = vmatpush3.bf16.msra.mxu0 %v10327_v9  ;;  %9793 = vmatpush3.bf16.msra.mxu1 %v10328_v19  ;;  %v5963_v9 = vsel %vm1179_vm8, %v5962_v55, %v5961_v5  ;;  %v6187_v40 = vrot.slane %v6179_v23, 3  ;;  %v6281_v51 = vrot.slane %v6179_v23, 4  ;;  %v11983_v56 = vld [vmem:[#allocation2 + $0xf4] ss:$0 sps:$4 sm:$0x44]   ;;  %v6280_v58 = vrot.slane %v6178_v38, 5 }
 0x2cd   :  { %9782 = vmatprep.subr.bf16.mxu0 %v10467_v49  ;;  %9794 = vmatprep.subr.bf16.mxu1 %v10467_v49  ;;  %v5965_v27 = vsel %vm1182_vm9, %v5964_v63, %v5963_v9  ;;  %v6063_v42 = vsel %vm1188_vm11, %v6062_v28, %v6061_v33  ;;  %v6189_v53 = vrot.slane %v6180_v39, 2  ;;  %v6182_v59 = vunpack.c.l.b16 %v11964_v37  ;;  %v10379_v7 = vld [vmem:[#allocation2 + $0x14] ss:$0 sps:$4 sm:$0x88]  }
 0x2ce   :  { %v5967_v32 = vsel %vm1185_vm10, %v5966_v0, %v5965_v27  ;;  %v6188_v60 = vsel %vm1173_vm6, %v6187_v40, %v6186_v52  ;;  %v6285_v63 = vrot.slane %v6181_v44, 2  ;;  %v10357_v0 = vld [vmem:[%s12422_s1 + $0x588] sm:$0xff]   ;;  %v6183_v1 = vunpack.c.l.b16 %v11969_v43  ;;  %v10380_v8 = vld [vmem:[#allocation2 + $0x34] ss:$0 sps:$4 sm:$0x88]  }
 0x2cf   :  { %v5969_v41 = vsel %vm1188_vm11, %v5968_v22, %v5967_v32  ;;  %v6184_v5 = vunpack.c.l.b16 %v11981_v50  ;;  %v6190_v6 = vsel %vm1176_vm7, %v6189_v53, %v6188_v60  ;;  %v6287_v12 = vrot.slane %v6182_v59, 1  ;;  %v12008_v13 = vld [vmem:[#allocation2 + $0x54] ss:$0 sps:$4 sm:$0x88]  }
 0x2d0   :  { %9783 = vmatpush3.bf16.msra.mxu0 %v5772_v34  ;;  %9795 = vmatpush3.bf16.msra.mxu1 %v5866_v36  ;;  %v6064_v34 = vrot.slane %v5957_v62, 4  ;;  %v6094_v36 = vsel %vm1221_vm2, %v10346_v17, 0  ;;  %v5971_v45 = vsel %vm1191_vm12, %v5970_v20, %v5969_v41  ;;  %v6283_v62 = vrot.slane %v6180_v39, 3  ;;  %v10362_v17 = vld [vmem:[%s12422_s1 + $0x5b8] sm:$0x1f]  }
 0x2d1   :  { %9800 = vmatprep.subr.bf16.mxu0 %v10467_v49  ;;  %9812 = vmatprep.subr.bf16.mxu1 %v10467_v49  ;;  %v6196_v29 = vrot.slane %v6184_v5, 6  ;;  %v6407_v32 = vunpack.c.l.b16 %v10380_v8  ;;  %v6408_v37 = vunpack.c.l.b16 %v12008_v13  ;;  %v10384_v43 = vld [vmem:[#allocation2 + $0xb4] ss:$0 sps:$4 sm:$0x88]  }
 0x2d2   :  { %v6065_v46 = vsel %vm1191_vm12, %v6064_v34, %v6063_v42  ;;  %v6322_v42 = vsel %vm1221_vm2, %v10362_v17, 0  ;;  %v6411_v60 = vunpack.c.l.b16 %v10384_v43  ;;  %v12073_v17 = vld [vmem:[#allocation2 + $0x38] ss:$0 sps:$4 sm:$0x11]  }
 0x2d3   :  { %9785 = vmatmul.mubr.msk.bf16.vlgmr.msra.gmra.mrb[112].mxu0 %vm1217_vm13, %v5744_v54  ;;  %9797 = vmatmul.mubr.msk.bf16.vlgmr.msra.gmra.mrb[112].mxu1 %vm1217_vm13, %v5838_v57  ;;  %v5972_v54 = vpack.c.b16 %v5971_v45, %v5971_v45  ;;  %v6066_v55 = vpack.c.b16 %v6065_v46, %v6065_v46  ;;  %v6191_v57 = vrot.slane %v6181_v44, 1  ;;  %v6415_v46 = vrot.slane %v6407_v32, 5 }
 0x2d4   :  { %9801 = vmatpush3.bf16.msra.mxu0 %v10339_v47  ;;  %9813 = vmatpush3.bf16.msra.mxu1 %v10340_v48  ;;  %v10355_v47 = vld [vmem:[%s12422_s1 + $0x580] sm:$0xff]   ;;  %v6417_v52 = vrot.slane %v6408_v37, 4  ;;  %v6509_v53 = vrot.slane %v6407_v32, 6 }
 0x2d5   :  { %9802 = vmatprep.subr.bf16.mxu0 %v10467_v49  ;;  %9814 = vmatprep.subr.bf16.mxu1 %v10467_v49  ;;  %v10356_v48 = vld [vmem:[%s12422_s1 + $0x5a0] sm:$0xff]   ;;  %v6192_v9 = vsel %vm1179_vm8, %v6191_v57, %v6190_v6  ;;  %v10374_v6 = vld [vmem:[%s12422_s1 + $0x5e8] sm:$0xff]  }
 0x2d6   :  { %v2844_v11 = vpop.f32.mrb[60].mxu0  ;;  %v2938_v61 = vpop.f32.mrb[60].mxu1  ;;  %9808 = vmatprep.mubr.msk.bf16.mxu0 %vm10468_vm3, %v10467_v49  ;;  %9820 = vmatprep.mubr.msk.bf16.mxu1 %vm10468_vm3, %v10467_v49  ;;  %v6193_v28 = vsel %vm1182_vm9, %v6182_v59, %v6192_v9  ;;  %v10372_v57 = vld [vmem:[%s12422_s1 + $0x5e0] sm:$0xff]  }
 0x2d7   :  { %v2850_v19 = vadd.f32 %v2844_v11, %v11884_v25  ;;  %v9474_v15 = vpop.f32.mrb[61].mxu0  ;;  %v9486_v21 = vpop.f32.mrb[61].mxu1 }
 0x2d8   :  { %v2847_v24 = vpop.f32.mrb[62].mxu0  ;;  %v2941_v26 = vpop.f32.mrb[62].mxu1  ;;  %9803 = vmatpush3.bf16.msra.mxu0 %v10341_v2  ;;  %9815 = vmatpush3.bf16.msra.mxu1 %v10342_v3  ;;  %v6282_v2 = vsel %vm1173_vm6, %v6281_v51, %v6280_v58  ;;  %v10358_v3 = vld [vmem:[%s12422_s1 + $0x5a8] sm:$0xff]   ;;  %v6194_v15 = vrot.slane %v6183_v1, 7 }
 0x2d9   :  { %v11956_v30 = vadd.f32 %v2938_v61, %v2850_v19  ;;  %v9475_v31 = vpop.f32.mrb[63].mxu0  ;;  %v9487_v25 = vpop.f32.mrb[63].mxu1  ;;  %9804 = vmatprep.subr.bf16.mxu0 %v10467_v49  ;;  %9816 = vmatprep.subr.bf16.mxu1 %v10467_v49  ;;  %v6284_v10 = vsel %vm1176_vm7, %v6283_v62, %v6282_v2  ;;  %v6185_v19 = vunpack.c.l.b16 %v11983_v56  ;;  %v6228_v24 = vsel %vm1221_vm2, %v10361_v4, 0  ;;  %v10382_v26 = vld [vmem:[#allocation2 + $0x74] ss:$0 sps:$4 sm:$0x88]  }
 0x2da   :  { %v6286_v21 = vsel %vm1179_vm8, %v6285_v63, %v6284_v10  ;;  %v10383_v31 = vld [vmem:[#allocation2 + $0x94] ss:$0 sps:$4 sm:$0x88]   ;;  %v6406_v25 = vunpack.c.l.b16 %v10379_v7  ;;  %v6195_v38 = vsel %vm1185_vm10, %v6194_v15, %v6193_v28  ;;  %v6409_v44 = vunpack.c.l.b16 %v10382_v26  ;;  %v10371_v56 = vld [vmem:[%s12422_s1 + $0x5c0] sm:$0xff]  }
 0x2db   :  { %v6198_v39 = vrot.slane %v6185_v19, 5  ;;  %v6292_v41 = vrot.slane %v6185_v19, 6  ;;  %v12041_v51 = vld [vmem:[#allocation2 + $0xf4] ss:$0 sps:$4 sm:$0x88]   ;;  %v6410_v59 = vunpack.c.l.b16 %v10383_v31  ;;  %v6423_v10 = vrot.slane %v6411_v60, 1 }
 0x2dc   :  { %9805 = vmatpush3.bf16.msra.mxu0 %v10343_v14  ;;  %9817 = vmatpush3.bf16.msra.mxu1 %v10344_v16  ;;  %v10359_v14 = vld [vmem:[%s12422_s1 + $0x590] sm:$0xff]   ;;  %v6414_v45 = vrot.slane %v6406_v25, 6  ;;  %v6419_v63 = vrot.slane %v6409_v44, 3  ;;  %v6513_v4 = vrot.slane %v6409_v44, 4  ;;  %v6413_v8 = vunpack.c.l.b16 %v12041_v51 }
 0x2dd   :  { %9806 = vmatprep.subr.bf16.mxu0 %v10467_v49  ;;  %9818 = vmatprep.subr.bf16.mxu1 %v10467_v49  ;;  %v10360_v16 = vld [vmem:[%s12422_s1 + $0x5b0] sm:$0xff]   ;;  %v6421_v7 = vrot.slane %v6410_v59, 2  ;;  %v10400_v51 = vld [vmem:[#allocation2 + $0xb8] ss:$0 sps:$4 sm:$0x11]  }
 0x2de   :  { %v12051_v58 = vld [vmem:[#allocation2 + $0xd4] ss:$0 sps:$4 sm:$0x88]   ;;  %v6416_v62 = vsel %vm1173_vm6, %v6415_v46, %v6414_v45  ;;  %v6426_v28 = vrot.slane %v6413_v8, 7 }
 0x2df   :  { %v6418_v9 = vsel %vm1176_vm7, %v6417_v52, %v6416_v62  ;;  %v6412_v13 = vunpack.c.l.b16 %v12051_v58  ;;  %v10399_v45 = vld [vmem:[#allocation2 + $0x98] ss:$0 sps:$4 sm:$0x11]   ;;  %v10388_v58 = vld [vmem:[%s12422_s1 + $0x620] sm:$0xff]  }
 0x2e0   :  { %9807 = vmatpush3.bf16.msra.mxu0 %v6000_v35  ;;  %9819 = vmatpush3.bf16.msra.mxu1 %v6094_v36  ;;  %v6290_v36 = vrot.slane %v6184_v5, 7  ;;  %v10373_v5 = vld [vmem:[%s12422_s1 + $0x5c8] sm:$0xff]  }
 0x2e1   :  { %9824 = vmatprep.subr.bf16.mxu0 %v10467_v49  ;;  %9836 = vmatprep.subr.bf16.mxu1 %v10467_v49 }
 0x2e3   :  { %9809 = vmatmul.mubr.msk.bf16.vlgmr.msra.gmra.mrb[116].mxu0 %vm1217_vm13, %v5972_v54  ;;  %9821 = vmatmul.mubr.msk.bf16.vlgmr.msra.gmra.mrb[116].mxu1 %vm1217_vm13, %v6066_v55 }
 0x2e4   :  { %9825 = vmatpush3.bf16.msra.mxu0 %v10355_v47  ;;  %9837 = vmatpush3.bf16.msra.mxu1 %v10356_v48  ;;  %v6508_v47 = vrot.slane %v6406_v25, 7  ;;  %v6197_v48 = vsel %vm1188_vm11, %v6196_v29, %v6195_v38  ;;  %v10395_v29 = vld [vmem:[#allocation2 + $0x18] ss:$0 sps:$4 sm:$0x11]  }
 0x2e5   :  { %9826 = vmatprep.subr.bf16.mxu0 %v10467_v49  ;;  %9838 = vmatprep.subr.bf16.mxu1 %v10467_v49  ;;  %v6199_v54 = vsel %vm1191_vm12, %v6198_v39, %v6197_v48  ;;  %v10398_v39 = vld [vmem:[#allocation2 + $0x78] ss:$0 sps:$4 sm:$0x11]   ;;  %v6634_v46 = vunpack.c.l.b16 %v10395_v29 }
 0x2e6   :  { %v3072_v11 = vpop.f32.mrb[64].mxu0  ;;  %v3166_v61 = vpop.f32.mrb[64].mxu1  ;;  %9832 = vmatprep.mubr.msk.bf16.mxu0 %vm10468_vm3, %v10467_v49  ;;  %9844 = vmatprep.mubr.msk.bf16.mxu1 %vm10468_vm3, %v10467_v49  ;;  %v6637_v52 = vunpack.c.l.b16 %v10398_v39  ;;  %v10413_v39 = vld [vmem:[#allocation2 + $0x58] ss:$0 sps:$4 sm:$0x22]  }
 0x2e7   :  { %v3078_v22 = vadd.f32 %v3072_v11, %v11956_v30  ;;  %v9498_v20 = vpop.f32.mrb[65].mxu0  ;;  %v9510_v23 = vpop.f32.mrb[65].mxu1  ;;  %v6288_v30 = vsel %vm1182_vm9, %v6287_v12, %v6286_v21  ;;  %v6515_v12 = vrot.slane %v6410_v59, 3  ;;  %v6420_v11 = vsel %vm1179_vm8, %v6419_v63, %v6418_v9  ;;  %v10375_v21 = vld [vmem:[%s12422_s1 + $0x5d0] sm:$0xff]  }
 0x2e8   :  { %v3075_v27 = vpop.f32.mrb[66].mxu0  ;;  %v3169_v18 = vpop.f32.mrb[66].mxu1  ;;  %9827 = vmatpush3.bf16.msra.mxu0 %v10357_v0  ;;  %9839 = vmatpush3.bf16.msra.mxu1 %v10358_v3  ;;  %v6289_v40 = vsel %vm1185_vm10, %v6183_v1, %v6288_v30  ;;  %v6511_v0 = vrot.slane %v6408_v37, 5  ;;  %v6200_v1 = vpack.c.b16 %v6199_v54, %v6199_v54  ;;  %v6510_v3 = vsel %vm1173_vm6, %v6509_v53, %v6508_v47  ;;  %v10377_v20 = vld [vmem:[%s12422_s1 + $0x5d8] sm:$0x1f]  }
 0x2e9   :  { %v12028_v33 = vadd.f32 %v3166_v61, %v3078_v22  ;;  %v9499_v34 = vpop.f32.mrb[67].mxu0  ;;  %v9511_v35 = vpop.f32.mrb[67].mxu1  ;;  %9828 = vmatprep.subr.bf16.mxu0 %v10467_v49  ;;  %9840 = vmatprep.subr.bf16.mxu1 %v10467_v49  ;;  %v6291_v50 = vsel %vm1188_vm11, %v6290_v36, %v6289_v40  ;;  %v10376_v22 = vld [vmem:[%s12422_s1 + $0x5f0] sm:$0xff]   ;;  %v10378_v27 = vld [vmem:[%s12422_s1 + $0x5f8] sm:$0x1f]   ;;  %v6422_v18 = vsel %vm1182_vm9, %v6421_v7, %v6420_v11  ;;  %v6635_v40 = vunpack.c.l.b16 %v12073_v17  ;;  %v10389_v7 = vld [vmem:[%s12422_s1 + $0x608] sm:$0xff]  }
 0x2ea   :  { %v6293_v55 = vsel %vm1191_vm12, %v6292_v41, %v6291_v50  ;;  %v6512_v61 = vsel %vm1176_vm7, %v6511_v0, %v6510_v3  ;;  %v6424_v32 = vsel %vm1185_vm10, %v6423_v10, %v6422_v18  ;;  %v6519_v35 = vrot.slane %v6412_v13, 1  ;;  %v10402_v59 = vld [vmem:[#allocation2 + $0xf8] ss:$0 sps:$4 sm:$0x11]  }
 0x2eb   :  { %v6294_v2 = vpack.c.b16 %v6293_v55, %v6293_v55  ;;  %v6456_v41 = vsel %vm1221_vm2, %v10377_v20, 0  ;;  %v6550_v48 = vsel %vm1221_vm2, %v10378_v27, 0  ;;  %v6642_v53 = vrot.slane %v6635_v40, 7  ;;  %v10387_v55 = vld [vmem:[%s12422_s1 + $0x600] sm:$0xff]   ;;  %v10392_v27 = vld [vmem:[%s12422_s1 + $0x630] sm:$0xff]  }
 0x2ec   :  { %9829 = vmatpush3.bf16.msra.mxu0 %v10359_v14  ;;  %9841 = vmatpush3.bf16.msra.mxu1 %v10360_v16  ;;  %v6514_v14 = vsel %vm1179_vm8, %v6513_v4, %v6512_v61  ;;  %v6517_v16 = vrot.slane %v6411_v60, 2  ;;  %v6638_v60 = vunpack.c.l.b16 %v10399_v45  ;;  %v6736_v63 = vrot.slane %v6634_v46, 1  ;;  %v10412_v20 = vld [vmem:[#allocation2 + $0x38] ss:$0 sps:$4 sm:$0x22]  }
 0x2ed   :  { %9830 = vmatprep.subr.bf16.mxu0 %v10467_v49  ;;  %9842 = vmatprep.subr.bf16.mxu1 %v10467_v49  ;;  %v6516_v34 = vsel %vm1182_vm9, %v6515_v12, %v6514_v14  ;;  %v6639_v0 = vunpack.c.l.b16 %v10400_v51  ;;  %v6641_v9 = vunpack.c.l.b16 %v10402_v59  ;;  %v10394_v18 = vld [vmem:[%s12422_s1 + $0x638] sm:$0x1f]  }
 0x2ee   :  { %v6518_v38 = vsel %vm1185_vm10, %v6517_v16, %v6516_v34  ;;  %v6737_v4 = vsel %vm1173_vm6, %v6635_v40, %v6736_v63  ;;  %v6648_v12 = vrot.slane %v6638_v60, 4  ;;  %v6742_v14 = vrot.slane %v6638_v60, 5  ;;  %v10411_v34 = vld [vmem:[#allocation2 + $0x18] ss:$0 sps:$4 sm:$0x22]   ;;  %v10404_v60 = vld [vmem:[%s12422_s1 + $0x660] sm:$0xff]  }
 0x2ef   :  { %v6520_v44 = vsel %vm1188_vm11, %v6519_v35, %v6518_v38  ;;  %v6650_v11 = vrot.slane %v6639_v0, 3  ;;  %v12172_v59 = vld [vmem:[#allocation2 + $0xd8] ss:$0 sps:$4 sm:$0x22]  }
 0x2f0   :  { %9831 = vmatpush3.bf16.msra.mxu0 %v6228_v24  ;;  %9843 = vmatpush3.bf16.msra.mxu1 %v6322_v42  ;;  %v6425_v42 = vsel %vm1188_vm11, %v6412_v13, %v6424_v32  ;;  %v6521_v50 = vsel %vm1191_vm12, %v6413_v8, %v6520_v44  ;;  %v10390_v8 = vld [vmem:[%s12422_s1 + $0x628] sm:$0xff]   ;;  %v6654_v32 = vrot.slane %v6641_v9, 1 }
 0x2f1   :  { %9848 = vmatprep.subr.bf16.mxu0 %v10467_v49  ;;  %9860 = vmatprep.subr.bf16.mxu1 %v10467_v49  ;;  %v6427_v43 = vsel %vm1191_vm12, %v6426_v28, %v6425_v42  ;;  %v10414_v42 = vld [vmem:[#allocation2 + $0x78] ss:$0 sps:$4 sm:$0x22]  }
 0x2f2   :  { %v6428_v54 = vpack.c.b16 %v6427_v43, %v6427_v43  ;;  %v6863_v43 = vunpack.c.l.b16 %v10412_v20  ;;  %v10408_v20 = vld [vmem:[%s12422_s1 + $0x670] sm:$0xff]  }
 0x2f3   :  { %9833 = vmatmul.mubr.msk.bf16.vlgmr.msra.gmra.mrb[120].mxu0 %vm1217_vm13, %v6200_v1  ;;  %9845 = vmatmul.mubr.msk.bf16.vlgmr.msra.gmra.mrb[120].mxu1 %vm1217_vm13, %v6294_v2  ;;  %v6643_v1 = vsel %vm1173_vm6, %v6642_v53, %v6634_v46  ;;  %v6646_v2 = vrot.slane %v6637_v52, 5  ;;  %v10415_v46 = vld [vmem:[#allocation2 + $0x98] ss:$0 sps:$4 sm:$0x22]   ;;  %v6864_v53 = vunpack.c.l.b16 %v10413_v39 }
 0x2f4   :  { %9849 = vmatpush3.bf16.msra.mxu0 %v10371_v56  ;;  %9861 = vmatpush3.bf16.msra.mxu1 %v10372_v57  ;;  %v12112_v56 = vld [vmem:[#allocation2 + $0xd8] ss:$0 sps:$4 sm:$0x11]   ;;  %v6522_v57 = vpack.c.b16 %v6521_v50, %v6521_v50  ;;  %v6866_v63 = vunpack.c.l.b16 %v10415_v46 }
 0x2f5   :  { %9850 = vmatprep.subr.bf16.mxu0 %v10467_v49  ;;  %9862 = vmatprep.subr.bf16.mxu1 %v10467_v49 }
 0x2f6   :  { %v3300_v19 = vpop.f32.mrb[68].mxu0  ;;  %v3394_v15 = vpop.f32.mrb[68].mxu1  ;;  %9856 = vmatprep.mubr.msk.bf16.mxu0 %vm10468_vm3, %v10467_v49  ;;  %9868 = vmatprep.mubr.msk.bf16.mxu1 %vm10468_vm3, %v10467_v49 }
 0x2f7   :  { %v3306_v23 = vadd.f32 %v3300_v19, %v12028_v33  ;;  %v9522_v24 = vpop.f32.mrb[69].mxu0  ;;  %v9534_v26 = vpop.f32.mrb[69].mxu1  ;;  %v10397_v33 = vld [vmem:[#allocation2 + $0x58] ss:$0 sps:$4 sm:$0x11]   ;;  %v10391_v19 = vld [vmem:[%s12422_s1 + $0x610] sm:$0xff]  }
 0x2f8   :  { %v3303_v31 = vpop.f32.mrb[70].mxu0  ;;  %v3397_v25 = vpop.f32.mrb[70].mxu1  ;;  %9851 = vmatpush3.bf16.msra.mxu0 %v10373_v5  ;;  %9863 = vmatpush3.bf16.msra.mxu1 %v10374_v6  ;;  %v6636_v47 = vunpack.c.l.b16 %v10397_v33  ;;  %v6740_v5 = vrot.slane %v6637_v52, 6  ;;  %v6640_v6 = vunpack.c.l.b16 %v12112_v56  ;;  %v10416_v52 = vld [vmem:[#allocation2 + $0xb8] ss:$0 sps:$4 sm:$0x22]  }
 0x2f9   :  { %v12095_v30 = vadd.f32 %v3394_v15, %v3306_v23  ;;  %v9523_v36 = vpop.f32.mrb[71].mxu0  ;;  %v9535_v37 = vpop.f32.mrb[71].mxu1  ;;  %9852 = vmatprep.subr.bf16.mxu0 %v10467_v49  ;;  %9864 = vmatprep.subr.bf16.mxu1 %v10467_v49  ;;  %v10393_v15 = vld [vmem:[%s12422_s1 + $0x618] sm:$0x1f]   ;;  %v6871_v56 = vrot.slane %v6863_v43, 1 }
 0x2fa   :  { %v6644_v62 = vrot.slane %v6636_v47, 6  ;;  %v6738_v3 = vrot.slane %v6636_v47, 7  ;;  %v6652_v28 = vrot.slane %v6640_v6, 2  ;;  %v6746_v38 = vrot.slane %v6640_v6, 3 }
 0x2fb   :  { %v6684_v44 = vsel %vm1221_vm2, %v10393_v15, 0  ;;  %v6862_v47 = vunpack.c.l.b16 %v10411_v34 }
 0x2fc   :  { %9853 = vmatpush3.bf16.msra.mxu0 %v10375_v21  ;;  %9865 = vmatpush3.bf16.msra.mxu1 %v10376_v22  ;;  %v6645_v10 = vsel %vm1176_vm7, %v6644_v62, %v6643_v1  ;;  %v6739_v61 = vsel %vm1176_vm7, %v6738_v3, %v6737_v4  ;;  %v6744_v22 = vrot.slane %v6639_v0, 4  ;;  %v12177_v62 = vld [vmem:[#allocation2 + $0xf8] ss:$0 sps:$4 sm:$0x22]   ;;  %v6867_v4 = vunpack.c.l.b16 %v10416_v52 }
 0x2fd   :  { %9854 = vmatprep.subr.bf16.mxu0 %v10467_v49  ;;  %9866 = vmatprep.subr.bf16.mxu1 %v10467_v49  ;;  %v6647_v13 = vsel %vm1179_vm8, %v6646_v2, %v6645_v10  ;;  %v6741_v21 = vsel %vm1179_vm8, %v6740_v5, %v6739_v61  ;;  %v6870_v0 = vrot.slane %v6862_v47, 2  ;;  %v6964_v1 = vrot.slane %v6862_v47, 3  ;;  %v10405_v10 = vld [vmem:[%s12422_s1 + $0x648] sm:$0xff]   ;;  %v10428_v61 = vld [vmem:[#allocation2 + $0x38] ss:$0 sps:$4 sm:$0x44]  }
 0x2fe   :  { %v6649_v25 = vsel %vm1182_vm9, %v6648_v12, %v6647_v13  ;;  %v6743_v37 = vsel %vm1182_vm9, %v6742_v14, %v6741_v21  ;;  %v6967_v5 = vrot.slane %v6864_v53, 1  ;;  %v10406_v12 = vld [vmem:[%s12422_s1 + $0x668] sm:$0xff]   ;;  %v6869_v13 = vunpack.c.l.b16 %v12177_v62 }
 0x2ff   :  { %v6651_v36 = vsel %vm1185_vm10, %v6650_v11, %v6649_v25  ;;  %v6745_v40 = vsel %vm1185_vm10, %v6744_v22, %v6743_v37  ;;  %v6872_v6 = vsel %vm1173_vm6, %v6871_v56, %v6870_v0  ;;  %v6876_v11 = vrot.slane %v6866_v63, 6  ;;  %v10407_v22 = vld [vmem:[%s12422_s1 + $0x650] sm:$0xff]  }
 0x300   :  { %9855 = vmatpush3.bf16.msra.mxu0 %v6456_v41  ;;  %9867 = vmatpush3.bf16.msra.mxu1 %v6550_v48  ;;  %v6748_v41 = vrot.slane %v6641_v9, 2  ;;  %v6653_v45 = vsel %vm1188_vm11, %v6652_v28, %v6651_v36  ;;  %v6778_v48 = vsel %vm1221_vm2, %v10394_v18, 0  ;;  %v6747_v51 = vsel %vm1188_vm11, %v6746_v38, %v6745_v40  ;;  %v10430_v36 = vld [vmem:[#allocation2 + $0x78] ss:$0 sps:$4 sm:$0x44]  }
 0x301   :  { %9872 = vmatprep.subr.bf16.mxu0 %v10467_v49  ;;  %9884 = vmatprep.subr.bf16.mxu1 %v10467_v49  ;;  %v6655_v50 = vsel %vm1191_vm12, %v6654_v32, %v6653_v45  ;;  %v6868_v9 = vunpack.c.l.b16 %v12172_v59  ;;  %v6873_v14 = vsel %vm1176_vm7, %v6864_v53, %v6872_v6  ;;  %v10429_v32 = vld [vmem:[#allocation2 + $0x58] ss:$0 sps:$4 sm:$0x44]   ;;  %v7091_v37 = vunpack.c.l.b16 %v10428_v61  ;;  %v10419_v6 = vld [vmem:[%s12422_s1 + $0x680] sm:$0xff]  }
 0x302   :  { %v6656_v2 = vpack.c.b16 %v6655_v50, %v6655_v50  ;;  %v6976_v46 = vrot.slane %v6869_v13, 4  ;;  %v12226_v50 = vld [vmem:[#allocation2 + $0xb8] ss:$0 sps:$4 sm:$0x44]   ;;  %v7093_v52 = vunpack.c.l.b16 %v10430_v36 }
 0x303   :  { %9857 = vmatmul.mubr.msk.bf16.vlgmr.msra.gmra.mrb[124].mxu0 %vm1217_vm13, %v6428_v54  ;;  %9869 = vmatmul.mubr.msk.bf16.vlgmr.msra.gmra.mrb[124].mxu1 %vm1217_vm13, %v6522_v57  ;;  %v6749_v54 = vsel %vm1191_vm12, %v6748_v41, %v6747_v51  ;;  %v6965_v57 = vrot.slane %v6863_v43, 2  ;;  %v6880_v25 = vrot.slane %v6868_v9, 4  ;;  %v6974_v43 = vrot.slane %v6868_v9, 5  ;;  %v10433_v59 = vld [vmem:[#allocation2 + $0xd8] ss:$0 sps:$4 sm:$0x44]  }
 0x304   :  { %9873 = vmatpush3.bf16.msra.mxu0 %v10387_v55  ;;  %9885 = vmatpush3.bf16.msra.mxu1 %v10388_v58  ;;  %v6865_v55 = vunpack.c.l.b16 %v10414_v42  ;;  %v10403_v58 = vld [vmem:[%s12422_s1 + $0x640] sm:$0xff]   ;;  %v6750_v3 = vpack.c.b16 %v6749_v54, %v6749_v54  ;;  %v7092_v51 = vunpack.c.l.b16 %v10429_v32  ;;  %v7099_v53 = vrot.slane %v7091_v37, 3 }
 0x305   :  { %9874 = vmatprep.subr.bf16.mxu0 %v10467_v49  ;;  %9886 = vmatprep.subr.bf16.mxu1 %v10467_v49  ;;  %v7193_v54 = vrot.slane %v7091_v37, 4  ;;  %v7103_v9 = vrot.slane %v7093_v52, 1  ;;  %v7096_v61 = vunpack.c.l.b16 %v10433_v59 }
 0x306   :  { %v3528_v16 = vpop.f32.mrb[72].mxu0  ;;  %v3622_v17 = vpop.f32.mrb[72].mxu1  ;;  %9880 = vmatprep.mubr.msk.bf16.mxu0 %vm10468_vm3, %v10467_v49  ;;  %9892 = vmatprep.mubr.msk.bf16.mxu1 %vm10468_vm3, %v10467_v49 }
 0x307   :  { %v3534_v23 = vadd.f32 %v3528_v16, %v12095_v30  ;;  %v9546_v24 = vpop.f32.mrb[73].mxu0  ;;  %v9558_v26 = vpop.f32.mrb[73].mxu1  ;;  %v6878_v16 = vrot.slane %v6867_v4, 5 }
 0x308   :  { %v3531_v29 = vpop.f32.mrb[74].mxu0  ;;  %v3625_v31 = vpop.f32.mrb[74].mxu1  ;;  %9875 = vmatpush3.bf16.msra.mxu0 %v10389_v7  ;;  %9887 = vmatpush3.bf16.msra.mxu1 %v10390_v8  ;;  %v6874_v7 = vrot.slane %v6865_v55, 7  ;;  %v6966_v8 = vsel %vm1173_vm6, %v6965_v57, %v6964_v1  ;;  %v6972_v26 = vrot.slane %v6867_v4, 6  ;;  %v7101_v4 = vrot.slane %v7092_v51, 2 }
 0x309   :  { %v12154_v35 = vadd.f32 %v3622_v17, %v3534_v23  ;;  %v9547_v33 = vpop.f32.mrb[75].mxu0  ;;  %v9559_v30 = vpop.f32.mrb[75].mxu1  ;;  %9876 = vmatprep.subr.bf16.mxu0 %v10467_v49  ;;  %9888 = vmatprep.subr.bf16.mxu1 %v10467_v49  ;;  %v6968_v17 = vsel %vm1176_vm7, %v6967_v5, %v6966_v8  ;;  %v10409_v31 = vld [vmem:[%s12422_s1 + $0x658] sm:$0x1f]   ;;  %v7195_v5 = vrot.slane %v7092_v51, 3 }
 0x30a   :  { %v6875_v23 = vsel %vm1179_vm8, %v6874_v7, %v6873_v14  ;;  %v6969_v24 = vsel %vm1179_vm8, %v6865_v55, %v6968_v17  ;;  %v6882_v30 = vrot.slane %v6869_v13, 3  ;;  %v6912_v55 = vsel %vm1221_vm2, %v10409_v31, 0  ;;  %v10420_v7 = vld [vmem:[%s12422_s1 + $0x6a0] sm:$0xff]  }
 0x30b   :  { %v6877_v41 = vsel %vm1182_vm9, %v6876_v11, %v6875_v23  ;;  %v7108_v31 = vrot.slane %v7096_v61, 6 }
 0x30c   :  { %9877 = vmatpush3.bf16.msra.mxu0 %v10391_v19  ;;  %9889 = vmatpush3.bf16.msra.mxu1 %v10392_v27  ;;  %v6970_v19 = vrot.slane %v6866_v63, 7  ;;  %v10427_v27 = vld [vmem:[#allocation2 + $0x18] ss:$0 sps:$4 sm:$0x44]  }
 0x30d   :  { %9878 = vmatprep.subr.bf16.mxu0 %v10467_v49  ;;  %9890 = vmatprep.subr.bf16.mxu1 %v10467_v49  ;;  %v7090_v47 = vunpack.c.l.b16 %v10427_v27  ;;  %v10434_v63 = vld [vmem:[#allocation2 + $0xf8] ss:$0 sps:$4 sm:$0x44]  }
 0x30e   :  { %v6971_v42 = vsel %vm1182_vm9, %v6970_v19, %v6969_v24  ;;  %v7097_v14 = vunpack.c.l.b16 %v10434_v63  ;;  %v10444_v24 = vld [vmem:[#allocation2 + $0x38] ss:$0 sps:$4 sm:$0x88]  }
 0x30f   :  { %v6973_v45 = vsel %vm1185_vm10, %v6972_v26, %v6971_v42  ;;  %v7098_v0 = vrot.slane %v7090_v47, 4  ;;  %v7192_v1 = vrot.slane %v7090_v47, 5 }
 0x310   :  { %9879 = vmatpush3.bf16.msra.mxu0 %v6684_v44  ;;  %9891 = vmatpush3.bf16.msra.mxu1 %v6778_v48  ;;  %v6879_v44 = vsel %vm1185_vm10, %v6878_v16, %v6877_v41  ;;  %v12224_v48 = vld [vmem:[#allocation2 + $0x98] ss:$0 sps:$4 sm:$0x44]  }
 0x311   :  { %9896 = vmatprep.subr.bf16.mxu0 %v10467_v49  ;;  %9908 = vmatprep.subr.bf16.mxu1 %v10467_v49  ;;  %v6881_v57 = vsel %vm1188_vm11, %v6880_v25, %v6879_v44  ;;  %v7100_v8 = vsel %vm1173_vm6, %v7099_v53, %v7098_v0  ;;  %v7110_v25 = vrot.slane %v7097_v14, 5  ;;  %v10445_v44 = vld [vmem:[#allocation2 + $0x58] ss:$0 sps:$4 sm:$0x88]  }
 0x312   :  { %v7102_v16 = vsel %vm1176_vm7, %v7101_v4, %v7100_v8  ;;  %v7320_v59 = vunpack.c.l.b16 %v10445_v44  ;;  %v12297_v4 = vld [vmem:[#allocation2 + $0xf8] ss:$0 sps:$4 sm:$0x88]   ;;  %v10436_v8 = vld [vmem:[%s12422_s1 + $0x6e0] sm:$0xff]  }
 0x313   :  { %9881 = vmatmul.mubr.msk.bf16.vlgmr.msra.gmra.mrb[128].mxu0 %vm1217_vm13, %v6656_v2  ;;  %9893 = vmatmul.mubr.msk.bf16.vlgmr.msra.gmra.mrb[128].mxu1 %vm1217_vm13, %v6750_v3  ;;  %v7094_v2 = vunpack.c.l.b16 %v12224_v48  ;;  %v7095_v3 = vunpack.c.l.b16 %v12226_v50  ;;  %v10446_v48 = vld [vmem:[#allocation2 + $0x78] ss:$0 sps:$4 sm:$0x88]   ;;  %v7319_v50 = vunpack.c.l.b16 %v10444_v24 }
 0x314   :  { %9897 = vmatpush3.bf16.msra.mxu0 %v10403_v58  ;;  %9909 = vmatpush3.bf16.msra.mxu1 %v10404_v60  ;;  %v6975_v58 = vsel %vm1188_vm11, %v6974_v43, %v6973_v45  ;;  %v6883_v60 = vsel %vm1191_vm12, %v6882_v30, %v6881_v57  ;;  %v10426_v30 = vld [vmem:[%s12422_s1 + $0x6b8] sm:$0x1f]   ;;  %v7204_v43 = vrot.slane %v7097_v14, 6 }
 0x315   :  { %9898 = vmatprep.subr.bf16.mxu0 %v10467_v49  ;;  %9910 = vmatprep.subr.bf16.mxu1 %v10467_v49  ;;  %v6977_v62 = vsel %vm1191_vm12, %v6976_v46, %v6975_v58  ;;  %v6884_v13 = vpack.c.b16 %v6883_v60, %v6883_v60  ;;  %v7199_v19 = vrot.slane %v7094_v2, 1  ;;  %v10447_v57 = vld [vmem:[#allocation2 + $0x98] ss:$0 sps:$4 sm:$0x88]   ;;  %v7234_v60 = vsel %vm1221_vm2, %v10426_v30, 0 }
 0x316   :  { %v3756_v15 = vpop.f32.mrb[76].mxu0  ;;  %v3850_v21 = vpop.f32.mrb[76].mxu1  ;;  %9904 = vmatprep.mubr.msk.bf16.mxu0 %vm10468_vm3, %v10467_v49  ;;  %9916 = vmatprep.mubr.msk.bf16.mxu1 %vm10468_vm3, %v10467_v49  ;;  %v6978_v11 = vpack.c.b16 %v6977_v62, %v6977_v62  ;;  %v10448_v58 = vld [vmem:[#allocation2 + $0xb8] ss:$0 sps:$4 sm:$0x88]   ;;  %v7321_v62 = vunpack.c.l.b16 %v10446_v48  ;;  %v7327_v63 = vrot.slane %v7319_v50, 5 }
 0x317   :  { %v3762_v18 = vadd.f32 %v3756_v15, %v12154_v35  ;;  %v9570_v28 = vpop.f32.mrb[77].mxu0  ;;  %v9582_v29 = vpop.f32.mrb[77].mxu1  ;;  %v10410_v35 = vld [vmem:[%s12422_s1 + $0x678] sm:$0x1f]   ;;  %v10421_v15 = vld [vmem:[%s12422_s1 + $0x688] sm:$0xff]   ;;  %v7421_v0 = vrot.slane %v7319_v50, 6 }
 0x318   :  { %v3759_v34 = vpop.f32.mrb[78].mxu0  ;;  %v3853_v33 = vpop.f32.mrb[78].mxu1  ;;  %9899 = vmatpush3.bf16.msra.mxu0 %v10405_v10  ;;  %9911 = vmatpush3.bf16.msra.mxu1 %v10406_v12  ;;  %v7006_v56 = vsel %vm1221_vm2, %v10410_v35, 0  ;;  %v7194_v10 = vsel %vm1173_vm6, %v7193_v54, %v7192_v1  ;;  %v7197_v12 = vrot.slane %v7093_v52, 2  ;;  %v10424_v28 = vld [vmem:[%s12422_s1 + $0x6b0] sm:$0xff]  }
 0x319   :  { %v12213_v38 = vadd.f32 %v3850_v21, %v3762_v18  ;;  %v9571_v39 = vpop.f32.mrb[79].mxu0  ;;  %v9583_v40 = vpop.f32.mrb[79].mxu1  ;;  %9900 = vmatprep.subr.bf16.mxu0 %v10467_v49  ;;  %9912 = vmatprep.subr.bf16.mxu1 %v10467_v49  ;;  %v7196_v17 = vsel %vm1176_vm7, %v7195_v5, %v7194_v10  ;;  %v10422_v21 = vld [vmem:[%s12422_s1 + $0x6a8] sm:$0xff]   ;;  %v10423_v18 = vld [vmem:[%s12422_s1 + $0x690] sm:$0xff]   ;;  %v10425_v29 = vld [vmem:[%s12422_s1 + $0x698] sm:$0x1f]   ;;  %v7323_v10 = vunpack.c.l.b16 %v10448_v58 }
 0x31a   :  { %v7198_v23 = vsel %vm1179_vm8, %v7197_v12, %v7196_v17  ;;  %v7202_v39 = vrot.slane %v7096_v61, 7  ;;  %v10443_v40 = vld [vmem:[#allocation2 + $0x18] ss:$0 sps:$4 sm:$0x88]   ;;  %v7140_v51 = vsel %vm1221_vm2, %v10425_v29, 0  ;;  %v7329_v12 = vrot.slane %v7320_v59, 4 }
 0x31b   :  { %v7200_v37 = vsel %vm1182_vm9, %v7199_v19, %v7198_v23  ;;  %v7318_v54 = vunpack.c.l.b16 %v10443_v40  ;;  %v12295_v1 = vld [vmem:[#allocation2 + $0xd8] ss:$0 sps:$4 sm:$0x88]   ;;  %v7331_v61 = vrot.slane %v7321_v62, 3  ;;  %v7325_v19 = vunpack.c.l.b16 %v12297_v4 }
 0x31c   :  { %9901 = vmatpush3.bf16.msra.mxu0 %v10407_v22  ;;  %9913 = vmatpush3.bf16.msra.mxu1 %v10408_v20  ;;  %v7104_v22 = vsel %vm1179_vm8, %v7103_v9, %v7102_v16  ;;  %v7106_v20 = vrot.slane %v7095_v3, 7  ;;  %v7322_v9 = vunpack.c.l.b16 %v10447_v57  ;;  %v7425_v16 = vrot.slane %v7321_v62, 4  ;;  %v10463_v62 = vld [vmem:[#allocation2 + $0x9c] ss:$0 sps:$4 sm:$0x11]  }
 0x31d   :  { %9902 = vmatprep.subr.bf16.mxu0 %v10467_v49  ;;  %9914 = vmatprep.subr.bf16.mxu1 %v10467_v49  ;;  %v7105_v36 = vsel %vm1182_vm9, %v7094_v2, %v7104_v22  ;;  %v7326_v5 = vrot.slane %v7318_v54, 6  ;;  %v7324_v17 = vunpack.c.l.b16 %v12295_v1  ;;  %v7338_v48 = vrot.slane %v7325_v19, 7 }
 0x31e   :  { %v7107_v42 = vsel %vm1185_vm10, %v7106_v20, %v7105_v36  ;;  %v7333_v20 = vrot.slane %v7322_v9, 2  ;;  %v7427_v24 = vrot.slane %v7322_v9, 3 }
 0x31f   :  { %v7109_v52 = vsel %vm1188_vm11, %v7108_v31, %v7107_v42 }
 0x320   :  { %9903 = vmatpush3.bf16.msra.mxu0 %v6912_v55  ;;  %9915 = vmatpush3.bf16.msra.mxu1 %v7006_v56  ;;  %v7111_v55 = vsel %vm1191_vm12, %v7110_v25, %v7109_v52  ;;  %v10439_v25 = vld [vmem:[%s12422_s1 + $0x6d0] sm:$0xff]   ;;  %v10462_v52 = vld [vmem:[#allocation2 + $0x7c] ss:$0 sps:$4 sm:$0x11]  }
 0x321   :  { %9920 = vmatprep.subr.bf16.mxu0 %v10467_v49  ;;  %9932 = vmatprep.subr.bf16.mxu1 %v10467_v49  ;;  %v7112_v2 = vpack.c.b16 %v7111_v55, %v7111_v55  ;;  %v7549_v1 = vunpack.c.l.b16 %v10462_v52 }
 0x323   :  { %9905 = vmatmul.mubr.msk.bf16.vlgmr.msra.gmra.mrb[132].mxu0 %vm1217_vm13, %v6884_v13  ;;  %9917 = vmatmul.mubr.msk.bf16.vlgmr.msra.gmra.mrb[132].mxu1 %vm1217_vm13, %v6978_v11  ;;  %v7423_v13 = vrot.slane %v7320_v59, 5  ;;  %v7328_v11 = vsel %vm1173_vm6, %v7327_v63, %v7326_v5  ;;  %v10464_v63 = vld [vmem:[#allocation2 + $0xbc] ss:$0 sps:$4 sm:$0x11]  }
 0x324   :  { %9921 = vmatpush3.bf16.msra.mxu0 %v10419_v6  ;;  %9933 = vmatpush3.bf16.msra.mxu1 %v10420_v7  ;;  %v7420_v6 = vrot.slane %v7318_v54, 7  ;;  %v10435_v7 = vld [vmem:[%s12422_s1 + $0x6c0] sm:$0xff]   ;;  %v7330_v22 = vsel %vm1176_vm7, %v7329_v12, %v7328_v11  ;;  %v7551_v12 = vunpack.c.l.b16 %v10464_v63 }
 0x325   :  { %9922 = vmatprep.subr.bf16.mxu0 %v10467_v49  ;;  %9934 = vmatprep.subr.bf16.mxu1 %v10467_v49 }
 0x326   :  { %v3984_v26 = vpop.f32.mrb[80].mxu0  ;;  %v4078_v27 = vpop.f32.mrb[80].mxu1  ;;  %9928 = vmatprep.mubr.msk.bf16.mxu0 %vm10468_vm3, %v10467_v49  ;;  %9940 = vmatprep.mubr.msk.bf16.mxu1 %vm10468_vm3, %v10467_v49  ;;  %v7422_v14 = vsel %vm1173_vm6, %v7421_v0, %v7420_v6  ;;  %v10451_v6 = vld [vmem:[%s12422_s1 + $0x700] sm:$0xff]  }
 0x327   :  { %v3990_v32 = vadd.f32 %v3984_v26, %v12213_v38  ;;  %v9594_v34 = vpop.f32.mrb[81].mxu0  ;;  %v9606_v33 = vpop.f32.mrb[81].mxu1  ;;  %v7201_v38 = vsel %vm1185_vm10, %v7095_v3, %v7200_v37  ;;  %v7424_v23 = vsel %vm1176_vm7, %v7423_v13, %v7422_v14  ;;  %v7332_v26 = vsel %vm1179_vm8, %v7331_v61, %v7330_v22  ;;  %v10441_v37 = vld [vmem:[%s12422_s1 + $0x6d8] sm:$0x1f]  }
 0x328   :  { %v3987_v35 = vpop.f32.mrb[82].mxu0  ;;  %v4081_v41 = vpop.f32.mrb[82].mxu1  ;;  %9923 = vmatpush3.bf16.msra.mxu0 %v10421_v15  ;;  %9935 = vmatpush3.bf16.msra.mxu1 %v10422_v21  ;;  %v7203_v53 = vsel %vm1188_vm11, %v7202_v39, %v7201_v38  ;;  %v10437_v15 = vld [vmem:[%s12422_s1 + $0x6c8] sm:$0xff]   ;;  %v10460_v34 = vld [vmem:[#allocation2 + $0x3c] ss:$0 sps:$4 sm:$0x11]  }
 0x329   :  { %v12283_v45 = vadd.f32 %v4078_v27, %v3990_v32  ;;  %v9595_v46 = vpop.f32.mrb[83].mxu0  ;;  %v9607_v47 = vpop.f32.mrb[83].mxu1  ;;  %9924 = vmatprep.subr.bf16.mxu0 %v10467_v49  ;;  %9936 = vmatprep.subr.bf16.mxu1 %v10467_v49  ;;  %v7205_v56 = vsel %vm1191_vm12, %v7204_v43, %v7203_v53  ;;  %v10438_v21 = vld [vmem:[%s12422_s1 + $0x6e8] sm:$0xff]   ;;  %v7335_v27 = vrot.slane %v7323_v10, 1  ;;  %v10440_v32 = vld [vmem:[%s12422_s1 + $0x6f0] sm:$0xff]   ;;  %v7334_v41 = vsel %vm1182_vm9, %v7333_v20, %v7332_v26 }
 0x32a   :  { %v7206_v3 = vpack.c.b16 %v7205_v56, %v7205_v56  ;;  %v10442_v39 = vld [vmem:[%s12422_s1 + $0x6f8] sm:$0x1f]   ;;  %v7431_v38 = vrot.slane %v7324_v17, 1  ;;  %v7547_v53 = vunpack.c.l.b16 %v10460_v34  ;;  %v7368_v54 = vsel %vm1221_vm2, %v10441_v37, 0 }
 0x32b   :  { %v10459_v43 = vld [vmem:[#allocation2 + $0x1c] ss:$0 sps:$4 sm:$0x11]   ;;  %v7336_v47 = vsel %vm1185_vm10, %v7335_v27, %v7334_v41  ;;  %v7462_v55 = vsel %vm1221_vm2, %v10442_v39, 0  ;;  %v7558_v14 = vrot.slane %v7549_v1, 5  ;;  %v10456_v39 = vld [vmem:[%s12422_s1 + $0x730] sm:$0xff]  }
 0x32c   :  { %9925 = vmatpush3.bf16.msra.mxu0 %v10423_v18  ;;  %9937 = vmatpush3.bf16.msra.mxu1 %v10424_v28  ;;  %v7426_v18 = vsel %vm1179_vm8, %v7425_v16, %v7424_v23  ;;  %v7429_v28 = vrot.slane %v7323_v10, 2  ;;  %v7337_v56 = vsel %vm1188_vm11, %v7324_v17, %v7336_v47  ;;  %v7546_v58 = vunpack.c.l.b16 %v10459_v43  ;;  %v10458_v43 = vld [vmem:[%s12422_s1 + $0x738] sm:$0x1f]  }
 0x32d   :  { %9926 = vmatprep.subr.bf16.mxu0 %v10467_v49  ;;  %9938 = vmatprep.subr.bf16.mxu1 %v10467_v49  ;;  %v7428_v42 = vsel %vm1182_vm9, %v7427_v24, %v7426_v18  ;;  %v7339_v59 = vsel %vm1191_vm12, %v7338_v48, %v7337_v56  ;;  %v7550_v10 = vunpack.c.l.b16 %v10463_v62  ;;  %v7652_v17 = vrot.slane %v7549_v1, 6 }
 0x32e   :  { %v7430_v50 = vsel %vm1185_vm10, %v7429_v28, %v7428_v42  ;;  %v7340_v4 = vpack.c.b16 %v7339_v59, %v7339_v59  ;;  %v7648_v9 = vrot.slane %v7546_v58, 1 }
 0x32f   :  { %v7432_v57 = vsel %vm1188_vm11, %v7431_v38, %v7430_v50  ;;  %v7560_v23 = vrot.slane %v7550_v10, 4  ;;  %v7654_v26 = vrot.slane %v7550_v10, 5 }
 0x330   :  { %9927 = vmatpush3.bf16.msra.mxu0 %v7140_v51  ;;  %9939 = vmatpush3.bf16.msra.mxu1 %v7234_v60  ;;  %v10461_v51 = vld [vmem:[#allocation2 + $0x5c] ss:$0 sps:$4 sm:$0x11]   ;;  %v7433_v60 = vsel %vm1191_vm12, %v7325_v19, %v7432_v57  ;;  %v7649_v16 = vsel %vm1173_vm6, %v7547_v53, %v7648_v9  ;;  %v10453_v19 = vld [vmem:[%s12422_s1 + $0x708] sm:$0xff]  }
 0x331   :  { %9944 = vmatprep.subr.bf16.mxu0 %v10467_v49  ;;  %9956 = vmatprep.subr.bf16.mxu1 %v10467_v49  ;;  %v7548_v0 = vunpack.c.l.b16 %v10461_v51  ;;  %v7434_v5 = vpack.c.b16 %v7433_v60, %v7433_v60 }
 0x333   :  { %9929 = vmatmul.mubr.msk.bf16.vlgmr.msra.gmra.mrb[136].mxu0 %vm1217_vm13, %v7112_v2  ;;  %9941 = vmatmul.mubr.msk.bf16.vlgmr.msra.gmra.mrb[136].mxu1 %vm1217_vm13, %v7206_v3  ;;  %v7554_v2 = vrot.slane %v7547_v53, 7  ;;  %v10465_v3 = vld [vmem:[#allocation2 + $0xdc] ss:$0 sps:$4 sm:$0x11]   ;;  %v7556_v13 = vrot.slane %v7548_v0, 6  ;;  %v7650_v11 = vrot.slane %v7548_v0, 7 }
 0x334   :  { %9945 = vmatpush3.bf16.msra.mxu0 %v10435_v7  ;;  %9957 = vmatpush3.bf16.msra.mxu1 %v10436_v8  ;;  %v10452_v7 = vld [vmem:[%s12422_s1 + $0x720] sm:$0xff]   ;;  %v10466_v8 = vld [vmem:[#allocation2 + $0xfc] ss:$0 sps:$4 sm:$0x11]   ;;  %v7690_v53 = vsel %vm1221_vm2, %v10458_v43, 0 }
 0x335   :  { %9946 = vmatprep.subr.bf16.mxu0 %v10467_v49  ;;  %9958 = vmatprep.subr.bf16.mxu1 %v10467_v49  ;;  %v7555_v61 = vsel %vm1173_vm6, %v7554_v2, %v7546_v58  ;;  %v7553_v22 = vunpack.c.l.b16 %v10466_v8  ;;  %v7651_v24 = vsel %vm1176_vm7, %v7650_v11, %v7649_v16 }
 0x336   :  { %v4212_v29 = vpop.f32.mrb[84].mxu0  ;;  %v4306_v31 = vpop.f32.mrb[84].mxu1  ;;  %9952 = vmatprep.mubr.msk.bf16.mxu0 %vm10468_vm3, %v10467_v49  ;;  %9964 = vmatprep.mubr.msk.bf16.mxu1 %vm10468_vm3, %v10467_v49  ;;  %v7557_v20 = vsel %vm1176_vm7, %v7556_v13, %v7555_v61 }
 0x337   :  { %v4218_v33 = vadd.f32 %v4212_v29, %v12283_v45  ;;  %v9618_v30 = vpop.f32.mrb[85].mxu0  ;;  %v9630_v36 = vpop.f32.mrb[85].mxu1  ;;  %v7559_v28 = vsel %vm1179_vm8, %v7558_v14, %v7557_v20  ;;  %v7562_v29 = vrot.slane %v7551_v12, 3  ;;  %v7566_v48 = vrot.slane %v7553_v22, 1 }
 0x338   :  { %v4215_v40 = vpop.f32.mrb[86].mxu0  ;;  %v4309_v35 = vpop.f32.mrb[86].mxu1  ;;  %9947 = vmatpush3.bf16.msra.mxu0 %v10437_v15  ;;  %9959 = vmatpush3.bf16.msra.mxu1 %v10438_v21  ;;  %v10454_v15 = vld [vmem:[%s12422_s1 + $0x728] sm:$0xff]   ;;  %v7552_v21 = vunpack.c.l.b16 %v10465_v3  ;;  %v10455_v30 = vld [vmem:[%s12422_s1 + $0x710] sm:$0xff]   ;;  %v7660_v51 = vrot.slane %v7553_v22, 2 }
 0x339   :  { %v12344_v44 = vadd.f32 %v4306_v31, %v4218_v33  ;;  %v9619_v45 = vpop.f32.mrb[87].mxu0  ;;  %v9631_v46 = vpop.f32.mrb[87].mxu1  ;;  %9948 = vmatprep.subr.bf16.mxu0 %v10467_v49  ;;  %9960 = vmatprep.subr.bf16.mxu1 %v10467_v49  ;;  %v7653_v31 = vsel %vm1179_vm8, %v7652_v17, %v7651_v24  ;;  %v10457_v40 = vld [vmem:[%s12422_s1 + $0x718] sm:$0x1f]  }
 0x33a   :  { %v7564_v35 = vrot.slane %v7552_v21, 2  ;;  %v7655_v45 = vsel %vm1182_vm9, %v7654_v26, %v7653_v31  ;;  %v7658_v46 = vrot.slane %v7552_v21, 3  ;;  %v7596_v52 = vsel %vm1221_vm2, %v10457_v40, 0 }
 0x33c   :  { %9949 = vmatpush3.bf16.msra.mxu0 %v10439_v25  ;;  %9961 = vmatpush3.bf16.msra.mxu1 %v10440_v32  ;;  %v7656_v25 = vrot.slane %v7551_v12, 4 }
 0x33d   :  { %9950 = vmatprep.subr.bf16.mxu0 %v10467_v49  ;;  %9962 = vmatprep.subr.bf16.mxu1 %v10467_v49 }
 0x33e   :  { %v7657_v50 = vsel %vm1185_vm10, %v7656_v25, %v7655_v45 }
 0x340   :  { %9951 = vmatpush3.bf16.msra.mxu0 %v7368_v54  ;;  %9963 = vmatpush3.bf16.msra.mxu1 %v7462_v55  ;;  %v7659_v55 = vsel %vm1188_vm11, %v7658_v46, %v7657_v50 }
 0x341   :  { %9968 = vmatprep.subr.bf16.mxu0 %v10467_v49  ;;  %9980 = vmatprep.subr.bf16.mxu1 %v10467_v49  ;;  %v7661_v57 = vsel %vm1191_vm12, %v7660_v51, %v7659_v55 }
 0x342   :  { %v7662_v59 = vpack.c.b16 %v7661_v57, %v7661_v57 }
 0x343   :  { %9953 = vmatmul.mubr.msk.bf16.vlgmr.msra.gmra.mrb[140].mxu0 %vm1217_vm13, %v7340_v4  ;;  %9965 = vmatmul.mubr.msk.bf16.vlgmr.msra.gmra.mrb[140].mxu1 %vm1217_vm13, %v7434_v5 }
 0x344   :  { %9969 = vmatpush3.bf16.msra.mxu0 %v10451_v6  ;;  %9981 = vmatpush3.bf16.msra.mxu1 %v10452_v7 }
 0x345   :  { %9970 = vmatprep.subr.bf16.mxu0 %v10467_v49  ;;  %9982 = vmatprep.subr.bf16.mxu1 %v10467_v49 }
 0x346   :  { %v4440_v27 = vpop.f32.mrb[88].mxu0  ;;  %v4534_v18 = vpop.f32.mrb[88].mxu1  ;;  %9976 = vmatprep.mubr.msk.bf16.mxu0 %vm10468_vm3, %v10467_v49  ;;  %9988 = vmatprep.mubr.msk.bf16.mxu1 %vm10468_vm3, %v10467_v49 }
 0x347   :  { %v4446_v32 = vadd.f32 %v4440_v27, %v12344_v44  ;;  %v9642_v34 = vpop.f32.mrb[89].mxu0  ;;  %v9654_v33 = vpop.f32.mrb[89].mxu1  ;;  %v7561_v44 = vsel %vm1182_vm9, %v7560_v23, %v7559_v28 }
 0x348   :  { %v4443_v36 = vpop.f32.mrb[90].mxu0  ;;  %v4537_v37 = vpop.f32.mrb[90].mxu1  ;;  %9971 = vmatpush3.bf16.msra.mxu0 %v10453_v19  ;;  %9983 = vmatpush3.bf16.msra.mxu1 %v10454_v15  ;;  %v7563_v47 = vsel %vm1185_vm10, %v7562_v29, %v7561_v44 }
 0x349   :  { %v4540_v41 = vadd.f32 %v4534_v18, %v4446_v32  ;;  %v9643_v42 = vpop.f32.mrb[91].mxu0  ;;  %v9655_v38 = vpop.f32.mrb[91].mxu1  ;;  %9972 = vmatprep.subr.bf16.mxu0 %v10467_v49  ;;  %9984 = vmatprep.subr.bf16.mxu1 %v10467_v49  ;;  %v7565_v54 = vsel %vm1188_vm11, %v7564_v35, %v7563_v47 }
 0x34a   :  { %v7567_v56 = vsel %vm1191_vm12, %v7566_v48, %v7565_v54 }
 0x34b   :  { %v7568_v58 = vpack.c.b16 %v7567_v56, %v7567_v56 }
 0x34c   :  { %9973 = vmatpush3.bf16.msra.mxu0 %v10455_v30  ;;  %9985 = vmatpush3.bf16.msra.mxu1 %v10456_v39 }
 0x34d   :  { %9974 = vmatprep.subr.bf16.mxu0 %v10467_v49  ;;  %9986 = vmatprep.subr.bf16.mxu1 %v10467_v49 }
 0x350   :  { %9975 = vmatpush3.bf16.msra.mxu0 %v7596_v52  ;;  %9987 = vmatpush3.bf16.msra.mxu1 %v7690_v53 }
 0x353   :  { %9977 = vmatmul.mubr.msk.bf16.vlgmr.msra.gmra.mrb[144].mxu0 %vm1217_vm13, %v7568_v58  ;;  %9989 = vmatmul.mubr.msk.bf16.vlgmr.msra.gmra.mrb[144].mxu1 %vm1217_vm13, %v7662_v59 }
 0x356   :  { %v4668_v49 = vpop.f32.mrb[92].mxu0  ;;  %v4762_v60 = vpop.f32.mrb[92].mxu1 }
 0x357   :  { %v4674_v62 = vadd.f32 %v4668_v49, %v4540_v41  ;;  %v9666_v63 = vpop.f32.mrb[93].mxu0  ;;  %v9678_v0 = vpop.f32.mrb[93].mxu1 }
 0x358   :  { %v4671_v1 = vpop.f32.mrb[94].mxu0  ;;  %v4765_v2 = vpop.f32.mrb[94].mxu1 }
 0x359   :  { %v4768_v3 = vadd.f32 %v4762_v60, %v4674_v62  ;;  %v9667_v4 = vpop.f32.mrb[95].mxu0  ;;  %v9679_v5 = vpop.f32.mrb[95].mxu1 }
 0x366   :  { %v4896_v6 = vpop.f32.mrb[96].mxu0  ;;  %v4990_v7 = vpop.f32.mrb[96].mxu1 }
 0x367   :  { %v4902_v8 = vadd.f32 %v4896_v6, %v4768_v3  ;;  %v9690_v9 = vpop.f32.mrb[97].mxu0  ;;  %v9702_v10 = vpop.f32.mrb[97].mxu1 }
 0x368   :  { %v4899_v12 = vpop.f32.mrb[98].mxu0  ;;  %v4993_v13 = vpop.f32.mrb[98].mxu1 }
 0x369   :  { %v4996_v11 = vadd.f32 %v4990_v7, %v4902_v8  ;;  %v9691_v61 = vpop.f32.mrb[99].mxu0  ;;  %v9703_v14 = vpop.f32.mrb[99].mxu1 }
 0x376   :  { %v5124_v16 = vpop.f32.mrb[100].mxu0  ;;  %v5218_v17 = vpop.f32.mrb[100].mxu1 }
 0x377   :  { %v5130_v19 = vadd.f32 %v5124_v16, %v4996_v11  ;;  %v9714_v15 = vpop.f32.mrb[101].mxu0  ;;  %v9726_v21 = vpop.f32.mrb[101].mxu1 }
 0x378   :  { %v5127_v22 = vpop.f32.mrb[102].mxu0  ;;  %v5221_v20 = vpop.f32.mrb[102].mxu1 }
 0x379   :  { %v5224_v23 = vadd.f32 %v5218_v17, %v5130_v19  ;;  %v9715_v24 = vpop.f32.mrb[103].mxu0  ;;  %v9727_v26 = vpop.f32.mrb[103].mxu1 }
 0x386   :  { %v5352_v27 = vpop.f32.mrb[104].mxu0  ;;  %v5446_v18 = vpop.f32.mrb[104].mxu1 }
 0x387   :  { %v5358_v28 = vadd.f32 %v5352_v27, %v5224_v23  ;;  %v9738_v29 = vpop.f32.mrb[105].mxu0  ;;  %v9750_v31 = vpop.f32.mrb[105].mxu1 }
 0x388   :  { %v5355_v25 = vpop.f32.mrb[106].mxu0  ;;  %v5449_v32 = vpop.f32.mrb[106].mxu1 }
 0x389   :  { %v5452_v34 = vadd.f32 %v5446_v18, %v5358_v28  ;;  %v9739_v33 = vpop.f32.mrb[107].mxu0  ;;  %v9751_v30 = vpop.f32.mrb[107].mxu1 }
 0x396   :  { %v5580_v36 = vpop.f32.mrb[108].mxu0  ;;  %v5674_v37 = vpop.f32.mrb[108].mxu1 }
 0x397   :  { %v5586_v39 = vadd.f32 %v5580_v36, %v5452_v34  ;;  %v9762_v40 = vpop.f32.mrb[109].mxu0  ;;  %v9774_v35 = vpop.f32.mrb[109].mxu1 }
 0x398   :  { %v5583_v41 = vpop.f32.mrb[110].mxu0  ;;  %v5677_v42 = vpop.f32.mrb[110].mxu1 }
 0x399   :  { %v5680_v38 = vadd.f32 %v5674_v37, %v5586_v39  ;;  %v9763_v43 = vpop.f32.mrb[111].mxu0  ;;  %v9775_v44 = vpop.f32.mrb[111].mxu1 }
 0x3a6   :  { %v5808_v45 = vpop.f32.mrb[112].mxu0  ;;  %v5902_v46 = vpop.f32.mrb[112].mxu1 }
 0x3a7   :  { %v5814_v47 = vadd.f32 %v5808_v45, %v5680_v38  ;;  %v9786_v48 = vpop.f32.mrb[113].mxu0  ;;  %v9798_v50 = vpop.f32.mrb[113].mxu1 }
 0x3a8   :  { %v5811_v51 = vpop.f32.mrb[114].mxu0  ;;  %v5905_v52 = vpop.f32.mrb[114].mxu1 }
 0x3a9   :  { %v5908_v53 = vadd.f32 %v5902_v46, %v5814_v47  ;;  %v9787_v54 = vpop.f32.mrb[115].mxu0  ;;  %v9799_v55 = vpop.f32.mrb[115].mxu1 }
 0x3b6   :  { %v6036_v56 = vpop.f32.mrb[116].mxu0  ;;  %v6130_v57 = vpop.f32.mrb[116].mxu1 }
 0x3b7   :  { %v6042_v58 = vadd.f32 %v6036_v56, %v5908_v53  ;;  %v9810_v59 = vpop.f32.mrb[117].mxu0  ;;  %v9822_v49 = vpop.f32.mrb[117].mxu1 }
 0x3b8   :  { %v6039_v60 = vpop.f32.mrb[118].mxu0  ;;  %v6133_v62 = vpop.f32.mrb[118].mxu1 }
 0x3b9   :  { %v6136_v63 = vadd.f32 %v6130_v57, %v6042_v58  ;;  %v9811_v0 = vpop.f32.mrb[119].mxu0  ;;  %v9823_v1 = vpop.f32.mrb[119].mxu1 }
 0x3c6   :  { %v6264_v2 = vpop.f32.mrb[120].mxu0  ;;  %v6358_v3 = vpop.f32.mrb[120].mxu1 }
 0x3c7   :  { %v6270_v4 = vadd.f32 %v6264_v2, %v6136_v63  ;;  %v9834_v5 = vpop.f32.mrb[121].mxu0  ;;  %v9846_v6 = vpop.f32.mrb[121].mxu1 }
 0x3c8   :  { %v6267_v7 = vpop.f32.mrb[122].mxu0  ;;  %v6361_v8 = vpop.f32.mrb[122].mxu1 }
 0x3c9   :  { %v6364_v9 = vadd.f32 %v6358_v3, %v6270_v4  ;;  %v9835_v10 = vpop.f32.mrb[123].mxu0  ;;  %v9847_v12 = vpop.f32.mrb[123].mxu1  ;;  %v8821_v3 = vld [vmem:[%s12423_s2] ss:$0 sm:$0xff] }
 0x3d6   :  { %v6492_v13 = vpop.f32.mrb[124].mxu0  ;;  %v6586_v11 = vpop.f32.mrb[124].mxu1 }
 0x3d7   :  { %v6498_v61 = vadd.f32 %v6492_v13, %v6364_v9  ;;  %v9858_v14 = vpop.f32.mrb[125].mxu0  ;;  %v9870_v16 = vpop.f32.mrb[125].mxu1 }
 0x3d8   :  { %v6495_v17 = vpop.f32.mrb[126].mxu0  ;;  %v6589_v19 = vpop.f32.mrb[126].mxu1 }
 0x3d9   :  { %v6592_v15 = vadd.f32 %v6586_v11, %v6498_v61  ;;  %v9859_v21 = vpop.f32.mrb[127].mxu0  ;;  %v9871_v22 = vpop.f32.mrb[127].mxu1 }
 0x3e6   :  { %v6720_v20 = vpop.f32.mrb[128].mxu0  ;;  %v6814_v23 = vpop.f32.mrb[128].mxu1 }
 0x3e7   :  { %v6726_v24 = vadd.f32 %v6720_v20, %v6592_v15  ;;  %v9882_v26 = vpop.f32.mrb[129].mxu0  ;;  %v9894_v27 = vpop.f32.mrb[129].mxu1 }
 0x3e8   :  { %v6723_v18 = vpop.f32.mrb[130].mxu0  ;;  %v6817_v28 = vpop.f32.mrb[130].mxu1 }
 0x3e9   :  { %v6820_v29 = vadd.f32 %v6814_v23, %v6726_v24  ;;  %v9883_v31 = vpop.f32.mrb[131].mxu0  ;;  %v9895_v25 = vpop.f32.mrb[131].mxu1 }
 0x3f6   :  { %v6948_v32 = vpop.f32.mrb[132].mxu0  ;;  %v7042_v34 = vpop.f32.mrb[132].mxu1 }
 0x3f7   :  { %v6954_v33 = vadd.f32 %v6948_v32, %v6820_v29  ;;  %v9906_v30 = vpop.f32.mrb[133].mxu0  ;;  %v9918_v36 = vpop.f32.mrb[133].mxu1 }
 0x3f8   :  { %v6951_v37 = vpop.f32.mrb[134].mxu0  ;;  %v7045_v39 = vpop.f32.mrb[134].mxu1 }
 0x3f9   :  { %v7048_v40 = vadd.f32 %v7042_v34, %v6954_v33  ;;  %v9907_v35 = vpop.f32.mrb[135].mxu0  ;;  %v9919_v41 = vpop.f32.mrb[135].mxu1 }
 0x406   :  { %v7176_v42 = vpop.f32.mrb[136].mxu0  ;;  %v7270_v38 = vpop.f32.mrb[136].mxu1 }
 0x407   :  { %v7182_v43 = vadd.f32 %v7176_v42, %v7048_v40  ;;  %v9930_v44 = vpop.f32.mrb[137].mxu0  ;;  %v9942_v45 = vpop.f32.mrb[137].mxu1 }
 0x408   :  { %v7179_v46 = vpop.f32.mrb[138].mxu0  ;;  %v7273_v47 = vpop.f32.mrb[138].mxu1 }
 0x409   :  { %v7276_v48 = vadd.f32 %v7270_v38, %v7182_v43  ;;  %v9931_v50 = vpop.f32.mrb[139].mxu0  ;;  %v9943_v51 = vpop.f32.mrb[139].mxu1 }
 0x416   :  { %v7404_v52 = vpop.f32.mrb[140].mxu0  ;;  %v7498_v53 = vpop.f32.mrb[140].mxu1 }
 0x417   :  { %v7410_v54 = vadd.f32 %v7404_v52, %v7276_v48  ;;  %v9954_v55 = vpop.f32.mrb[141].mxu0  ;;  %v9966_v56 = vpop.f32.mrb[141].mxu1 }
 0x418   :  { %v7407_v57 = vpop.f32.mrb[142].mxu0  ;;  %v7501_v58 = vpop.f32.mrb[142].mxu1 }
 0x419   :  { %v7504_v59 = vadd.f32 %v7498_v53, %v7410_v54  ;;  %v9955_v49 = vpop.f32.mrb[143].mxu0  ;;  %v9967_v60 = vpop.f32.mrb[143].mxu1 }
 0x426   :  { %v7632_v62 = vpop.f32.mrb[144].mxu0  ;;  %v7726_v63 = vpop.f32.mrb[144].mxu1 }
 0x427   :  { %v7638_v0 = vadd.f32 %v7632_v62, %v7504_v59  ;;  %v9978_v1 = vpop.f32.mrb[145].mxu0  ;;  %v9990_v2 = vpop.f32.mrb[145].mxu1 }
 0x428   :  { %v7635_v4 = vpop.f32.mrb[146].mxu0  ;;  %v7729_v5 = vpop.f32.mrb[146].mxu1 }
 0x429   :  { %v7732_v6 = vadd.f32 %v7726_v63, %v7638_v0  ;;  %v9979_v7 = vpop.f32.mrb[147].mxu0  ;;  %v9991_v8 = vpop.f32.mrb[147].mxu1 }
 0x42b   :  { %v7740_v9 = vadd.f32 %v8821_v3, %v7732_v6 }
 0x42d   :  { %7742 = vst.msk [vmem:[%s12424_s3] sm:$0xff] %vm7741_vm14, %v7740_v9 }

</bundles_post_ra>
